<compile_context>
chip_gen: v7x
topology: tpu7x:2x2x1
jax: 0.10.0
libtpu: 0.0.40
codegen_flags: <defaults>
</compile_context>

<pallas_src>
import functools
import math

import numpy as np
import jax
import jax.numpy as jnp
from jax.experimental import pallas as pl
from jax.experimental.pallas import tpu as pltpu


# ----------------------------------------------------------------------------
# Fused Pallas kernel
# ----------------------------------------------------------------------------

def _fused_node_encoder_kernel(
    units_ref,    # [T*N, 1] int32 token ids (row-major flatten of [T, N])
    sel_ref,      # [B*SP, N]    f32 static 0/1 _cut_batch packing matrix
    bias_ref,     # [B*SP, B*SP] f32 static block-diag + key-padding bias
    selout_ref,   # [S*B, B*SP]  f32 static 0/1 output-row-layout matrix
    pe_ref,       # [PE_MAX, E]  positional encoding table
    emb_ref,      # [V, E]       token embedding table
    wih_ref,      # [E, 4H]      LSTM input weights, gates stacked (i|f|g|o)
    whh_ref,      # [H, 4H]
    bl_ref,       # [1, 4H]      summed LSTM bias (b_ih + b_hh)
    cw_ref,       # [H, E]       concat_layer weight (bias=False)
    inw_ref,      # [L, E, 3E]   attention in_proj
    inb_ref,      # [L, 1, 3E]
    outw_ref,     # [L, E, E]    attention out_proj
    outb_ref,     # [L, 1, E]
    ln1g_ref, ln1b_ref,          # [L, 1, E]
    ff1w_ref,     # [L, E, F]
    ff1b_ref,     # [L, 1, F]
    ff2w_ref,     # [L, F, E]
    ff2b_ref,     # [L, 1, E]
    ln2g_ref, ln2b_ref,          # [L, 1, E]
    o_ref,        # [S*B, E]  rows in [s-major, b-minor] order
    *, n_heads, pad_id, seq_pad):
    f32 = jnp.float32
    bf16 = jnp.bfloat16
    TN = units_ref.shape[0]
    V, E = emb_ref.shape
    H = whh_ref.shape[0]
    L = inw_ref.shape[0]
    SP = seq_pad
    BSP, N = sel_ref.shape
    B = BSP // SP
    T = TN // N
    NH = n_heads
    D = E // NH
    scale = 1.0 / math.sqrt(D)

    def mm(a, b):        # bf16 MXU operands, f32 accumulation
        return jnp.dot(a.astype(bf16), b.astype(bf16),
                       preferred_element_type=f32)

    def mm_t(a, b):      # a @ b.T (rhs-transposed MXU matmul)
        return jax.lax.dot_general(
            a.astype(bf16), b.astype(bf16),
            (((1,), (1,)), ((), ())), preferred_element_type=f32)

    # ---- embedding gather (one-hot matmul) fused with LSTM input projection,
    #      hoisted out of the recurrence -------------------------------------
    ids = units_ref[...]                                           # [T*N, 1]
    vocab_iota = jax.lax.broadcasted_iota(jnp.int32, (TN, V), 1)
    onehot = jnp.where(ids == vocab_iota, 1.0, 0.0)                # [T*N, V]
    emb_proj = mm(emb_ref[...], wih_ref[...])                      # [V, 4H]
    gates_x = mm(onehot, emb_proj) + bl_ref[...]                   # [T*N, 4H]
    is_pad = ids == pad_id                                         # [T*N, 1]

    whh = whh_ref[...]

    # ---- LSTM recurrence (pack_padded semantics via running alive mask) ----
    h = jnp.zeros((N, H), f32)
    c = jnp.zeros((N, H), f32)
    alive = jnp.ones((N, 1), jnp.bool_)
    for t in range(T):                       # fully unrolled, h/c stay in vregs
        r = t * N
        gates = gates_x[r:r + N, :] + mm(h, whh)                   # [N, 4H]
        sig = jax.nn.sigmoid(gates)          # one full-width EUP pass (i,f,o)
        i_g = sig[:, 0 * H:1 * H]
        f_g = sig[:, 1 * H:2 * H]
        o_g = sig[:, 3 * H:4 * H]
        g_g = jnp.tanh(gates[:, 2 * H:3 * H])
        c_new = f_g * c + i_g * g_g
        h_new = o_g * jnp.tanh(c_new)
        # alive goes False at the first pad token and stays False -> frozen h/c
        alive = jnp.logical_and(alive, jnp.logical_not(is_pad[r:r + N, :]))
        h = jnp.where(alive, h_new, h)
        c = jnp.where(alive, c_new, c)

    # ---- concat linear + _cut_batch packing + positional encoding -----------
    enc = mm(h, cw_ref[...])                                       # [N, E]
    pe_sp = pe_ref[0:SP, :]                                        # [SP, E]
    pe_rep = jnp.concatenate([pe_sp] * B, axis=0)                  # [B*SP, E]
    # Static selection matmul: aligned, no slice/concat relayouts; padded rows
    # end up as pure PE, matching PyTorch's zero-padded _cut_batch output.
    x2d = jnp.dot(sel_ref[...], enc, preferred_element_type=f32) + pe_rep

    bias_full = bias_ref[...]                                      # [B*SP, B*SP]

    def layer_norm(y, g, b):
        mean = jnp.mean(y, axis=-1, keepdims=True)
        var = jnp.mean(jnp.square(y - mean), axis=-1, keepdims=True)
        return (y - mean) * jax.lax.rsqrt(var + 1e-5) * g + b

    # ---- Transformer encoder (post-norm, relu, eval) -------------------------
    for l in range(L):
        qkv = mm(x2d, inw_ref[l]) + inb_ref[l]                     # [B*SP, 3E]
        q = qkv[:, 0:E] * scale              # fold 1/sqrt(D) into Q once
        k = qkv[:, E:2 * E]
        v = qkv[:, 2 * E:3 * E]
        head_outs = []
        for hh in range(NH):
            cs = slice(hh * D, (hh + 1) * D)
            s = mm_t(q[:, cs], k[:, cs]) + bias_full               # [B*SP, B*SP]
            s = s - jnp.max(s, axis=-1, keepdims=True)
            p = jnp.exp(s)
            denom = jnp.sum(p, axis=-1, keepdims=True)
            p = p * pl.reciprocal(denom, approx=True)
            head_outs.append(mm(p, v[:, cs]))                      # [B*SP, D]
        attn = jnp.concatenate(head_outs, axis=-1)                 # [B*SP, E]
        attn = mm(attn, outw_ref[l]) + outb_ref[l]
        x2d = layer_norm(x2d + attn, ln1g_ref[l], ln1b_ref[l])
        ff = jnp.maximum(mm(x2d, ff1w_ref[l]) + ff1b_ref[l], 0.0)
        ff = mm(ff, ff2w_ref[l]) + ff2b_ref[l]
        x2d = layer_norm(x2d + ff, ln2g_ref[l], ln2b_ref[l])

    # ---- reorder rows to [s-major, b-minor] and store once (lane-dense) -----
    o_ref[...] = jnp.dot(selout_ref[...], x2d, preferred_element_type=f32)


# ----------------------------------------------------------------------------
# Wrapper: static packing/mask matrices + single pallas_call (no XLA glue ops
# besides a free bitcast reshape on each side).
# ----------------------------------------------------------------------------

def node_encoder_forward(params, units, unit_per_data, paths=None,
                         path_per_data=None, *, pad_id, n_heads):
    del paths, path_per_data           # unused by the forward (as in PyTorch)
    T, N = units.shape
    B = len(unit_per_data)
    S = max(unit_per_data)
    SP = ((S + 7) // 8) * 8            # pad sequence dim to 8-sublane multiple
    E = params["embedding"].shape[1]
    assert params["pe"].shape[0] >= SP
    assert sum(unit_per_data) == N

    units_flat = units.reshape(T * N, 1).astype(jnp.int32)   # free bitcast

    # Static (compile-time) selection / bias matrices from python lengths.
    starts = np.cumsum([0] + list(unit_per_data))[:-1]
    sel_np = np.zeros((B * SP, N), np.float32)
    bias_np = np.full((B * SP, B * SP), -1e9, np.float32)
    selout_np = np.zeros((S * B, B * SP), np.float32)
    mask_np = np.ones((S, B), bool)
    for b, (st, n) in enumerate(zip(starts, unit_per_data)):
        for s_ in range(n):
            sel_np[b * SP + s_, st + s_] = 1.0
        bias_np[b * SP:(b + 1) * SP, b * SP:b * SP + n] = 0.0
        mask_np[:n, b] = False
    for s_ in range(S):
        for b in range(B):
            selout_np[s_ * B + b, b * SP + s_] = 1.0
    attention_mask = jnp.asarray(mask_np)                    # [S, B], True = pad

    inputs = (units_flat, jnp.asarray(sel_np), jnp.asarray(bias_np),
              jnp.asarray(selout_np), params["pe"], params["embedding"],
              params["lstm_w_ih"], params["lstm_w_hh"], params["lstm_b"],
              params["concat_w"],
              params["in_w"], params["in_b"], params["out_w"], params["out_b"],
              params["ln1_g"], params["ln1_b"],
              params["ff1_w"], params["ff1_b"],
              params["ff2_w"], params["ff2_b"],
              params["ln2_g"], params["ln2_b"])

    def _full_spec(arr):
        nd = arr.ndim
        return pl.BlockSpec(arr.shape, lambda *_, _nd=nd: (0,) * _nd)

    kernel = functools.partial(
        _fused_node_encoder_kernel,
        n_heads=n_heads, pad_id=pad_id, seq_pad=SP)

    out_flat = pl.pallas_call(
        kernel,
        out_shape=jax.ShapeDtypeStruct((S * B, E), jnp.float32),
        grid=(1,),
        in_specs=[_full_spec(a) for a in inputs],
        out_specs=pl.BlockSpec((S * B, E), lambda i: (0, 0)),
        compiler_params=pltpu.CompilerParams(
            dimension_semantics=("arbitrary",)),
    )(*inputs)

    out = out_flat.reshape(S, B, E)    # row-major leading-dim split: free bitcast
    return out, attention_mask


# ----------------------------------------------------------------------------
# Parameter setup
# ----------------------------------------------------------------------------

def _normal(key, shape, scale=0.05):
    return scale * jax.random.normal(key, shape, dtype=jnp.float32)


def init_params(key, vocab_size, emb_size, rnn_size, ffn_dim, n_layers,
                max_len=64):
    E, H, F, L = emb_size, rnn_size, ffn_dim, n_layers
    keys = iter(jax.random.split(key, 16 + 8 * n_layers))
    params = {}
    params["embedding"] = _normal(next(keys), (vocab_size, E))
    # LSTM weights with gates stacked along the output dim (i|f|g|o) -> 4H.
    params["lstm_w_ih"] = _normal(next(keys), (E, 4 * H))
    params["lstm_w_hh"] = _normal(next(keys), (H, 4 * H))
    b_ih = _normal(next(keys), (1, 4 * H))
    b_hh = _normal(next(keys), (1, 4 * H))
    params["lstm_b"] = b_ih + b_hh
    params["concat_w"] = _normal(next(keys), (H, E))       # Linear(H->E), no bias
    # sinusoidal positional encoding table [max_len, E]
    pos = jnp.arange(max_len, dtype=jnp.float32)[:, None]
    div = jnp.exp(jnp.arange(0, E, 2, dtype=jnp.float32) * (-math.log(1e4) / E))
    pe = jnp.zeros((max_len, E), jnp.float32)
    pe = pe.at[:, 0::2].set(jnp.sin(pos * div))
    pe = pe.at[:, 1::2].set(jnp.cos(pos * div))
    params["pe"] = pe
    # Transformer layer params stacked on a leading layer dim.
    in_w, out_w, ff1_w, ff2_w = [], [], [], []
    for _ in range(L):
        in_w.append(_normal(next(keys), (E, 3 * E)))
        out_w.append(_normal(next(keys), (E, E)))
        ff1_w.append(_normal(next(keys), (E, F)))
        ff2_w.append(_normal(next(keys), (F, E)))
    params["in_w"] = jnp.stack(in_w)
    params["in_b"] = jnp.zeros((L, 1, 3 * E), jnp.float32)
    params["out_w"] = jnp.stack(out_w)
    params["out_b"] = jnp.zeros((L, 1, E), jnp.float32)
    params["ln1_g"] = jnp.ones((L, 1, E), jnp.float32)
    params["ln1_b"] = jnp.zeros((L, 1, E), jnp.float32)
    params["ff1_w"] = jnp.stack(ff1_w)
    params["ff1_b"] = jnp.zeros((L, 1, F), jnp.float32)
    params["ff2_w"] = jnp.stack(ff2_w)
    params["ff2_b"] = jnp.zeros((L, 1, E), jnp.float32)
    params["ln2_g"] = jnp.ones((L, 1, E), jnp.float32)
    params["ln2_b"] = jnp.zeros((L, 1, E), jnp.float32)
    return params


# ----------------------------------------------------------------------------
# Main
# ----------------------------------------------------------------------------

if __name__ == "__main__":
    VOCAB, E, H, FFN = 64, 32, 32, 64
    N_LAYERS, N_HEADS = 2, 4
    PAD_ID = 0
    T, N_UNITS = 8, 12
    unit_per_data = [5, 7]          # sums to N_UNITS

    key = jax.random.PRNGKey(0)
    pkey, tkey, lkey = jax.random.split(key, 3)
    params = init_params(pkey, VOCAB, E, H, FFN, N_LAYERS)

    # token ids in [1, VOCAB); pad the tail of each unit to variable lengths
    units = jax.random.randint(tkey, (T, N_UNITS), 1, VOCAB, dtype=jnp.int32)
    lens = jax.random.randint(lkey, (N_UNITS,), 2, T + 1, dtype=jnp.int32)
    units = jnp.where(jnp.arange(T)[:, None] < lens[None, :], units, PAD_ID)

    fwd = jax.jit(
        node_encoder_forward,
        static_argnames=("unit_per_data", "pad_id", "n_heads"))
    out, attn_mask = fwd(params, units, unit_per_data=tuple(unit_per_data),
                         pad_id=PAD_ID, n_heads=N_HEADS)
    jax.block_until_ready(out)
    jax.block_until_ready(attn_mask)
    assert out.shape == (max(unit_per_data), len(unit_per_data), E)
    assert attn_mask.shape == (max(unit_per_data), len(unit_per_data))
    print("KERNEL_OK")
</pallas_src>

<mosaic_0001>
module attributes {stable_mosaic.version = 11 : i64} {
  func.func @_fused_node_encoder_kernel(%arg0: i32, %arg1: memref<96x1xi32, #tpu.memory_space<vmem>>, %arg2: memref<16x12xf32, #tpu.memory_space<vmem>>, %arg3: memref<16x16xf32, #tpu.memory_space<vmem>>, %arg4: memref<14x16xf32, #tpu.memory_space<vmem>>, %arg5: memref<64x32xf32, #tpu.memory_space<vmem>>, %arg6: memref<64x32xf32, #tpu.memory_space<vmem>>, %arg7: memref<32x128xf32, #tpu.memory_space<vmem>>, %arg8: memref<32x128xf32, #tpu.memory_space<vmem>>, %arg9: memref<1x128xf32, #tpu.memory_space<vmem>>, %arg10: memref<32x32xf32, #tpu.memory_space<vmem>>, %arg11: memref<2x32x96xf32, #tpu.memory_space<vmem>>, %arg12: memref<2x1x96xf32, #tpu.memory_space<vmem>>, %arg13: memref<2x32x32xf32, #tpu.memory_space<vmem>>, %arg14: memref<2x1x32xf32, #tpu.memory_space<vmem>>, %arg15: memref<2x1x32xf32, #tpu.memory_space<vmem>>, %arg16: memref<2x1x32xf32, #tpu.memory_space<vmem>>, %arg17: memref<2x32x64xf32, #tpu.memory_space<vmem>>, %arg18: memref<2x1x64xf32, #tpu.memory_space<vmem>>, %arg19: memref<2x64x32xf32, #tpu.memory_space<vmem>>, %arg20: memref<2x1x32xf32, #tpu.memory_space<vmem>>, %arg21: memref<2x1x32xf32, #tpu.memory_space<vmem>>, %arg22: memref<2x1x32xf32, #tpu.memory_space<vmem>>, %arg23: memref<14x32xf32, #tpu.memory_space<vmem>>) attributes {dimension_semantics = [#tpu.dimension_semantics<arbitrary>], iteration_bounds = array<i64: 1>, scalar_prefetch = 0 : i64, scratch_operands = 0 : i64, tpu.core_type = #tpu.core_type<tc>, window_params = [{pipeline_mode = #tpu.pipeline_mode<synchronous>, transform_indices = @transform_0, window_bounds = array<i64: 96, 1>}, {pipeline_mode = #tpu.pipeline_mode<synchronous>, transform_indices = @transform_1, window_bounds = array<i64: 16, 12>}, {pipeline_mode = #tpu.pipeline_mode<synchronous>, transform_indices = @transform_2, window_bounds = array<i64: 16, 16>}, {pipeline_mode = #tpu.pipeline_mode<synchronous>, transform_indices = @transform_3, window_bounds = array<i64: 14, 16>}, {pipeline_mode = #tpu.pipeline_mode<synchronous>, transform_indices = @transform_4, window_bounds = array<i64: 64, 32>}, {pipeline_mode = #tpu.pipeline_mode<synchronous>, transform_indices = @transform_5, window_bounds = array<i64: 64, 32>}, {pipeline_mode = #tpu.pipeline_mode<synchronous>, transform_indices = @transform_6, window_bounds = array<i64: 32, 128>}, {pipeline_mode = #tpu.pipeline_mode<synchronous>, transform_indices = @transform_7, window_bounds = array<i64: 32, 128>}, {pipeline_mode = #tpu.pipeline_mode<synchronous>, transform_indices = @transform_8, window_bounds = array<i64: 1, 128>}, {pipeline_mode = #tpu.pipeline_mode<synchronous>, transform_indices = @transform_9, window_bounds = array<i64: 32, 32>}, {pipeline_mode = #tpu.pipeline_mode<synchronous>, transform_indices = @transform_10, window_bounds = array<i64: 2, 32, 96>}, {pipeline_mode = #tpu.pipeline_mode<synchronous>, transform_indices = @transform_11, window_bounds = array<i64: 2, 1, 96>}, {pipeline_mode = #tpu.pipeline_mode<synchronous>, transform_indices = @transform_12, window_bounds = array<i64: 2, 32, 32>}, {pipeline_mode = #tpu.pipeline_mode<synchronous>, transform_indices = @transform_13, window_bounds = array<i64: 2, 1, 32>}, {pipeline_mode = #tpu.pipeline_mode<synchronous>, transform_indices = @transform_14, window_bounds = array<i64: 2, 1, 32>}, {pipeline_mode = #tpu.pipeline_mode<synchronous>, transform_indices = @transform_15, window_bounds = array<i64: 2, 1, 32>}, {pipeline_mode = #tpu.pipeline_mode<synchronous>, transform_indices = @transform_16, window_bounds = array<i64: 2, 32, 64>}, {pipeline_mode = #tpu.pipeline_mode<synchronous>, transform_indices = @transform_17, window_bounds = array<i64: 2, 1, 64>}, {pipeline_mode = #tpu.pipeline_mode<synchronous>, transform_indices = @transform_18, window_bounds = array<i64: 2, 64, 32>}, {pipeline_mode = #tpu.pipeline_mode<synchronous>, transform_indices = @transform_19, window_bounds = array<i64: 2, 1, 32>}, {pipeline_mode = #tpu.pipeline_mode<synchronous>, transform_indices = @transform_20, window_bounds = array<i64: 2, 1, 32>}, {pipeline_mode = #tpu.pipeline_mode<synchronous>, transform_indices = @transform_21, window_bounds = array<i64: 2, 1, 32>}, {pipeline_mode = #tpu.pipeline_mode<synchronous>, transform_indices = @transform_22, window_bounds = array<i64: 14, 32>}]} {
    %c0 = arith.constant 0 : index
    %c0_0 = arith.constant 0 : index
    %0 = vector.load %arg1[%c0, %c0_0] : memref<96x1xi32, #tpu.memory_space<vmem>>, vector<96x1xi32>
    %1 = tpu.iota {dimensions = array<i32: 1>} : vector<96x64xi32>
    %2 = vector.broadcast %0 : vector<96x1xi32> to vector<96x64xi32>
    %3 = arith.cmpi eq, %2, %1 : vector<96x64xi32>
    %cst = arith.constant 1.000000e+00 : f32
    %cst_1 = arith.constant 0.000000e+00 : f32
    %4 = vector.broadcast %cst : f32 to vector<96x64xf32>
    %5 = vector.broadcast %cst_1 : f32 to vector<96x64xf32>
    %6 = arith.select %3, %4, %5 : vector<96x64xi1>, vector<96x64xf32>
    %c0_2 = arith.constant 0 : index
    %c0_3 = arith.constant 0 : index
    %7 = vector.load %arg6[%c0_2, %c0_3] : memref<64x32xf32, #tpu.memory_space<vmem>>, vector<64x32xf32>
    %c0_4 = arith.constant 0 : index
    %c0_5 = arith.constant 0 : index
    %8 = vector.load %arg7[%c0_4, %c0_5] : memref<32x128xf32, #tpu.memory_space<vmem>>, vector<32x128xf32>
    %9 = arith.truncf %7 : vector<64x32xf32> to vector<64x32xbf16>
    %10 = arith.truncf %8 : vector<32x128xf32> to vector<32x128xbf16>
    %cst_6 = arith.constant dense<0.000000e+00> : vector<64x128xf32>
    %11 = tpu.matmul %9, %10, %cst_6 {dimension_numbers = #tpu.dot_dimension_numbers<[1], [0], [0], [1], [0, 0, 1, 1], [], []>} : vector<64x32xbf16>, vector<32x128xbf16>, vector<64x128xf32> -> vector<64x128xf32>
    %12 = arith.truncf %6 : vector<96x64xf32> to vector<96x64xbf16>
    %13 = arith.truncf %11 : vector<64x128xf32> to vector<64x128xbf16>
    %cst_7 = arith.constant dense<0.000000e+00> : vector<96x128xf32>
    %14 = tpu.matmul %12, %13, %cst_7 {dimension_numbers = #tpu.dot_dimension_numbers<[1], [0], [0], [1], [0, 0, 1, 1], [], []>} : vector<96x64xbf16>, vector<64x128xbf16>, vector<96x128xf32> -> vector<96x128xf32>
    %c0_8 = arith.constant 0 : index
    %c0_9 = arith.constant 0 : index
    %15 = vector.load %arg9[%c0_8, %c0_9] : memref<1x128xf32, #tpu.memory_space<vmem>>, vector<1x128xf32>
    %16 = vector.broadcast %15 : vector<1x128xf32> to vector<96x128xf32>
    %17 = arith.addf %14, %16 : vector<96x128xf32>
    %c0_i32 = arith.constant 0 : i32
    %18 = vector.broadcast %c0_i32 : i32 to vector<96x1xi32>
    %19 = arith.cmpi eq, %0, %18 : vector<96x1xi32>
    %c0_10 = arith.constant 0 : index
    %c0_11 = arith.constant 0 : index
    %20 = vector.load %arg8[%c0_10, %c0_11] : memref<32x128xf32, #tpu.memory_space<vmem>>, vector<32x128xf32>
    %cst_12 = arith.constant 0.000000e+00 : f32
    %21 = vector.broadcast %cst_12 : f32 to vector<12x32xf32>
    %cst_13 = arith.constant 0.000000e+00 : f32
    %22 = vector.broadcast %cst_13 : f32 to vector<12x32xf32>
    %true = arith.constant true
    %23 = vector.broadcast %true : i1 to vector<12x1xi1>
    %24 = vector.extract_strided_slice %17 {offsets = [0, 0], sizes = [12, 128], strides = [1, 1]} : vector<96x128xf32> to vector<12x128xf32>
    %25 = arith.truncf %21 : vector<12x32xf32> to vector<12x32xbf16>
    %26 = arith.truncf %20 : vector<32x128xf32> to vector<32x128xbf16>
    %cst_14 = arith.constant dense<0.000000e+00> : vector<12x128xf32>
    %27 = tpu.matmul %25, %26, %cst_14 {dimension_numbers = #tpu.dot_dimension_numbers<[1], [0], [0], [1], [0, 0, 1, 1], [], []>} : vector<12x32xbf16>, vector<32x128xbf16>, vector<12x128xf32> -> vector<12x128xf32>
    %28 = arith.addf %24, %27 : vector<12x128xf32>
    %29 = arith.negf %28 : vector<12x128xf32>
    %30 = math.exp %29 : vector<12x128xf32>
    %cst_15 = arith.constant 1.000000e+00 : f32
    %31 = vector.broadcast %cst_15 : f32 to vector<12x128xf32>
    %32 = arith.addf %31, %30 : vector<12x128xf32>
    %33 = arith.divf %31, %32 : vector<12x128xf32>
    %34 = vector.extract_strided_slice %33 {offsets = [0, 0], sizes = [12, 32], strides = [1, 1]} : vector<12x128xf32> to vector<12x32xf32>
    %35 = vector.extract_strided_slice %33 {offsets = [0, 32], sizes = [12, 32], strides = [1, 1]} : vector<12x128xf32> to vector<12x32xf32>
    %36 = vector.extract_strided_slice %33 {offsets = [0, 96], sizes = [12, 32], strides = [1, 1]} : vector<12x128xf32> to vector<12x32xf32>
    %37 = vector.extract_strided_slice %28 {offsets = [0, 64], sizes = [12, 32], strides = [1, 1]} : vector<12x128xf32> to vector<12x32xf32>
    %38 = math.tanh %37 : vector<12x32xf32>
    %39 = arith.mulf %35, %22 : vector<12x32xf32>
    %40 = arith.mulf %34, %38 : vector<12x32xf32>
    %41 = arith.addf %39, %40 : vector<12x32xf32>
    %42 = math.tanh %41 : vector<12x32xf32>
    %43 = arith.mulf %36, %42 : vector<12x32xf32>
    %44 = vector.extract_strided_slice %19 {offsets = [0, 0], sizes = [12, 1], strides = [1, 1]} : vector<96x1xi1> to vector<12x1xi1>
    %cst_16 = arith.constant dense<true> : vector<12x1xi1>
    %45 = arith.xori %44, %cst_16 : vector<12x1xi1>
    %46 = arith.andi %23, %45 : vector<12x1xi1>
    %47 = vector.shape_cast %46 : vector<12x1xi1> to vector<12x1xi1>
    %48 = vector.broadcast %47 : vector<12x1xi1> to vector<12x32xi1>
    %49 = arith.select %48, %43, %21 : vector<12x32xi1>, vector<12x32xf32>
    %50 = vector.shape_cast %46 : vector<12x1xi1> to vector<12x1xi1>
    %51 = vector.broadcast %50 : vector<12x1xi1> to vector<12x32xi1>
    %52 = arith.select %51, %41, %22 : vector<12x32xi1>, vector<12x32xf32>
    %53 = vector.extract_strided_slice %17 {offsets = [12, 0], sizes = [12, 128], strides = [1, 1]} : vector<96x128xf32> to vector<12x128xf32>
    %54 = arith.truncf %49 : vector<12x32xf32> to vector<12x32xbf16>
    %55 = arith.truncf %20 : vector<32x128xf32> to vector<32x128xbf16>
    %cst_17 = arith.constant dense<0.000000e+00> : vector<12x128xf32>
    %56 = tpu.matmul %54, %55, %cst_17 {dimension_numbers = #tpu.dot_dimension_numbers<[1], [0], [0], [1], [0, 0, 1, 1], [], []>} : vector<12x32xbf16>, vector<32x128xbf16>, vector<12x128xf32> -> vector<12x128xf32>
    %57 = arith.addf %53, %56 : vector<12x128xf32>
    %58 = arith.negf %57 : vector<12x128xf32>
    %59 = math.exp %58 : vector<12x128xf32>
    %cst_18 = arith.constant 1.000000e+00 : f32
    %60 = vector.broadcast %cst_18 : f32 to vector<12x128xf32>
    %61 = arith.addf %60, %59 : vector<12x128xf32>
    %62 = arith.divf %60, %61 : vector<12x128xf32>
    %63 = vector.extract_strided_slice %62 {offsets = [0, 0], sizes = [12, 32], strides = [1, 1]} : vector<12x128xf32> to vector<12x32xf32>
    %64 = vector.extract_strided_slice %62 {offsets = [0, 32], sizes = [12, 32], strides = [1, 1]} : vector<12x128xf32> to vector<12x32xf32>
    %65 = vector.extract_strided_slice %62 {offsets = [0, 96], sizes = [12, 32], strides = [1, 1]} : vector<12x128xf32> to vector<12x32xf32>
    %66 = vector.extract_strided_slice %57 {offsets = [0, 64], sizes = [12, 32], strides = [1, 1]} : vector<12x128xf32> to vector<12x32xf32>
    %67 = math.tanh %66 : vector<12x32xf32>
    %68 = arith.mulf %64, %52 : vector<12x32xf32>
    %69 = arith.mulf %63, %67 : vector<12x32xf32>
    %70 = arith.addf %68, %69 : vector<12x32xf32>
    %71 = math.tanh %70 : vector<12x32xf32>
    %72 = arith.mulf %65, %71 : vector<12x32xf32>
    %73 = vector.extract_strided_slice %19 {offsets = [12, 0], sizes = [12, 1], strides = [1, 1]} : vector<96x1xi1> to vector<12x1xi1>
    %cst_19 = arith.constant dense<true> : vector<12x1xi1>
    %74 = arith.xori %73, %cst_19 : vector<12x1xi1>
    %75 = arith.andi %46, %74 : vector<12x1xi1>
    %76 = vector.shape_cast %75 : vector<12x1xi1> to vector<12x1xi1>
    %77 = vector.broadcast %76 : vector<12x1xi1> to vector<12x32xi1>
    %78 = arith.select %77, %72, %49 : vector<12x32xi1>, vector<12x32xf32>
    %79 = vector.shape_cast %75 : vector<12x1xi1> to vector<12x1xi1>
    %80 = vector.broadcast %79 : vector<12x1xi1> to vector<12x32xi1>
    %81 = arith.select %80, %70, %52 : vector<12x32xi1>, vector<12x32xf32>
    %82 = vector.extract_strided_slice %17 {offsets = [24, 0], sizes = [12, 128], strides = [1, 1]} : vector<96x128xf32> to vector<12x128xf32>
    %83 = arith.truncf %78 : vector<12x32xf32> to vector<12x32xbf16>
    %84 = arith.truncf %20 : vector<32x128xf32> to vector<32x128xbf16>
    %cst_20 = arith.constant dense<0.000000e+00> : vector<12x128xf32>
    %85 = tpu.matmul %83, %84, %cst_20 {dimension_numbers = #tpu.dot_dimension_numbers<[1], [0], [0], [1], [0, 0, 1, 1], [], []>} : vector<12x32xbf16>, vector<32x128xbf16>, vector<12x128xf32> -> vector<12x128xf32>
    %86 = arith.addf %82, %85 : vector<12x128xf32>
    %87 = arith.negf %86 : vector<12x128xf32>
    %88 = math.exp %87 : vector<12x128xf32>
    %cst_21 = arith.constant 1.000000e+00 : f32
    %89 = vector.broadcast %cst_21 : f32 to vector<12x128xf32>
    %90 = arith.addf %89, %88 : vector<12x128xf32>
    %91 = arith.divf %89, %90 : vector<12x128xf32>
    %92 = vector.extract_strided_slice %91 {offsets = [0, 0], sizes = [12, 32], strides = [1, 1]} : vector<12x128xf32> to vector<12x32xf32>
    %93 = vector.extract_strided_slice %91 {offsets = [0, 32], sizes = [12, 32], strides = [1, 1]} : vector<12x128xf32> to vector<12x32xf32>
    %94 = vector.extract_strided_slice %91 {offsets = [0, 96], sizes = [12, 32], strides = [1, 1]} : vector<12x128xf32> to vector<12x32xf32>
    %95 = vector.extract_strided_slice %86 {offsets = [0, 64], sizes = [12, 32], strides = [1, 1]} : vector<12x128xf32> to vector<12x32xf32>
    %96 = math.tanh %95 : vector<12x32xf32>
    %97 = arith.mulf %93, %81 : vector<12x32xf32>
    %98 = arith.mulf %92, %96 : vector<12x32xf32>
    %99 = arith.addf %97, %98 : vector<12x32xf32>
    %100 = math.tanh %99 : vector<12x32xf32>
    %101 = arith.mulf %94, %100 : vector<12x32xf32>
    %102 = vector.extract_strided_slice %19 {offsets = [24, 0], sizes = [12, 1], strides = [1, 1]} : vector<96x1xi1> to vector<12x1xi1>
    %cst_22 = arith.constant dense<true> : vector<12x1xi1>
    %103 = arith.xori %102, %cst_22 : vector<12x1xi1>
    %104 = arith.andi %75, %103 : vector<12x1xi1>
    %105 = vector.shape_cast %104 : vector<12x1xi1> to vector<12x1xi1>
    %106 = vector.broadcast %105 : vector<12x1xi1> to vector<12x32xi1>
    %107 = arith.select %106, %101, %78 : vector<12x32xi1>, vector<12x32xf32>
    %108 = vector.shape_cast %104 : vector<12x1xi1> to vector<12x1xi1>
    %109 = vector.broadcast %108 : vector<12x1xi1> to vector<12x32xi1>
    %110 = arith.select %109, %99, %81 : vector<12x32xi1>, vector<12x32xf32>
    %111 = vector.extract_strided_slice %17 {offsets = [36, 0], sizes = [12, 128], strides = [1, 1]} : vector<96x128xf32> to vector<12x128xf32>
    %112 = arith.truncf %107 : vector<12x32xf32> to vector<12x32xbf16>
    %113 = arith.truncf %20 : vector<32x128xf32> to vector<32x128xbf16>
    %cst_23 = arith.constant dense<0.000000e+00> : vector<12x128xf32>
    %114 = tpu.matmul %112, %113, %cst_23 {dimension_numbers = #tpu.dot_dimension_numbers<[1], [0], [0], [1], [0, 0, 1, 1], [], []>} : vector<12x32xbf16>, vector<32x128xbf16>, vector<12x128xf32> -> vector<12x128xf32>
    %115 = arith.addf %111, %114 : vector<12x128xf32>
    %116 = arith.negf %115 : vector<12x128xf32>
    %117 = math.exp %116 : vector<12x128xf32>
    %cst_24 = arith.constant 1.000000e+00 : f32
    %118 = vector.broadcast %cst_24 : f32 to vector<12x128xf32>
    %119 = arith.addf %118, %117 : vector<12x128xf32>
    %120 = arith.divf %118, %119 : vector<12x128xf32>
    %121 = vector.extract_strided_slice %120 {offsets = [0, 0], sizes = [12, 32], strides = [1, 1]} : vector<12x128xf32> to vector<12x32xf32>
    %122 = vector.extract_strided_slice %120 {offsets = [0, 32], sizes = [12, 32], strides = [1, 1]} : vector<12x128xf32> to vector<12x32xf32>
    %123 = vector.extract_strided_slice %120 {offsets = [0, 96], sizes = [12, 32], strides = [1, 1]} : vector<12x128xf32> to vector<12x32xf32>
    %124 = vector.extract_strided_slice %115 {offsets = [0, 64], sizes = [12, 32], strides = [1, 1]} : vector<12x128xf32> to vector<12x32xf32>
    %125 = math.tanh %124 : vector<12x32xf32>
    %126 = arith.mulf %122, %110 : vector<12x32xf32>
    %127 = arith.mulf %121, %125 : vector<12x32xf32>
    %128 = arith.addf %126, %127 : vector<12x32xf32>
    %129 = math.tanh %128 : vector<12x32xf32>
    %130 = arith.mulf %123, %129 : vector<12x32xf32>
    %131 = vector.extract_strided_slice %19 {offsets = [36, 0], sizes = [12, 1], strides = [1, 1]} : vector<96x1xi1> to vector<12x1xi1>
    %cst_25 = arith.constant dense<true> : vector<12x1xi1>
    %132 = arith.xori %131, %cst_25 : vector<12x1xi1>
    %133 = arith.andi %104, %132 : vector<12x1xi1>
    %134 = vector.shape_cast %133 : vector<12x1xi1> to vector<12x1xi1>
    %135 = vector.broadcast %134 : vector<12x1xi1> to vector<12x32xi1>
    %136 = arith.select %135, %130, %107 : vector<12x32xi1>, vector<12x32xf32>
    %137 = vector.shape_cast %133 : vector<12x1xi1> to vector<12x1xi1>
    %138 = vector.broadcast %137 : vector<12x1xi1> to vector<12x32xi1>
    %139 = arith.select %138, %128, %110 : vector<12x32xi1>, vector<12x32xf32>
    %140 = vector.extract_strided_slice %17 {offsets = [48, 0], sizes = [12, 128], strides = [1, 1]} : vector<96x128xf32> to vector<12x128xf32>
    %141 = arith.truncf %136 : vector<12x32xf32> to vector<12x32xbf16>
    %142 = arith.truncf %20 : vector<32x128xf32> to vector<32x128xbf16>
    %cst_26 = arith.constant dense<0.000000e+00> : vector<12x128xf32>
    %143 = tpu.matmul %141, %142, %cst_26 {dimension_numbers = #tpu.dot_dimension_numbers<[1], [0], [0], [1], [0, 0, 1, 1], [], []>} : vector<12x32xbf16>, vector<32x128xbf16>, vector<12x128xf32> -> vector<12x128xf32>
    %144 = arith.addf %140, %143 : vector<12x128xf32>
    %145 = arith.negf %144 : vector<12x128xf32>
    %146 = math.exp %145 : vector<12x128xf32>
    %cst_27 = arith.constant 1.000000e+00 : f32
    %147 = vector.broadcast %cst_27 : f32 to vector<12x128xf32>
    %148 = arith.addf %147, %146 : vector<12x128xf32>
    %149 = arith.divf %147, %148 : vector<12x128xf32>
    %150 = vector.extract_strided_slice %149 {offsets = [0, 0], sizes = [12, 32], strides = [1, 1]} : vector<12x128xf32> to vector<12x32xf32>
    %151 = vector.extract_strided_slice %149 {offsets = [0, 32], sizes = [12, 32], strides = [1, 1]} : vector<12x128xf32> to vector<12x32xf32>
    %152 = vector.extract_strided_slice %149 {offsets = [0, 96], sizes = [12, 32], strides = [1, 1]} : vector<12x128xf32> to vector<12x32xf32>
    %153 = vector.extract_strided_slice %144 {offsets = [0, 64], sizes = [12, 32], strides = [1, 1]} : vector<12x128xf32> to vector<12x32xf32>
    %154 = math.tanh %153 : vector<12x32xf32>
    %155 = arith.mulf %151, %139 : vector<12x32xf32>
    %156 = arith.mulf %150, %154 : vector<12x32xf32>
    %157 = arith.addf %155, %156 : vector<12x32xf32>
    %158 = math.tanh %157 : vector<12x32xf32>
    %159 = arith.mulf %152, %158 : vector<12x32xf32>
    %160 = vector.extract_strided_slice %19 {offsets = [48, 0], sizes = [12, 1], strides = [1, 1]} : vector<96x1xi1> to vector<12x1xi1>
    %cst_28 = arith.constant dense<true> : vector<12x1xi1>
    %161 = arith.xori %160, %cst_28 : vector<12x1xi1>
    %162 = arith.andi %133, %161 : vector<12x1xi1>
    %163 = vector.shape_cast %162 : vector<12x1xi1> to vector<12x1xi1>
    %164 = vector.broadcast %163 : vector<12x1xi1> to vector<12x32xi1>
    %165 = arith.select %164, %159, %136 : vector<12x32xi1>, vector<12x32xf32>
    %166 = vector.shape_cast %162 : vector<12x1xi1> to vector<12x1xi1>
    %167 = vector.broadcast %166 : vector<12x1xi1> to vector<12x32xi1>
    %168 = arith.select %167, %157, %139 : vector<12x32xi1>, vector<12x32xf32>
    %169 = vector.extract_strided_slice %17 {offsets = [60, 0], sizes = [12, 128], strides = [1, 1]} : vector<96x128xf32> to vector<12x128xf32>
    %170 = arith.truncf %165 : vector<12x32xf32> to vector<12x32xbf16>
    %171 = arith.truncf %20 : vector<32x128xf32> to vector<32x128xbf16>
    %cst_29 = arith.constant dense<0.000000e+00> : vector<12x128xf32>
    %172 = tpu.matmul %170, %171, %cst_29 {dimension_numbers = #tpu.dot_dimension_numbers<[1], [0], [0], [1], [0, 0, 1, 1], [], []>} : vector<12x32xbf16>, vector<32x128xbf16>, vector<12x128xf32> -> vector<12x128xf32>
    %173 = arith.addf %169, %172 : vector<12x128xf32>
    %174 = arith.negf %173 : vector<12x128xf32>
    %175 = math.exp %174 : vector<12x128xf32>
    %cst_30 = arith.constant 1.000000e+00 : f32
    %176 = vector.broadcast %cst_30 : f32 to vector<12x128xf32>
    %177 = arith.addf %176, %175 : vector<12x128xf32>
    %178 = arith.divf %176, %177 : vector<12x128xf32>
    %179 = vector.extract_strided_slice %178 {offsets = [0, 0], sizes = [12, 32], strides = [1, 1]} : vector<12x128xf32> to vector<12x32xf32>
    %180 = vector.extract_strided_slice %178 {offsets = [0, 32], sizes = [12, 32], strides = [1, 1]} : vector<12x128xf32> to vector<12x32xf32>
    %181 = vector.extract_strided_slice %178 {offsets = [0, 96], sizes = [12, 32], strides = [1, 1]} : vector<12x128xf32> to vector<12x32xf32>
    %182 = vector.extract_strided_slice %173 {offsets = [0, 64], sizes = [12, 32], strides = [1, 1]} : vector<12x128xf32> to vector<12x32xf32>
    %183 = math.tanh %182 : vector<12x32xf32>
    %184 = arith.mulf %180, %168 : vector<12x32xf32>
    %185 = arith.mulf %179, %183 : vector<12x32xf32>
    %186 = arith.addf %184, %185 : vector<12x32xf32>
    %187 = math.tanh %186 : vector<12x32xf32>
    %188 = arith.mulf %181, %187 : vector<12x32xf32>
    %189 = vector.extract_strided_slice %19 {offsets = [60, 0], sizes = [12, 1], strides = [1, 1]} : vector<96x1xi1> to vector<12x1xi1>
    %cst_31 = arith.constant dense<true> : vector<12x1xi1>
    %190 = arith.xori %189, %cst_31 : vector<12x1xi1>
    %191 = arith.andi %162, %190 : vector<12x1xi1>
    %192 = vector.shape_cast %191 : vector<12x1xi1> to vector<12x1xi1>
    %193 = vector.broadcast %192 : vector<12x1xi1> to vector<12x32xi1>
    %194 = arith.select %193, %188, %165 : vector<12x32xi1>, vector<12x32xf32>
    %195 = vector.shape_cast %191 : vector<12x1xi1> to vector<12x1xi1>
    %196 = vector.broadcast %195 : vector<12x1xi1> to vector<12x32xi1>
    %197 = arith.select %196, %186, %168 : vector<12x32xi1>, vector<12x32xf32>
    %198 = vector.extract_strided_slice %17 {offsets = [72, 0], sizes = [12, 128], strides = [1, 1]} : vector<96x128xf32> to vector<12x128xf32>
    %199 = arith.truncf %194 : vector<12x32xf32> to vector<12x32xbf16>
    %200 = arith.truncf %20 : vector<32x128xf32> to vector<32x128xbf16>
    %cst_32 = arith.constant dense<0.000000e+00> : vector<12x128xf32>
    %201 = tpu.matmul %199, %200, %cst_32 {dimension_numbers = #tpu.dot_dimension_numbers<[1], [0], [0], [1], [0, 0, 1, 1], [], []>} : vector<12x32xbf16>, vector<32x128xbf16>, vector<12x128xf32> -> vector<12x128xf32>
    %202 = arith.addf %198, %201 : vector<12x128xf32>
    %203 = arith.negf %202 : vector<12x128xf32>
    %204 = math.exp %203 : vector<12x128xf32>
    %cst_33 = arith.constant 1.000000e+00 : f32
    %205 = vector.broadcast %cst_33 : f32 to vector<12x128xf32>
    %206 = arith.addf %205, %204 : vector<12x128xf32>
    %207 = arith.divf %205, %206 : vector<12x128xf32>
    %208 = vector.extract_strided_slice %207 {offsets = [0, 0], sizes = [12, 32], strides = [1, 1]} : vector<12x128xf32> to vector<12x32xf32>
    %209 = vector.extract_strided_slice %207 {offsets = [0, 32], sizes = [12, 32], strides = [1, 1]} : vector<12x128xf32> to vector<12x32xf32>
    %210 = vector.extract_strided_slice %207 {offsets = [0, 96], sizes = [12, 32], strides = [1, 1]} : vector<12x128xf32> to vector<12x32xf32>
    %211 = vector.extract_strided_slice %202 {offsets = [0, 64], sizes = [12, 32], strides = [1, 1]} : vector<12x128xf32> to vector<12x32xf32>
    %212 = math.tanh %211 : vector<12x32xf32>
    %213 = arith.mulf %209, %197 : vector<12x32xf32>
    %214 = arith.mulf %208, %212 : vector<12x32xf32>
    %215 = arith.addf %213, %214 : vector<12x32xf32>
    %216 = math.tanh %215 : vector<12x32xf32>
    %217 = arith.mulf %210, %216 : vector<12x32xf32>
    %218 = vector.extract_strided_slice %19 {offsets = [72, 0], sizes = [12, 1], strides = [1, 1]} : vector<96x1xi1> to vector<12x1xi1>
    %cst_34 = arith.constant dense<true> : vector<12x1xi1>
    %219 = arith.xori %218, %cst_34 : vector<12x1xi1>
    %220 = arith.andi %191, %219 : vector<12x1xi1>
    %221 = vector.shape_cast %220 : vector<12x1xi1> to vector<12x1xi1>
    %222 = vector.broadcast %221 : vector<12x1xi1> to vector<12x32xi1>
    %223 = arith.select %222, %217, %194 : vector<12x32xi1>, vector<12x32xf32>
    %224 = vector.shape_cast %220 : vector<12x1xi1> to vector<12x1xi1>
    %225 = vector.broadcast %224 : vector<12x1xi1> to vector<12x32xi1>
    %226 = arith.select %225, %215, %197 : vector<12x32xi1>, vector<12x32xf32>
    %227 = vector.extract_strided_slice %17 {offsets = [84, 0], sizes = [12, 128], strides = [1, 1]} : vector<96x128xf32> to vector<12x128xf32>
    %228 = arith.truncf %223 : vector<12x32xf32> to vector<12x32xbf16>
    %229 = arith.truncf %20 : vector<32x128xf32> to vector<32x128xbf16>
    %cst_35 = arith.constant dense<0.000000e+00> : vector<12x128xf32>
    %230 = tpu.matmul %228, %229, %cst_35 {dimension_numbers = #tpu.dot_dimension_numbers<[1], [0], [0], [1], [0, 0, 1, 1], [], []>} : vector<12x32xbf16>, vector<32x128xbf16>, vector<12x128xf32> -> vector<12x128xf32>
    %231 = arith.addf %227, %230 : vector<12x128xf32>
    %232 = arith.negf %231 : vector<12x128xf32>
    %233 = math.exp %232 : vector<12x128xf32>
    %cst_36 = arith.constant 1.000000e+00 : f32
    %234 = vector.broadcast %cst_36 : f32 to vector<12x128xf32>
    %235 = arith.addf %234, %233 : vector<12x128xf32>
    %236 = arith.divf %234, %235 : vector<12x128xf32>
    %237 = vector.extract_strided_slice %236 {offsets = [0, 0], sizes = [12, 32], strides = [1, 1]} : vector<12x128xf32> to vector<12x32xf32>
    %238 = vector.extract_strided_slice %236 {offsets = [0, 32], sizes = [12, 32], strides = [1, 1]} : vector<12x128xf32> to vector<12x32xf32>
    %239 = vector.extract_strided_slice %236 {offsets = [0, 96], sizes = [12, 32], strides = [1, 1]} : vector<12x128xf32> to vector<12x32xf32>
    %240 = vector.extract_strided_slice %231 {offsets = [0, 64], sizes = [12, 32], strides = [1, 1]} : vector<12x128xf32> to vector<12x32xf32>
    %241 = math.tanh %240 : vector<12x32xf32>
    %242 = arith.mulf %238, %226 : vector<12x32xf32>
    %243 = arith.mulf %237, %241 : vector<12x32xf32>
    %244 = arith.addf %242, %243 : vector<12x32xf32>
    %245 = math.tanh %244 : vector<12x32xf32>
    %246 = arith.mulf %239, %245 : vector<12x32xf32>
    %247 = vector.extract_strided_slice %19 {offsets = [84, 0], sizes = [12, 1], strides = [1, 1]} : vector<96x1xi1> to vector<12x1xi1>
    %cst_37 = arith.constant dense<true> : vector<12x1xi1>
    %248 = arith.xori %247, %cst_37 : vector<12x1xi1>
    %249 = arith.andi %220, %248 : vector<12x1xi1>
    %250 = vector.shape_cast %249 : vector<12x1xi1> to vector<12x1xi1>
    %251 = vector.broadcast %250 : vector<12x1xi1> to vector<12x32xi1>
    %252 = arith.select %251, %246, %223 : vector<12x32xi1>, vector<12x32xf32>
    %c0_38 = arith.constant 0 : index
    %c0_39 = arith.constant 0 : index
    %253 = vector.load %arg10[%c0_38, %c0_39] : memref<32x32xf32, #tpu.memory_space<vmem>>, vector<32x32xf32>
    %254 = arith.truncf %252 : vector<12x32xf32> to vector<12x32xbf16>
    %255 = arith.truncf %253 : vector<32x32xf32> to vector<32x32xbf16>
    %cst_40 = arith.constant dense<0.000000e+00> : vector<12x32xf32>
    %256 = tpu.matmul %254, %255, %cst_40 {dimension_numbers = #tpu.dot_dimension_numbers<[1], [0], [0], [1], [0, 0, 1, 1], [], []>} : vector<12x32xbf16>, vector<32x32xbf16>, vector<12x32xf32> -> vector<12x32xf32>
    %c0_41 = arith.constant 0 : index
    %c0_42 = arith.constant 0 : index
    %257 = vector.load %arg5[%c0_41, %c0_42] : memref<64x32xf32, #tpu.memory_space<vmem>>, vector<8x32xf32>
    %258 = tpu.concatenate %257, %257 in 0 : vector<8x32xf32>, vector<8x32xf32> -> vector<16x32xf32>
    %c0_43 = arith.constant 0 : index
    %c0_44 = arith.constant 0 : index
    %259 = vector.load %arg2[%c0_43, %c0_44] : memref<16x12xf32, #tpu.memory_space<vmem>>, vector<16x12xf32>
    %cst_45 = arith.constant dense<0.000000e+00> : vector<16x32xf32>
    %260 = tpu.matmul %259, %256, %cst_45 {dimension_numbers = #tpu.dot_dimension_numbers<[1], [0], [0], [1], [0, 0, 1, 1], [], []>} : vector<16x12xf32>, vector<12x32xf32>, vector<16x32xf32> -> vector<16x32xf32>
    %261 = arith.addf %260, %258 : vector<16x32xf32>
    %c0_46 = arith.constant 0 : index
    %c0_47 = arith.constant 0 : index
    %262 = vector.load %arg3[%c0_46, %c0_47] : memref<16x16xf32, #tpu.memory_space<vmem>>, vector<16x16xf32>
    %c0_48 = arith.constant 0 : index
    %c0_49 = arith.constant 0 : index
    %c0_50 = arith.constant 0 : index
    %263 = vector.load %arg11[%c0_48, %c0_49, %c0_50] : memref<2x32x96xf32, #tpu.memory_space<vmem>>, vector<1x32x96xf32>
    %264 = vector.shape_cast %263 : vector<1x32x96xf32> to vector<32x96xf32>
    %265 = arith.truncf %261 : vector<16x32xf32> to vector<16x32xbf16>
    %266 = arith.truncf %264 : vector<32x96xf32> to vector<32x96xbf16>
    %cst_51 = arith.constant dense<0.000000e+00> : vector<16x96xf32>
    %267 = tpu.matmul %265, %266, %cst_51 {dimension_numbers = #tpu.dot_dimension_numbers<[1], [0], [0], [1], [0, 0, 1, 1], [], []>} : vector<16x32xbf16>, vector<32x96xbf16>, vector<16x96xf32> -> vector<16x96xf32>
    %c0_52 = arith.constant 0 : index
    %c0_53 = arith.constant 0 : index
    %c0_54 = arith.constant 0 : index
    %268 = vector.load %arg12[%c0_52, %c0_53, %c0_54] : memref<2x1x96xf32, #tpu.memory_space<vmem>>, vector<1x1x96xf32>
    %269 = vector.shape_cast %268 : vector<1x1x96xf32> to vector<1x96xf32>
    %270 = vector.broadcast %269 : vector<1x96xf32> to vector<16x96xf32>
    %271 = arith.addf %267, %270 : vector<16x96xf32>
    %272 = vector.extract_strided_slice %271 {offsets = [0, 0], sizes = [16, 32], strides = [1, 1]} : vector<16x96xf32> to vector<16x32xf32>
    %cst_55 = arith.constant 0.353553385 : f32
    %273 = vector.broadcast %cst_55 : f32 to vector<16x32xf32>
    %274 = arith.mulf %272, %273 : vector<16x32xf32>
    %275 = vector.extract_strided_slice %271 {offsets = [0, 32], sizes = [16, 32], strides = [1, 1]} : vector<16x96xf32> to vector<16x32xf32>
    %276 = vector.extract_strided_slice %271 {offsets = [0, 64], sizes = [16, 32], strides = [1, 1]} : vector<16x96xf32> to vector<16x32xf32>
    %277 = vector.extract_strided_slice %274 {offsets = [0, 0], sizes = [16, 8], strides = [1, 1]} : vector<16x32xf32> to vector<16x8xf32>
    %278 = vector.extract_strided_slice %275 {offsets = [0, 0], sizes = [16, 8], strides = [1, 1]} : vector<16x32xf32> to vector<16x8xf32>
    %279 = arith.truncf %277 : vector<16x8xf32> to vector<16x8xbf16>
    %280 = arith.truncf %278 : vector<16x8xf32> to vector<16x8xbf16>
    %cst_56 = arith.constant dense<0.000000e+00> : vector<16x16xf32>
    %281 = tpu.matmul %279, %280, %cst_56 {dimension_numbers = #tpu.dot_dimension_numbers<[1], [1], [0], [0], [0, 0, 1, 0], [], []>} : vector<16x8xbf16>, vector<16x8xbf16>, vector<16x16xf32> -> vector<16x16xf32>
    %282 = arith.addf %281, %262 : vector<16x16xf32>
    %cst_57 = arith.constant dense<0xFF800000> : vector<16xf32>
    %283 = vector.multi_reduction <maximumf>, %282, %cst_57 [1] : vector<16x16xf32> to vector<16xf32>
    %284 = vector.shape_cast %283 : vector<16xf32> to vector<16x1xf32>
    %285 = vector.broadcast %284 : vector<16x1xf32> to vector<16x16xf32>
    %286 = arith.subf %282, %285 : vector<16x16xf32>
    %287 = math.exp %286 : vector<16x16xf32>
    %cst_58 = arith.constant dense<0.000000e+00> : vector<16xf32>
    %288 = vector.multi_reduction <add>, %287, %cst_58 [1] : vector<16x16xf32> to vector<16xf32>
    %289 = vector.shape_cast %288 : vector<16xf32> to vector<16x1xf32>
    %290 = tpu.reciprocal %289 {approx = true} : vector<16x1xf32> -> vector<16x1xf32>
    %291 = vector.broadcast %290 : vector<16x1xf32> to vector<16x16xf32>
    %292 = arith.mulf %287, %291 : vector<16x16xf32>
    %293 = vector.extract_strided_slice %276 {offsets = [0, 0], sizes = [16, 8], strides = [1, 1]} : vector<16x32xf32> to vector<16x8xf32>
    %294 = arith.truncf %292 : vector<16x16xf32> to vector<16x16xbf16>
    %295 = arith.truncf %293 : vector<16x8xf32> to vector<16x8xbf16>
    %cst_59 = arith.constant dense<0.000000e+00> : vector<16x8xf32>
    %296 = tpu.matmul %294, %295, %cst_59 {dimension_numbers = #tpu.dot_dimension_numbers<[1], [0], [0], [1], [0, 0, 1, 1], [], []>} : vector<16x16xbf16>, vector<16x8xbf16>, vector<16x8xf32> -> vector<16x8xf32>
    %297 = vector.extract_strided_slice %274 {offsets = [0, 8], sizes = [16, 8], strides = [1, 1]} : vector<16x32xf32> to vector<16x8xf32>
    %298 = vector.extract_strided_slice %275 {offsets = [0, 8], sizes = [16, 8], strides = [1, 1]} : vector<16x32xf32> to vector<16x8xf32>
    %299 = arith.truncf %297 : vector<16x8xf32> to vector<16x8xbf16>
    %300 = arith.truncf %298 : vector<16x8xf32> to vector<16x8xbf16>
    %cst_60 = arith.constant dense<0.000000e+00> : vector<16x16xf32>
    %301 = tpu.matmul %299, %300, %cst_60 {dimension_numbers = #tpu.dot_dimension_numbers<[1], [1], [0], [0], [0, 0, 1, 0], [], []>} : vector<16x8xbf16>, vector<16x8xbf16>, vector<16x16xf32> -> vector<16x16xf32>
    %302 = arith.addf %301, %262 : vector<16x16xf32>
    %cst_61 = arith.constant dense<0xFF800000> : vector<16xf32>
    %303 = vector.multi_reduction <maximumf>, %302, %cst_61 [1] : vector<16x16xf32> to vector<16xf32>
    %304 = vector.shape_cast %303 : vector<16xf32> to vector<16x1xf32>
    %305 = vector.broadcast %304 : vector<16x1xf32> to vector<16x16xf32>
    %306 = arith.subf %302, %305 : vector<16x16xf32>
    %307 = math.exp %306 : vector<16x16xf32>
    %cst_62 = arith.constant dense<0.000000e+00> : vector<16xf32>
    %308 = vector.multi_reduction <add>, %307, %cst_62 [1] : vector<16x16xf32> to vector<16xf32>
    %309 = vector.shape_cast %308 : vector<16xf32> to vector<16x1xf32>
    %310 = tpu.reciprocal %309 {approx = true} : vector<16x1xf32> -> vector<16x1xf32>
    %311 = vector.broadcast %310 : vector<16x1xf32> to vector<16x16xf32>
    %312 = arith.mulf %307, %311 : vector<16x16xf32>
    %313 = vector.extract_strided_slice %276 {offsets = [0, 8], sizes = [16, 8], strides = [1, 1]} : vector<16x32xf32> to vector<16x8xf32>
    %314 = arith.truncf %312 : vector<16x16xf32> to vector<16x16xbf16>
    %315 = arith.truncf %313 : vector<16x8xf32> to vector<16x8xbf16>
    %cst_63 = arith.constant dense<0.000000e+00> : vector<16x8xf32>
    %316 = tpu.matmul %314, %315, %cst_63 {dimension_numbers = #tpu.dot_dimension_numbers<[1], [0], [0], [1], [0, 0, 1, 1], [], []>} : vector<16x16xbf16>, vector<16x8xbf16>, vector<16x8xf32> -> vector<16x8xf32>
    %317 = vector.extract_strided_slice %274 {offsets = [0, 16], sizes = [16, 8], strides = [1, 1]} : vector<16x32xf32> to vector<16x8xf32>
    %318 = vector.extract_strided_slice %275 {offsets = [0, 16], sizes = [16, 8], strides = [1, 1]} : vector<16x32xf32> to vector<16x8xf32>
    %319 = arith.truncf %317 : vector<16x8xf32> to vector<16x8xbf16>
    %320 = arith.truncf %318 : vector<16x8xf32> to vector<16x8xbf16>
    %cst_64 = arith.constant dense<0.000000e+00> : vector<16x16xf32>
    %321 = tpu.matmul %319, %320, %cst_64 {dimension_numbers = #tpu.dot_dimension_numbers<[1], [1], [0], [0], [0, 0, 1, 0], [], []>} : vector<16x8xbf16>, vector<16x8xbf16>, vector<16x16xf32> -> vector<16x16xf32>
    %322 = arith.addf %321, %262 : vector<16x16xf32>
    %cst_65 = arith.constant dense<0xFF800000> : vector<16xf32>
    %323 = vector.multi_reduction <maximumf>, %322, %cst_65 [1] : vector<16x16xf32> to vector<16xf32>
    %324 = vector.shape_cast %323 : vector<16xf32> to vector<16x1xf32>
    %325 = vector.broadcast %324 : vector<16x1xf32> to vector<16x16xf32>
    %326 = arith.subf %322, %325 : vector<16x16xf32>
    %327 = math.exp %326 : vector<16x16xf32>
    %cst_66 = arith.constant dense<0.000000e+00> : vector<16xf32>
    %328 = vector.multi_reduction <add>, %327, %cst_66 [1] : vector<16x16xf32> to vector<16xf32>
    %329 = vector.shape_cast %328 : vector<16xf32> to vector<16x1xf32>
    %330 = tpu.reciprocal %329 {approx = true} : vector<16x1xf32> -> vector<16x1xf32>
    %331 = vector.broadcast %330 : vector<16x1xf32> to vector<16x16xf32>
    %332 = arith.mulf %327, %331 : vector<16x16xf32>
    %333 = vector.extract_strided_slice %276 {offsets = [0, 16], sizes = [16, 8], strides = [1, 1]} : vector<16x32xf32> to vector<16x8xf32>
    %334 = arith.truncf %332 : vector<16x16xf32> to vector<16x16xbf16>
    %335 = arith.truncf %333 : vector<16x8xf32> to vector<16x8xbf16>
    %cst_67 = arith.constant dense<0.000000e+00> : vector<16x8xf32>
    %336 = tpu.matmul %334, %335, %cst_67 {dimension_numbers = #tpu.dot_dimension_numbers<[1], [0], [0], [1], [0, 0, 1, 1], [], []>} : vector<16x16xbf16>, vector<16x8xbf16>, vector<16x8xf32> -> vector<16x8xf32>
    %337 = vector.extract_strided_slice %274 {offsets = [0, 24], sizes = [16, 8], strides = [1, 1]} : vector<16x32xf32> to vector<16x8xf32>
    %338 = vector.extract_strided_slice %275 {offsets = [0, 24], sizes = [16, 8], strides = [1, 1]} : vector<16x32xf32> to vector<16x8xf32>
    %339 = arith.truncf %337 : vector<16x8xf32> to vector<16x8xbf16>
    %340 = arith.truncf %338 : vector<16x8xf32> to vector<16x8xbf16>
    %cst_68 = arith.constant dense<0.000000e+00> : vector<16x16xf32>
    %341 = tpu.matmul %339, %340, %cst_68 {dimension_numbers = #tpu.dot_dimension_numbers<[1], [1], [0], [0], [0, 0, 1, 0], [], []>} : vector<16x8xbf16>, vector<16x8xbf16>, vector<16x16xf32> -> vector<16x16xf32>
    %342 = arith.addf %341, %262 : vector<16x16xf32>
    %cst_69 = arith.constant dense<0xFF800000> : vector<16xf32>
    %343 = vector.multi_reduction <maximumf>, %342, %cst_69 [1] : vector<16x16xf32> to vector<16xf32>
    %344 = vector.shape_cast %343 : vector<16xf32> to vector<16x1xf32>
    %345 = vector.broadcast %344 : vector<16x1xf32> to vector<16x16xf32>
    %346 = arith.subf %342, %345 : vector<16x16xf32>
    %347 = math.exp %346 : vector<16x16xf32>
    %cst_70 = arith.constant dense<0.000000e+00> : vector<16xf32>
    %348 = vector.multi_reduction <add>, %347, %cst_70 [1] : vector<16x16xf32> to vector<16xf32>
    %349 = vector.shape_cast %348 : vector<16xf32> to vector<16x1xf32>
    %350 = tpu.reciprocal %349 {approx = true} : vector<16x1xf32> -> vector<16x1xf32>
    %351 = vector.broadcast %350 : vector<16x1xf32> to vector<16x16xf32>
    %352 = arith.mulf %347, %351 : vector<16x16xf32>
    %353 = vector.extract_strided_slice %276 {offsets = [0, 24], sizes = [16, 8], strides = [1, 1]} : vector<16x32xf32> to vector<16x8xf32>
    %354 = arith.truncf %352 : vector<16x16xf32> to vector<16x16xbf16>
    %355 = arith.truncf %353 : vector<16x8xf32> to vector<16x8xbf16>
    %cst_71 = arith.constant dense<0.000000e+00> : vector<16x8xf32>
    %356 = tpu.matmul %354, %355, %cst_71 {dimension_numbers = #tpu.dot_dimension_numbers<[1], [0], [0], [1], [0, 0, 1, 1], [], []>} : vector<16x16xbf16>, vector<16x8xbf16>, vector<16x8xf32> -> vector<16x8xf32>
    %357 = tpu.concatenate %296, %316, %336, %356 in 1 : vector<16x8xf32>, vector<16x8xf32>, vector<16x8xf32>, vector<16x8xf32> -> vector<16x32xf32>
    %c0_72 = arith.constant 0 : index
    %c0_73 = arith.constant 0 : index
    %c0_74 = arith.constant 0 : index
    %358 = vector.load %arg13[%c0_72, %c0_73, %c0_74] : memref<2x32x32xf32, #tpu.memory_space<vmem>>, vector<1x32x32xf32>
    %359 = vector.shape_cast %358 : vector<1x32x32xf32> to vector<32x32xf32>
    %360 = arith.truncf %357 : vector<16x32xf32> to vector<16x32xbf16>
    %361 = arith.truncf %359 : vector<32x32xf32> to vector<32x32xbf16>
    %cst_75 = arith.constant dense<0.000000e+00> : vector<16x32xf32>
    %362 = tpu.matmul %360, %361, %cst_75 {dimension_numbers = #tpu.dot_dimension_numbers<[1], [0], [0], [1], [0, 0, 1, 1], [], []>} : vector<16x32xbf16>, vector<32x32xbf16>, vector<16x32xf32> -> vector<16x32xf32>
    %c0_76 = arith.constant 0 : index
    %c0_77 = arith.constant 0 : index
    %c0_78 = arith.constant 0 : index
    %363 = vector.load %arg14[%c0_76, %c0_77, %c0_78] : memref<2x1x32xf32, #tpu.memory_space<vmem>>, vector<1x1x32xf32>
    %364 = vector.shape_cast %363 : vector<1x1x32xf32> to vector<1x32xf32>
    %365 = vector.broadcast %364 : vector<1x32xf32> to vector<16x32xf32>
    %366 = arith.addf %362, %365 : vector<16x32xf32>
    %367 = arith.addf %261, %366 : vector<16x32xf32>
    %c0_79 = arith.constant 0 : index
    %c0_80 = arith.constant 0 : index
    %c0_81 = arith.constant 0 : index
    %368 = vector.load %arg15[%c0_79, %c0_80, %c0_81] : memref<2x1x32xf32, #tpu.memory_space<vmem>>, vector<1x1x32xf32>
    %369 = vector.shape_cast %368 : vector<1x1x32xf32> to vector<1x32xf32>
    %c0_82 = arith.constant 0 : index
    %c0_83 = arith.constant 0 : index
    %c0_84 = arith.constant 0 : index
    %370 = vector.load %arg16[%c0_82, %c0_83, %c0_84] : memref<2x1x32xf32, #tpu.memory_space<vmem>>, vector<1x1x32xf32>
    %371 = vector.shape_cast %370 : vector<1x1x32xf32> to vector<1x32xf32>
    %cst_85 = arith.constant dense<0.000000e+00> : vector<16xf32>
    %372 = vector.multi_reduction <add>, %367, %cst_85 [1] : vector<16x32xf32> to vector<16xf32>
    %373 = vector.shape_cast %372 : vector<16xf32> to vector<16x1xf32>
    %cst_86 = arith.constant 3.200000e+01 : f32
    %374 = vector.broadcast %cst_86 : f32 to vector<16x1xf32>
    %375 = arith.divf %373, %374 : vector<16x1xf32>
    %376 = vector.broadcast %375 : vector<16x1xf32> to vector<16x32xf32>
    %377 = arith.subf %367, %376 : vector<16x32xf32>
    %378 = arith.mulf %377, %377 : vector<16x32xf32>
    %cst_87 = arith.constant dense<0.000000e+00> : vector<16xf32>
    %379 = vector.multi_reduction <add>, %378, %cst_87 [1] : vector<16x32xf32> to vector<16xf32>
    %380 = vector.shape_cast %379 : vector<16xf32> to vector<16x1xf32>
    %cst_88 = arith.constant 3.200000e+01 : f32
    %381 = vector.broadcast %cst_88 : f32 to vector<16x1xf32>
    %382 = arith.divf %380, %381 : vector<16x1xf32>
    %383 = vector.broadcast %375 : vector<16x1xf32> to vector<16x32xf32>
    %384 = arith.subf %367, %383 : vector<16x32xf32>
    %cst_89 = arith.constant 9.99999974E-6 : f32
    %385 = vector.broadcast %cst_89 : f32 to vector<16x1xf32>
    %386 = arith.addf %382, %385 : vector<16x1xf32>
    %387 = math.rsqrt %386 : vector<16x1xf32>
    %388 = vector.broadcast %387 : vector<16x1xf32> to vector<16x32xf32>
    %389 = arith.mulf %384, %388 : vector<16x32xf32>
    %390 = vector.broadcast %369 : vector<1x32xf32> to vector<16x32xf32>
    %391 = arith.mulf %389, %390 : vector<16x32xf32>
    %392 = vector.broadcast %371 : vector<1x32xf32> to vector<16x32xf32>
    %393 = arith.addf %391, %392 : vector<16x32xf32>
    %c0_90 = arith.constant 0 : index
    %c0_91 = arith.constant 0 : index
    %c0_92 = arith.constant 0 : index
    %394 = vector.load %arg17[%c0_90, %c0_91, %c0_92] : memref<2x32x64xf32, #tpu.memory_space<vmem>>, vector<1x32x64xf32>
    %395 = vector.shape_cast %394 : vector<1x32x64xf32> to vector<32x64xf32>
    %396 = arith.truncf %393 : vector<16x32xf32> to vector<16x32xbf16>
    %397 = arith.truncf %395 : vector<32x64xf32> to vector<32x64xbf16>
    %cst_93 = arith.constant dense<0.000000e+00> : vector<16x64xf32>
    %398 = tpu.matmul %396, %397, %cst_93 {dimension_numbers = #tpu.dot_dimension_numbers<[1], [0], [0], [1], [0, 0, 1, 1], [], []>} : vector<16x32xbf16>, vector<32x64xbf16>, vector<16x64xf32> -> vector<16x64xf32>
    %c0_94 = arith.constant 0 : index
    %c0_95 = arith.constant 0 : index
    %c0_96 = arith.constant 0 : index
    %399 = vector.load %arg18[%c0_94, %c0_95, %c0_96] : memref<2x1x64xf32, #tpu.memory_space<vmem>>, vector<1x1x64xf32>
    %400 = vector.shape_cast %399 : vector<1x1x64xf32> to vector<1x64xf32>
    %401 = vector.broadcast %400 : vector<1x64xf32> to vector<16x64xf32>
    %402 = arith.addf %398, %401 : vector<16x64xf32>
    %cst_97 = arith.constant 0.000000e+00 : f32
    %403 = vector.broadcast %cst_97 : f32 to vector<16x64xf32>
    %404 = arith.maximumf %402, %403 : vector<16x64xf32>
    %c0_98 = arith.constant 0 : index
    %c0_99 = arith.constant 0 : index
    %c0_100 = arith.constant 0 : index
    %405 = vector.load %arg19[%c0_98, %c0_99, %c0_100] : memref<2x64x32xf32, #tpu.memory_space<vmem>>, vector<1x64x32xf32>
    %406 = vector.shape_cast %405 : vector<1x64x32xf32> to vector<64x32xf32>
    %407 = arith.truncf %404 : vector<16x64xf32> to vector<16x64xbf16>
    %408 = arith.truncf %406 : vector<64x32xf32> to vector<64x32xbf16>
    %cst_101 = arith.constant dense<0.000000e+00> : vector<16x32xf32>
    %409 = tpu.matmul %407, %408, %cst_101 {dimension_numbers = #tpu.dot_dimension_numbers<[1], [0], [0], [1], [0, 0, 1, 1], [], []>} : vector<16x64xbf16>, vector<64x32xbf16>, vector<16x32xf32> -> vector<16x32xf32>
    %c0_102 = arith.constant 0 : index
    %c0_103 = arith.constant 0 : index
    %c0_104 = arith.constant 0 : index
    %410 = vector.load %arg20[%c0_102, %c0_103, %c0_104] : memref<2x1x32xf32, #tpu.memory_space<vmem>>, vector<1x1x32xf32>
    %411 = vector.shape_cast %410 : vector<1x1x32xf32> to vector<1x32xf32>
    %412 = vector.broadcast %411 : vector<1x32xf32> to vector<16x32xf32>
    %413 = arith.addf %409, %412 : vector<16x32xf32>
    %414 = arith.addf %393, %413 : vector<16x32xf32>
    %c0_105 = arith.constant 0 : index
    %c0_106 = arith.constant 0 : index
    %c0_107 = arith.constant 0 : index
    %415 = vector.load %arg21[%c0_105, %c0_106, %c0_107] : memref<2x1x32xf32, #tpu.memory_space<vmem>>, vector<1x1x32xf32>
    %416 = vector.shape_cast %415 : vector<1x1x32xf32> to vector<1x32xf32>
    %c0_108 = arith.constant 0 : index
    %c0_109 = arith.constant 0 : index
    %c0_110 = arith.constant 0 : index
    %417 = vector.load %arg22[%c0_108, %c0_109, %c0_110] : memref<2x1x32xf32, #tpu.memory_space<vmem>>, vector<1x1x32xf32>
    %418 = vector.shape_cast %417 : vector<1x1x32xf32> to vector<1x32xf32>
    %cst_111 = arith.constant dense<0.000000e+00> : vector<16xf32>
    %419 = vector.multi_reduction <add>, %414, %cst_111 [1] : vector<16x32xf32> to vector<16xf32>
    %420 = vector.shape_cast %419 : vector<16xf32> to vector<16x1xf32>
    %cst_112 = arith.constant 3.200000e+01 : f32
    %421 = vector.broadcast %cst_112 : f32 to vector<16x1xf32>
    %422 = arith.divf %420, %421 : vector<16x1xf32>
    %423 = vector.broadcast %422 : vector<16x1xf32> to vector<16x32xf32>
    %424 = arith.subf %414, %423 : vector<16x32xf32>
    %425 = arith.mulf %424, %424 : vector<16x32xf32>
    %cst_113 = arith.constant dense<0.000000e+00> : vector<16xf32>
    %426 = vector.multi_reduction <add>, %425, %cst_113 [1] : vector<16x32xf32> to vector<16xf32>
    %427 = vector.shape_cast %426 : vector<16xf32> to vector<16x1xf32>
    %cst_114 = arith.constant 3.200000e+01 : f32
    %428 = vector.broadcast %cst_114 : f32 to vector<16x1xf32>
    %429 = arith.divf %427, %428 : vector<16x1xf32>
    %430 = vector.broadcast %422 : vector<16x1xf32> to vector<16x32xf32>
    %431 = arith.subf %414, %430 : vector<16x32xf32>
    %cst_115 = arith.constant 9.99999974E-6 : f32
    %432 = vector.broadcast %cst_115 : f32 to vector<16x1xf32>
    %433 = arith.addf %429, %432 : vector<16x1xf32>
    %434 = math.rsqrt %433 : vector<16x1xf32>
    %435 = vector.broadcast %434 : vector<16x1xf32> to vector<16x32xf32>
    %436 = arith.mulf %431, %435 : vector<16x32xf32>
    %437 = vector.broadcast %416 : vector<1x32xf32> to vector<16x32xf32>
    %438 = arith.mulf %436, %437 : vector<16x32xf32>
    %439 = vector.broadcast %418 : vector<1x32xf32> to vector<16x32xf32>
    %440 = arith.addf %438, %439 : vector<16x32xf32>
    %c1 = arith.constant 1 : index
    %c0_116 = arith.constant 0 : index
    %c0_117 = arith.constant 0 : index
    %441 = vector.load %arg11[%c1, %c0_116, %c0_117] : memref<2x32x96xf32, #tpu.memory_space<vmem>>, vector<1x32x96xf32>
    %442 = vector.shape_cast %441 : vector<1x32x96xf32> to vector<32x96xf32>
    %443 = arith.truncf %440 : vector<16x32xf32> to vector<16x32xbf16>
    %444 = arith.truncf %442 : vector<32x96xf32> to vector<32x96xbf16>
    %cst_118 = arith.constant dense<0.000000e+00> : vector<16x96xf32>
    %445 = tpu.matmul %443, %444, %cst_118 {dimension_numbers = #tpu.dot_dimension_numbers<[1], [0], [0], [1], [0, 0, 1, 1], [], []>} : vector<16x32xbf16>, vector<32x96xbf16>, vector<16x96xf32> -> vector<16x96xf32>
    %c1_119 = arith.constant 1 : index
    %c0_120 = arith.constant 0 : index
    %c0_121 = arith.constant 0 : index
    %446 = vector.load %arg12[%c1_119, %c0_120, %c0_121] : memref<2x1x96xf32, #tpu.memory_space<vmem>>, vector<1x1x96xf32>
    %447 = vector.shape_cast %446 : vector<1x1x96xf32> to vector<1x96xf32>
    %448 = vector.broadcast %447 : vector<1x96xf32> to vector<16x96xf32>
    %449 = arith.addf %445, %448 : vector<16x96xf32>
    %450 = vector.extract_strided_slice %449 {offsets = [0, 0], sizes = [16, 32], strides = [1, 1]} : vector<16x96xf32> to vector<16x32xf32>
    %cst_122 = arith.constant 0.353553385 : f32
    %451 = vector.broadcast %cst_122 : f32 to vector<16x32xf32>
    %452 = arith.mulf %450, %451 : vector<16x32xf32>
    %453 = vector.extract_strided_slice %449 {offsets = [0, 32], sizes = [16, 32], strides = [1, 1]} : vector<16x96xf32> to vector<16x32xf32>
    %454 = vector.extract_strided_slice %449 {offsets = [0, 64], sizes = [16, 32], strides = [1, 1]} : vector<16x96xf32> to vector<16x32xf32>
    %455 = vector.extract_strided_slice %452 {offsets = [0, 0], sizes = [16, 8], strides = [1, 1]} : vector<16x32xf32> to vector<16x8xf32>
    %456 = vector.extract_strided_slice %453 {offsets = [0, 0], sizes = [16, 8], strides = [1, 1]} : vector<16x32xf32> to vector<16x8xf32>
    %457 = arith.truncf %455 : vector<16x8xf32> to vector<16x8xbf16>
    %458 = arith.truncf %456 : vector<16x8xf32> to vector<16x8xbf16>
    %cst_123 = arith.constant dense<0.000000e+00> : vector<16x16xf32>
    %459 = tpu.matmul %457, %458, %cst_123 {dimension_numbers = #tpu.dot_dimension_numbers<[1], [1], [0], [0], [0, 0, 1, 0], [], []>} : vector<16x8xbf16>, vector<16x8xbf16>, vector<16x16xf32> -> vector<16x16xf32>
    %460 = arith.addf %459, %262 : vector<16x16xf32>
    %cst_124 = arith.constant dense<0xFF800000> : vector<16xf32>
    %461 = vector.multi_reduction <maximumf>, %460, %cst_124 [1] : vector<16x16xf32> to vector<16xf32>
    %462 = vector.shape_cast %461 : vector<16xf32> to vector<16x1xf32>
    %463 = vector.broadcast %462 : vector<16x1xf32> to vector<16x16xf32>
    %464 = arith.subf %460, %463 : vector<16x16xf32>
    %465 = math.exp %464 : vector<16x16xf32>
    %cst_125 = arith.constant dense<0.000000e+00> : vector<16xf32>
    %466 = vector.multi_reduction <add>, %465, %cst_125 [1] : vector<16x16xf32> to vector<16xf32>
    %467 = vector.shape_cast %466 : vector<16xf32> to vector<16x1xf32>
    %468 = tpu.reciprocal %467 {approx = true} : vector<16x1xf32> -> vector<16x1xf32>
    %469 = vector.broadcast %468 : vector<16x1xf32> to vector<16x16xf32>
    %470 = arith.mulf %465, %469 : vector<16x16xf32>
    %471 = vector.extract_strided_slice %454 {offsets = [0, 0], sizes = [16, 8], strides = [1, 1]} : vector<16x32xf32> to vector<16x8xf32>
    %472 = arith.truncf %470 : vector<16x16xf32> to vector<16x16xbf16>
    %473 = arith.truncf %471 : vector<16x8xf32> to vector<16x8xbf16>
    %cst_126 = arith.constant dense<0.000000e+00> : vector<16x8xf32>
    %474 = tpu.matmul %472, %473, %cst_126 {dimension_numbers = #tpu.dot_dimension_numbers<[1], [0], [0], [1], [0, 0, 1, 1], [], []>} : vector<16x16xbf16>, vector<16x8xbf16>, vector<16x8xf32> -> vector<16x8xf32>
    %475 = vector.extract_strided_slice %452 {offsets = [0, 8], sizes = [16, 8], strides = [1, 1]} : vector<16x32xf32> to vector<16x8xf32>
    %476 = vector.extract_strided_slice %453 {offsets = [0, 8], sizes = [16, 8], strides = [1, 1]} : vector<16x32xf32> to vector<16x8xf32>
    %477 = arith.truncf %475 : vector<16x8xf32> to vector<16x8xbf16>
    %478 = arith.truncf %476 : vector<16x8xf32> to vector<16x8xbf16>
    %cst_127 = arith.constant dense<0.000000e+00> : vector<16x16xf32>
    %479 = tpu.matmul %477, %478, %cst_127 {dimension_numbers = #tpu.dot_dimension_numbers<[1], [1], [0], [0], [0, 0, 1, 0], [], []>} : vector<16x8xbf16>, vector<16x8xbf16>, vector<16x16xf32> -> vector<16x16xf32>
    %480 = arith.addf %479, %262 : vector<16x16xf32>
    %cst_128 = arith.constant dense<0xFF800000> : vector<16xf32>
    %481 = vector.multi_reduction <maximumf>, %480, %cst_128 [1] : vector<16x16xf32> to vector<16xf32>
    %482 = vector.shape_cast %481 : vector<16xf32> to vector<16x1xf32>
    %483 = vector.broadcast %482 : vector<16x1xf32> to vector<16x16xf32>
    %484 = arith.subf %480, %483 : vector<16x16xf32>
    %485 = math.exp %484 : vector<16x16xf32>
    %cst_129 = arith.constant dense<0.000000e+00> : vector<16xf32>
    %486 = vector.multi_reduction <add>, %485, %cst_129 [1] : vector<16x16xf32> to vector<16xf32>
    %487 = vector.shape_cast %486 : vector<16xf32> to vector<16x1xf32>
    %488 = tpu.reciprocal %487 {approx = true} : vector<16x1xf32> -> vector<16x1xf32>
    %489 = vector.broadcast %488 : vector<16x1xf32> to vector<16x16xf32>
    %490 = arith.mulf %485, %489 : vector<16x16xf32>
    %491 = vector.extract_strided_slice %454 {offsets = [0, 8], sizes = [16, 8], strides = [1, 1]} : vector<16x32xf32> to vector<16x8xf32>
    %492 = arith.truncf %490 : vector<16x16xf32> to vector<16x16xbf16>
    %493 = arith.truncf %491 : vector<16x8xf32> to vector<16x8xbf16>
    %cst_130 = arith.constant dense<0.000000e+00> : vector<16x8xf32>
    %494 = tpu.matmul %492, %493, %cst_130 {dimension_numbers = #tpu.dot_dimension_numbers<[1], [0], [0], [1], [0, 0, 1, 1], [], []>} : vector<16x16xbf16>, vector<16x8xbf16>, vector<16x8xf32> -> vector<16x8xf32>
    %495 = vector.extract_strided_slice %452 {offsets = [0, 16], sizes = [16, 8], strides = [1, 1]} : vector<16x32xf32> to vector<16x8xf32>
    %496 = vector.extract_strided_slice %453 {offsets = [0, 16], sizes = [16, 8], strides = [1, 1]} : vector<16x32xf32> to vector<16x8xf32>
    %497 = arith.truncf %495 : vector<16x8xf32> to vector<16x8xbf16>
    %498 = arith.truncf %496 : vector<16x8xf32> to vector<16x8xbf16>
    %cst_131 = arith.constant dense<0.000000e+00> : vector<16x16xf32>
    %499 = tpu.matmul %497, %498, %cst_131 {dimension_numbers = #tpu.dot_dimension_numbers<[1], [1], [0], [0], [0, 0, 1, 0], [], []>} : vector<16x8xbf16>, vector<16x8xbf16>, vector<16x16xf32> -> vector<16x16xf32>
    %500 = arith.addf %499, %262 : vector<16x16xf32>
    %cst_132 = arith.constant dense<0xFF800000> : vector<16xf32>
    %501 = vector.multi_reduction <maximumf>, %500, %cst_132 [1] : vector<16x16xf32> to vector<16xf32>
    %502 = vector.shape_cast %501 : vector<16xf32> to vector<16x1xf32>
    %503 = vector.broadcast %502 : vector<16x1xf32> to vector<16x16xf32>
    %504 = arith.subf %500, %503 : vector<16x16xf32>
    %505 = math.exp %504 : vector<16x16xf32>
    %cst_133 = arith.constant dense<0.000000e+00> : vector<16xf32>
    %506 = vector.multi_reduction <add>, %505, %cst_133 [1] : vector<16x16xf32> to vector<16xf32>
    %507 = vector.shape_cast %506 : vector<16xf32> to vector<16x1xf32>
    %508 = tpu.reciprocal %507 {approx = true} : vector<16x1xf32> -> vector<16x1xf32>
    %509 = vector.broadcast %508 : vector<16x1xf32> to vector<16x16xf32>
    %510 = arith.mulf %505, %509 : vector<16x16xf32>
    %511 = vector.extract_strided_slice %454 {offsets = [0, 16], sizes = [16, 8], strides = [1, 1]} : vector<16x32xf32> to vector<16x8xf32>
    %512 = arith.truncf %510 : vector<16x16xf32> to vector<16x16xbf16>
    %513 = arith.truncf %511 : vector<16x8xf32> to vector<16x8xbf16>
    %cst_134 = arith.constant dense<0.000000e+00> : vector<16x8xf32>
    %514 = tpu.matmul %512, %513, %cst_134 {dimension_numbers = #tpu.dot_dimension_numbers<[1], [0], [0], [1], [0, 0, 1, 1], [], []>} : vector<16x16xbf16>, vector<16x8xbf16>, vector<16x8xf32> -> vector<16x8xf32>
    %515 = vector.extract_strided_slice %452 {offsets = [0, 24], sizes = [16, 8], strides = [1, 1]} : vector<16x32xf32> to vector<16x8xf32>
    %516 = vector.extract_strided_slice %453 {offsets = [0, 24], sizes = [16, 8], strides = [1, 1]} : vector<16x32xf32> to vector<16x8xf32>
    %517 = arith.truncf %515 : vector<16x8xf32> to vector<16x8xbf16>
    %518 = arith.truncf %516 : vector<16x8xf32> to vector<16x8xbf16>
    %cst_135 = arith.constant dense<0.000000e+00> : vector<16x16xf32>
    %519 = tpu.matmul %517, %518, %cst_135 {dimension_numbers = #tpu.dot_dimension_numbers<[1], [1], [0], [0], [0, 0, 1, 0], [], []>} : vector<16x8xbf16>, vector<16x8xbf16>, vector<16x16xf32> -> vector<16x16xf32>
    %520 = arith.addf %519, %262 : vector<16x16xf32>
    %cst_136 = arith.constant dense<0xFF800000> : vector<16xf32>
    %521 = vector.multi_reduction <maximumf>, %520, %cst_136 [1] : vector<16x16xf32> to vector<16xf32>
    %522 = vector.shape_cast %521 : vector<16xf32> to vector<16x1xf32>
    %523 = vector.broadcast %522 : vector<16x1xf32> to vector<16x16xf32>
    %524 = arith.subf %520, %523 : vector<16x16xf32>
    %525 = math.exp %524 : vector<16x16xf32>
    %cst_137 = arith.constant dense<0.000000e+00> : vector<16xf32>
    %526 = vector.multi_reduction <add>, %525, %cst_137 [1] : vector<16x16xf32> to vector<16xf32>
    %527 = vector.shape_cast %526 : vector<16xf32> to vector<16x1xf32>
    %528 = tpu.reciprocal %527 {approx = true} : vector<16x1xf32> -> vector<16x1xf32>
    %529 = vector.broadcast %528 : vector<16x1xf32> to vector<16x16xf32>
    %530 = arith.mulf %525, %529 : vector<16x16xf32>
    %531 = vector.extract_strided_slice %454 {offsets = [0, 24], sizes = [16, 8], strides = [1, 1]} : vector<16x32xf32> to vector<16x8xf32>
    %532 = arith.truncf %530 : vector<16x16xf32> to vector<16x16xbf16>
    %533 = arith.truncf %531 : vector<16x8xf32> to vector<16x8xbf16>
    %cst_138 = arith.constant dense<0.000000e+00> : vector<16x8xf32>
    %534 = tpu.matmul %532, %533, %cst_138 {dimension_numbers = #tpu.dot_dimension_numbers<[1], [0], [0], [1], [0, 0, 1, 1], [], []>} : vector<16x16xbf16>, vector<16x8xbf16>, vector<16x8xf32> -> vector<16x8xf32>
    %535 = tpu.concatenate %474, %494, %514, %534 in 1 : vector<16x8xf32>, vector<16x8xf32>, vector<16x8xf32>, vector<16x8xf32> -> vector<16x32xf32>
    %c1_139 = arith.constant 1 : index
    %c0_140 = arith.constant 0 : index
    %c0_141 = arith.constant 0 : index
    %536 = vector.load %arg13[%c1_139, %c0_140, %c0_141] : memref<2x32x32xf32, #tpu.memory_space<vmem>>, vector<1x32x32xf32>
    %537 = vector.shape_cast %536 : vector<1x32x32xf32> to vector<32x32xf32>
    %538 = arith.truncf %535 : vector<16x32xf32> to vector<16x32xbf16>
    %539 = arith.truncf %537 : vector<32x32xf32> to vector<32x32xbf16>
    %cst_142 = arith.constant dense<0.000000e+00> : vector<16x32xf32>
    %540 = tpu.matmul %538, %539, %cst_142 {dimension_numbers = #tpu.dot_dimension_numbers<[1], [0], [0], [1], [0, 0, 1, 1], [], []>} : vector<16x32xbf16>, vector<32x32xbf16>, vector<16x32xf32> -> vector<16x32xf32>
    %c1_143 = arith.constant 1 : index
    %c0_144 = arith.constant 0 : index
    %c0_145 = arith.constant 0 : index
    %541 = vector.load %arg14[%c1_143, %c0_144, %c0_145] : memref<2x1x32xf32, #tpu.memory_space<vmem>>, vector<1x1x32xf32>
    %542 = vector.shape_cast %541 : vector<1x1x32xf32> to vector<1x32xf32>
    %543 = vector.broadcast %542 : vector<1x32xf32> to vector<16x32xf32>
    %544 = arith.addf %540, %543 : vector<16x32xf32>
    %545 = arith.addf %440, %544 : vector<16x32xf32>
    %c1_146 = arith.constant 1 : index
    %c0_147 = arith.constant 0 : index
    %c0_148 = arith.constant 0 : index
    %546 = vector.load %arg15[%c1_146, %c0_147, %c0_148] : memref<2x1x32xf32, #tpu.memory_space<vmem>>, vector<1x1x32xf32>
    %547 = vector.shape_cast %546 : vector<1x1x32xf32> to vector<1x32xf32>
    %c1_149 = arith.constant 1 : index
    %c0_150 = arith.constant 0 : index
    %c0_151 = arith.constant 0 : index
    %548 = vector.load %arg16[%c1_149, %c0_150, %c0_151] : memref<2x1x32xf32, #tpu.memory_space<vmem>>, vector<1x1x32xf32>
    %549 = vector.shape_cast %548 : vector<1x1x32xf32> to vector<1x32xf32>
    %cst_152 = arith.constant dense<0.000000e+00> : vector<16xf32>
    %550 = vector.multi_reduction <add>, %545, %cst_152 [1] : vector<16x32xf32> to vector<16xf32>
    %551 = vector.shape_cast %550 : vector<16xf32> to vector<16x1xf32>
    %cst_153 = arith.constant 3.200000e+01 : f32
    %552 = vector.broadcast %cst_153 : f32 to vector<16x1xf32>
    %553 = arith.divf %551, %552 : vector<16x1xf32>
    %554 = vector.broadcast %553 : vector<16x1xf32> to vector<16x32xf32>
    %555 = arith.subf %545, %554 : vector<16x32xf32>
    %556 = arith.mulf %555, %555 : vector<16x32xf32>
    %cst_154 = arith.constant dense<0.000000e+00> : vector<16xf32>
    %557 = vector.multi_reduction <add>, %556, %cst_154 [1] : vector<16x32xf32> to vector<16xf32>
    %558 = vector.shape_cast %557 : vector<16xf32> to vector<16x1xf32>
    %cst_155 = arith.constant 3.200000e+01 : f32
    %559 = vector.broadcast %cst_155 : f32 to vector<16x1xf32>
    %560 = arith.divf %558, %559 : vector<16x1xf32>
    %561 = vector.broadcast %553 : vector<16x1xf32> to vector<16x32xf32>
    %562 = arith.subf %545, %561 : vector<16x32xf32>
    %cst_156 = arith.constant 9.99999974E-6 : f32
    %563 = vector.broadcast %cst_156 : f32 to vector<16x1xf32>
    %564 = arith.addf %560, %563 : vector<16x1xf32>
    %565 = math.rsqrt %564 : vector<16x1xf32>
    %566 = vector.broadcast %565 : vector<16x1xf32> to vector<16x32xf32>
    %567 = arith.mulf %562, %566 : vector<16x32xf32>
    %568 = vector.broadcast %547 : vector<1x32xf32> to vector<16x32xf32>
    %569 = arith.mulf %567, %568 : vector<16x32xf32>
    %570 = vector.broadcast %549 : vector<1x32xf32> to vector<16x32xf32>
    %571 = arith.addf %569, %570 : vector<16x32xf32>
    %c1_157 = arith.constant 1 : index
    %c0_158 = arith.constant 0 : index
    %c0_159 = arith.constant 0 : index
    %572 = vector.load %arg17[%c1_157, %c0_158, %c0_159] : memref<2x32x64xf32, #tpu.memory_space<vmem>>, vector<1x32x64xf32>
    %573 = vector.shape_cast %572 : vector<1x32x64xf32> to vector<32x64xf32>
    %574 = arith.truncf %571 : vector<16x32xf32> to vector<16x32xbf16>
    %575 = arith.truncf %573 : vector<32x64xf32> to vector<32x64xbf16>
    %cst_160 = arith.constant dense<0.000000e+00> : vector<16x64xf32>
    %576 = tpu.matmul %574, %575, %cst_160 {dimension_numbers = #tpu.dot_dimension_numbers<[1], [0], [0], [1], [0, 0, 1, 1], [], []>} : vector<16x32xbf16>, vector<32x64xbf16>, vector<16x64xf32> -> vector<16x64xf32>
    %c1_161 = arith.constant 1 : index
    %c0_162 = arith.constant 0 : index
    %c0_163 = arith.constant 0 : index
    %577 = vector.load %arg18[%c1_161, %c0_162, %c0_163] : memref<2x1x64xf32, #tpu.memory_space<vmem>>, vector<1x1x64xf32>
    %578 = vector.shape_cast %577 : vector<1x1x64xf32> to vector<1x64xf32>
    %579 = vector.broadcast %578 : vector<1x64xf32> to vector<16x64xf32>
    %580 = arith.addf %576, %579 : vector<16x64xf32>
    %cst_164 = arith.constant 0.000000e+00 : f32
    %581 = vector.broadcast %cst_164 : f32 to vector<16x64xf32>
    %582 = arith.maximumf %580, %581 : vector<16x64xf32>
    %c1_165 = arith.constant 1 : index
    %c0_166 = arith.constant 0 : index
    %c0_167 = arith.constant 0 : index
    %583 = vector.load %arg19[%c1_165, %c0_166, %c0_167] : memref<2x64x32xf32, #tpu.memory_space<vmem>>, vector<1x64x32xf32>
    %584 = vector.shape_cast %583 : vector<1x64x32xf32> to vector<64x32xf32>
    %585 = arith.truncf %582 : vector<16x64xf32> to vector<16x64xbf16>
    %586 = arith.truncf %584 : vector<64x32xf32> to vector<64x32xbf16>
    %cst_168 = arith.constant dense<0.000000e+00> : vector<16x32xf32>
    %587 = tpu.matmul %585, %586, %cst_168 {dimension_numbers = #tpu.dot_dimension_numbers<[1], [0], [0], [1], [0, 0, 1, 1], [], []>} : vector<16x64xbf16>, vector<64x32xbf16>, vector<16x32xf32> -> vector<16x32xf32>
    %c1_169 = arith.constant 1 : index
    %c0_170 = arith.constant 0 : index
    %c0_171 = arith.constant 0 : index
    %588 = vector.load %arg20[%c1_169, %c0_170, %c0_171] : memref<2x1x32xf32, #tpu.memory_space<vmem>>, vector<1x1x32xf32>
    %589 = vector.shape_cast %588 : vector<1x1x32xf32> to vector<1x32xf32>
    %590 = vector.broadcast %589 : vector<1x32xf32> to vector<16x32xf32>
    %591 = arith.addf %587, %590 : vector<16x32xf32>
    %592 = arith.addf %571, %591 : vector<16x32xf32>
    %c1_172 = arith.constant 1 : index
    %c0_173 = arith.constant 0 : index
    %c0_174 = arith.constant 0 : index
    %593 = vector.load %arg21[%c1_172, %c0_173, %c0_174] : memref<2x1x32xf32, #tpu.memory_space<vmem>>, vector<1x1x32xf32>
    %594 = vector.shape_cast %593 : vector<1x1x32xf32> to vector<1x32xf32>
    %c1_175 = arith.constant 1 : index
    %c0_176 = arith.constant 0 : index
    %c0_177 = arith.constant 0 : index
    %595 = vector.load %arg22[%c1_175, %c0_176, %c0_177] : memref<2x1x32xf32, #tpu.memory_space<vmem>>, vector<1x1x32xf32>
    %596 = vector.shape_cast %595 : vector<1x1x32xf32> to vector<1x32xf32>
    %cst_178 = arith.constant dense<0.000000e+00> : vector<16xf32>
    %597 = vector.multi_reduction <add>, %592, %cst_178 [1] : vector<16x32xf32> to vector<16xf32>
    %598 = vector.shape_cast %597 : vector<16xf32> to vector<16x1xf32>
    %cst_179 = arith.constant 3.200000e+01 : f32
    %599 = vector.broadcast %cst_179 : f32 to vector<16x1xf32>
    %600 = arith.divf %598, %599 : vector<16x1xf32>
    %601 = vector.broadcast %600 : vector<16x1xf32> to vector<16x32xf32>
    %602 = arith.subf %592, %601 : vector<16x32xf32>
    %603 = arith.mulf %602, %602 : vector<16x32xf32>
    %cst_180 = arith.constant dense<0.000000e+00> : vector<16xf32>
    %604 = vector.multi_reduction <add>, %603, %cst_180 [1] : vector<16x32xf32> to vector<16xf32>
    %605 = vector.shape_cast %604 : vector<16xf32> to vector<16x1xf32>
    %cst_181 = arith.constant 3.200000e+01 : f32
    %606 = vector.broadcast %cst_181 : f32 to vector<16x1xf32>
    %607 = arith.divf %605, %606 : vector<16x1xf32>
    %608 = vector.broadcast %600 : vector<16x1xf32> to vector<16x32xf32>
    %609 = arith.subf %592, %608 : vector<16x32xf32>
    %cst_182 = arith.constant 9.99999974E-6 : f32
    %610 = vector.broadcast %cst_182 : f32 to vector<16x1xf32>
    %611 = arith.addf %607, %610 : vector<16x1xf32>
    %612 = math.rsqrt %611 : vector<16x1xf32>
    %613 = vector.broadcast %612 : vector<16x1xf32> to vector<16x32xf32>
    %614 = arith.mulf %609, %613 : vector<16x32xf32>
    %615 = vector.broadcast %594 : vector<1x32xf32> to vector<16x32xf32>
    %616 = arith.mulf %614, %615 : vector<16x32xf32>
    %617 = vector.broadcast %596 : vector<1x32xf32> to vector<16x32xf32>
    %618 = arith.addf %616, %617 : vector<16x32xf32>
    %c0_183 = arith.constant 0 : index
    %c0_184 = arith.constant 0 : index
    %619 = vector.load %arg4[%c0_183, %c0_184] : memref<14x16xf32, #tpu.memory_space<vmem>>, vector<14x16xf32>
    %cst_185 = arith.constant dense<0.000000e+00> : vector<14x32xf32>
    %620 = tpu.matmul %619, %618, %cst_185 {dimension_numbers = #tpu.dot_dimension_numbers<[1], [0], [0], [1], [0, 0, 1, 1], [], []>} : vector<14x16xf32>, vector<16x32xf32>, vector<14x32xf32> -> vector<14x32xf32>
    %c0_186 = arith.constant 0 : index
    %c0_187 = arith.constant 0 : index
    %621 = vector.load %arg23[%c0_186, %c0_187] : memref<14x32xf32, #tpu.memory_space<vmem>>, vector<14x32xf32>
    tpu.vector_store %arg23[%c0_186, %c0_187], %620 {strides = array<i32>} : memref<14x32xf32, #tpu.memory_space<vmem>>, vector<14x32xf32>,
    return
  }
  func.func @transform_0(%arg0: i32) -> (i32, i32) {
    %c0_i32 = arith.constant 0 : i32
    %c0_i32_0 = arith.constant 0 : i32
    %c0_i32_1 = arith.constant 0 : i32
    return %c0_i32, %c0_i32_0 : i32, i32
  }
  func.func @transform_1(%arg0: i32) -> (i32, i32) {
    %c0_i32 = arith.constant 0 : i32
    %c0_i32_0 = arith.constant 0 : i32
    %c0_i32_1 = arith.constant 0 : i32
    return %c0_i32, %c0_i32_0 : i32, i32
  }
  func.func @transform_2(%arg0: i32) -> (i32, i32) {
    %c0_i32 = arith.constant 0 : i32
    %c0_i32_0 = arith.constant 0 : i32
    %c0_i32_1 = arith.constant 0 : i32
    return %c0_i32, %c0_i32_0 : i32, i32
  }
  func.func @transform_3(%arg0: i32) -> (i32, i32) {
    %c0_i32 = arith.constant 0 : i32
    %c0_i32_0 = arith.constant 0 : i32
    %c0_i32_1 = arith.constant 0 : i32
    return %c0_i32, %c0_i32_0 : i32, i32
  }
  func.func @transform_4(%arg0: i32) -> (i32, i32) {
    %c0_i32 = arith.constant 0 : i32
    %c0_i32_0 = arith.constant 0 : i32
    %c0_i32_1 = arith.constant 0 : i32
    return %c0_i32, %c0_i32_0 : i32, i32
  }
  func.func @transform_5(%arg0: i32) -> (i32, i32) {
    %c0_i32 = arith.constant 0 : i32
    %c0_i32_0 = arith.constant 0 : i32
    %c0_i32_1 = arith.constant 0 : i32
    return %c0_i32, %c0_i32_0 : i32, i32
  }
  func.func @transform_6(%arg0: i32) -> (i32, i32) {
    %c0_i32 = arith.constant 0 : i32
    %c0_i32_0 = arith.constant 0 : i32
    %c0_i32_1 = arith.constant 0 : i32
    return %c0_i32, %c0_i32_0 : i32, i32
  }
  func.func @transform_7(%arg0: i32) -> (i32, i32) {
    %c0_i32 = arith.constant 0 : i32
    %c0_i32_0 = arith.constant 0 : i32
    %c0_i32_1 = arith.constant 0 : i32
    return %c0_i32, %c0_i32_0 : i32, i32
  }
  func.func @transform_8(%arg0: i32) -> (i32, i32) {
    %c0_i32 = arith.constant 0 : i32
    %c0_i32_0 = arith.constant 0 : i32
    %c0_i32_1 = arith.constant 0 : i32
    return %c0_i32, %c0_i32_0 : i32, i32
  }
  func.func @transform_9(%arg0: i32) -> (i32, i32) {
    %c0_i32 = arith.constant 0 : i32
    %c0_i32_0 = arith.constant 0 : i32
    %c0_i32_1 = arith.constant 0 : i32
    return %c0_i32, %c0_i32_0 : i32, i32
  }
  func.func @transform_10(%arg0: i32) -> (i32, i32, i32) {
    %c0_i32 = arith.constant 0 : i32
    %c0_i32_0 = arith.constant 0 : i32
    %c0_i32_1 = arith.constant 0 : i32
    %c0_i32_2 = arith.constant 0 : i32
    return %c0_i32, %c0_i32_0, %c0_i32_1 : i32, i32, i32
  }
  func.func @transform_11(%arg0: i32) -> (i32, i32, i32) {
    %c0_i32 = arith.constant 0 : i32
    %c0_i32_0 = arith.constant 0 : i32
    %c0_i32_1 = arith.constant 0 : i32
    %c0_i32_2 = arith.constant 0 : i32
    return %c0_i32, %c0_i32_0, %c0_i32_1 : i32, i32, i32
  }
  func.func @transform_12(%arg0: i32) -> (i32, i32, i32) {
    %c0_i32 = arith.constant 0 : i32
    %c0_i32_0 = arith.constant 0 : i32
    %c0_i32_1 = arith.constant 0 : i32
    %c0_i32_2 = arith.constant 0 : i32
    return %c0_i32, %c0_i32_0, %c0_i32_1 : i32, i32, i32
  }
  func.func @transform_13(%arg0: i32) -> (i32, i32, i32) {
    %c0_i32 = arith.constant 0 : i32
    %c0_i32_0 = arith.constant 0 : i32
    %c0_i32_1 = arith.constant 0 : i32
    %c0_i32_2 = arith.constant 0 : i32
    return %c0_i32, %c0_i32_0, %c0_i32_1 : i32, i32, i32
  }
  func.func @transform_14(%arg0: i32) -> (i32, i32, i32) {
    %c0_i32 = arith.constant 0 : i32
    %c0_i32_0 = arith.constant 0 : i32
    %c0_i32_1 = arith.constant 0 : i32
    %c0_i32_2 = arith.constant 0 : i32
    return %c0_i32, %c0_i32_0, %c0_i32_1 : i32, i32, i32
  }
  func.func @transform_15(%arg0: i32) -> (i32, i32, i32) {
    %c0_i32 = arith.constant 0 : i32
    %c0_i32_0 = arith.constant 0 : i32
    %c0_i32_1 = arith.constant 0 : i32
    %c0_i32_2 = arith.constant 0 : i32
    return %c0_i32, %c0_i32_0, %c0_i32_1 : i32, i32, i32
  }
  func.func @transform_16(%arg0: i32) -> (i32, i32, i32) {
    %c0_i32 = arith.constant 0 : i32
    %c0_i32_0 = arith.constant 0 : i32
    %c0_i32_1 = arith.constant 0 : i32
    %c0_i32_2 = arith.constant 0 : i32
    return %c0_i32, %c0_i32_0, %c0_i32_1 : i32, i32, i32
  }
  func.func @transform_17(%arg0: i32) -> (i32, i32, i32) {
    %c0_i32 = arith.constant 0 : i32
    %c0_i32_0 = arith.constant 0 : i32
    %c0_i32_1 = arith.constant 0 : i32
    %c0_i32_2 = arith.constant 0 : i32
    return %c0_i32, %c0_i32_0, %c0_i32_1 : i32, i32, i32
  }
  func.func @transform_18(%arg0: i32) -> (i32, i32, i32) {
    %c0_i32 = arith.constant 0 : i32
    %c0_i32_0 = arith.constant 0 : i32
    %c0_i32_1 = arith.constant 0 : i32
    %c0_i32_2 = arith.constant 0 : i32
    return %c0_i32, %c0_i32_0, %c0_i32_1 : i32, i32, i32
  }
  func.func @transform_19(%arg0: i32) -> (i32, i32, i32) {
    %c0_i32 = arith.constant 0 : i32
    %c0_i32_0 = arith.constant 0 : i32
    %c0_i32_1 = arith.constant 0 : i32
    %c0_i32_2 = arith.constant 0 : i32
    return %c0_i32, %c0_i32_0, %c0_i32_1 : i32, i32, i32
  }
  func.func @transform_20(%arg0: i32) -> (i32, i32, i32) {
    %c0_i32 = arith.constant 0 : i32
    %c0_i32_0 = arith.constant 0 : i32
    %c0_i32_1 = arith.constant 0 : i32
    %c0_i32_2 = arith.constant 0 : i32
    return %c0_i32, %c0_i32_0, %c0_i32_1 : i32, i32, i32
  }
  func.func @transform_21(%arg0: i32) -> (i32, i32, i32) {
    %c0_i32 = arith.constant 0 : i32
    %c0_i32_0 = arith.constant 0 : i32
    %c0_i32_1 = arith.constant 0 : i32
    %c0_i32_2 = arith.constant 0 : i32
    return %c0_i32, %c0_i32_0, %c0_i32_1 : i32, i32, i32
  }
  func.func @transform_22(%arg0: i32) -> (i32, i32) {
    %c0_i32 = arith.constant 0 : i32
    %c0_i32_0 = arith.constant 0 : i32
    %c0_i32_1 = arith.constant 0 : i32
    return %c0_i32, %c0_i32_0 : i32, i32
  }
}

</mosaic_0001>

<bundles_post_ra>
// kernel: node_encoder_forward.1
= control target key start
LH: loop header
LB: loop body
LE: loop exit
PB: predicated region body
PF: predicated region fallthrough
CT: control target
= control target key end

     0   :  { %v4320_v3 = vmov 0   ;;  %vm164_vm0 = vcmask 261120   ;;  %v4321_v23 = vmov 0.0   ;;  %vm4322_vm1 = vmmov 0   ;;  %s4325_s23 = smov 32   ;;  %s4329_s27 = smov 120   ;;  %s5697_s6 = inlined_call_operand.vmem [shape: f32[32,128], index: 6, kind: input, shape index: {}]   ;;  %s5698_s5 = inlined_call_operand.vmem [shape: f32[64,32], index: 5, kind: input, shape index: {}]   ;;  %s5699_s0 = inlined_call_operand.vmem [shape: s32[96,1], index: 0, kind: input, shape index: {}]   ;;  %s5700_s7 = inlined_call_operand.vmem [shape: f32[32,128], index: 7, kind: input, shape index: {}]   ;;  %s5701_s8 = inlined_call_operand.vmem [shape: f32[1,128], index: 8, kind: input, shape index: {}]   ;;  %s5702_s9 = inlined_call_operand.vmem [shape: f32[32,32], index: 9, kind: input, shape index: {}]   ;;  %s5703_s1 = inlined_call_operand.vmem [shape: f32[16,12], index: 1, kind: input, shape index: {}]   ;;  %s5704_s10 = inlined_call_operand.vmem [shape: f32[2,32,96], index: 10, kind: input, shape index: {}]   ;;  %s5705_s4 = inlined_call_operand.vmem [shape: f32[64,32], index: 4, kind: input, shape index: {}]   ;;  %s5706_s11 = inlined_call_operand.vmem [shape: f32[2,1,96], index: 11, kind: input, shape index: {}]   ;;  %s5707_s2 = inlined_call_operand.vmem [shape: f32[16,16], index: 2, kind: input, shape index: {}]   ;;  %s5708_s12 = inlined_call_operand.vmem [shape: f32[2,32,32], index: 12, kind: input, shape index: {}]   ;;  %s5709_s13 = inlined_call_operand.vmem [shape: f32[2,1,32], index: 13, kind: input, shape index: {}]   ;;  %s5710_s16 = inlined_call_operand.vmem [shape: f32[2,32,64], index: 16, kind: input, shape index: {}]   ;;  %s5711_s18 = inlined_call_operand.vmem [shape: f32[2,64,32], index: 18, kind: input, shape index: {}]   ;;  %s5712_s14 = inlined_call_operand.vmem [shape: f32[2,1,32], index: 14, kind: input, shape index: {}]   ;;  %s5713_s15 = inlined_call_operand.vmem [shape: f32[2,1,32], index: 15, kind: input, shape index: {}]   ;;  %s5714_s17 = inlined_call_operand.vmem [shape: f32[2,1,64], index: 17, kind: input, shape index: {}]   ;;  %s5715_s19 = inlined_call_operand.vmem [shape: f32[2,1,32], index: 19, kind: input, shape index: {}]   ;;  %s5716_s20 = inlined_call_operand.vmem [shape: f32[2,1,32], index: 20, kind: input, shape index: {}]   ;;  %s5717_s21 = inlined_call_operand.vmem [shape: f32[2,1,32], index: 21, kind: input, shape index: {}]   ;;  %s5718_s3 = inlined_call_operand.vmem [shape: f32[14,16], index: 3, kind: input, shape index: {}]   ;;  %s5719_s22 = inlined_call_operand.vmem [shape: f32[14,32], index: 22, kind: output, shape index: {}]  }
   0x1   :  { %5732 = sst [smem:[#allocation2_spill]] %s5697_s6  ;;  %4024 = vset.pattern.permute.xlu0 %v4320_v3  ;;  %4025 = vset.pattern.permute.xlu1 %v4320_v3  ;;  %v84_v30 = vlaneseq  ;;  %vm259_vm4 = vcmask 523264   ;;  %vm4324_vm8 = vmmov 1   ;;  %vm537_vm14 = vcmask 1043456  }
   0x2   :  { %5733 = sst [smem:[#allocation3_spill]] %s5698_s5  ;;  %s5739_s29 = sld [smem:[#allocation2_spill]]  ;;  %3741 = vmatprep.subr.bf16.mxu0 %v4321_v23  ;;  %3745 = vmatprep.mubr.msk.bf16.mxu0 %vm4322_vm1, %v4321_v23 }
   0x3   :  { %5734 = sst [smem:[#allocation4_spill]] %s5699_s0  ;;  %s5740_s25 = sld [smem:[#allocation3_spill]]  ;;  %v4550_v31 = vand.u32 127, %v84_v30 }
   0x4   :  { %5735 = sst [smem:[#allocation5_spill]] %s5700_s7  ;;  %s5741_s6 = sld [smem:[#allocation4_spill]] }
   0x5   :  { %5736 = sst [smem:[#allocation6_spill]] %s5701_s8  ;;  %s5742_s24 = sld [smem:[#allocation5_spill]] }
   0x6   :  { %5737 = sst [smem:[#allocation7_spill]] %s5702_s9  ;;  %s5743_s30 = sld [smem:[#allocation6_spill]] }
   0x7   :  { %5738 = sst [smem:[#allocation8_spill]] %s5703_s1  ;;  %s4323_s8 = smov 64  }
   0x8   :  { %v154_v0 = vld [vmem:[%s5739_s29] sm:$0xff]  ;;  %v155_v1 = vld [vmem:[%s5739_s29 + $0x8] sm:$0xff]  ;;  %v156_v2 = vld [vmem:[%s5739_s29 + $0x10] sm:$0xff]  ;;  %s4326_s7 = smov 96   ;;  %s5778_s28 = sld [smem:[#allocation7_spill]] }
   0x9   :  { %v162_v4 = vpack.c.bf16 %v155_v1, %v154_v0  ;;  %v157_v5 = vld [vmem:[%s5739_s29 + $0x18] sm:$0xff]  ;;  %v146_v6 = vld [vmem:[%s5740_s25] sm:$0xff]  ;;  %v147_v7 = vld [vmem:[%s5740_s25 + $0x8] sm:$0xff]  ;;  %s4331_s29 = smov 112   ;;  %s4332_s5 = smov 104  }
   0xa   :  { %v163_v8 = vpack.c.bf16 %v157_v5, %v156_v2  ;;  %v158_v9 = vpack.c.bf16 %v147_v7, %v146_v6  ;;  %v148_v10 = vld [vmem:[%s5740_s25 + $0x10] sm:$0xff]  ;;  %v149_v11 = vld [vmem:[%s5740_s25 + $0x18] sm:$0xff]  ;;  %v4484_v12 = vld [vmem:[%s5741_s6] sm:$0xff]  ;;  %s4336_s1 = smov 8  }
   0xb   :  { %3709 = vmatprep.subr.bf16.mxu1 %v162_v4  ;;  %v4489_v13 = vld [vmem:[%s5741_s6 + $0x10] sm:$0xff]  ;;  %v150_v14 = vld [vmem:[%s5740_s25 + $0x20] sm:$0xff]  ;;  %v151_v15 = vld [vmem:[%s5740_s25 + $0x28] sm:$0xff]  ;;  %87 = vperm.xlu0 %4024, %v4484_v12   ;;  %v159_v17 = vpack.c.bf16 %v149_v11, %v148_v10  ;;  %vm359_vm7 = vcmp.eq.s32.totalorder %v4484_v12, 0 }
   0xc   :  { %3710 = vmatpush3.bf16.msra.mxu1 %v162_v4  ;;  %3713 = vmatprep.mubr.msk.bf16.mxu1 %vm164_vm0, %v158_v9  ;;  %v4502_v16 = vld [vmem:[%s5741_s6 + $0x8] sm:$0xff]  ;;  %v4507_v18 = vld [vmem:[%s5741_s6 + $0x18] sm:$0xff]  ;;  %v160_v19 = vpack.c.bf16 %v151_v15, %v150_v14  ;;  %v152_v20 = vld [vmem:[%s5740_s25 + $0x30] sm:$0xff]  ;;  %vm361_vm15 = vcmp.eq.s32.totalorder %v4489_v13, 0 }
   0xd   :  { %3711 = vmatprep.subr.bf16.mxu1 %v163_v8  ;;  %93 = vperm.xlu1 %4025, %v4489_v13   ;;  %v153_v21 = vld [vmem:[%s5740_s25 + $0x38] sm:$0xff]  ;;  %v371_v24 = vld [vmem:[%s5742_s24] sm:$0xff]  ;;  %v372_v25 = vld [vmem:[%s5742_s24 + $0x8] sm:$0xff]  ;;  %vm360_vm10 = vcmp.eq.s32.totalorder %v4502_v16, 0  ;;  %s5727_s25 = smov 56  }
   0xe   :  { %v161_v22 = vpack.c.bf16 %v153_v21, %v152_v20  ;;  %v4527_v26 = vpack.c.bf16 %v372_v25, %v371_v24  ;;  %v373_v27 = vld [vmem:[%s5742_s24 + $0x10] sm:$0xff]  ;;  %v374_v28 = vld [vmem:[%s5742_s24 + $0x18] sm:$0xff]  ;;  %v4570_v58 = vld [vmem:[%s5743_s30] ss:$0 sm:$0xff] }
   0xf   :  { %90 = vperm.xlu0 %4024, %v4502_v16   ;;  %v4537_v29 = vpack.c.bf16 %v374_v28, %v373_v27  ;;  %vm4585_vm9 = vmxor %vm359_vm7, %vm4324_vm8 }
  0x10   :  { %3712 = vmatpush3.bf16.msra.mxu1 %v163_v8  ;;  %3742 = vmatpush3.bf16.msra.mxu0 %v4527_v26  ;;  %v473_v12 = vsel %vm4585_vm9, 1, %v4320_v3  ;;  %vm4595_vm11 = vmxor %vm360_vm10, %vm4324_vm8 }
  0x11   :  { %96 = vperm.xlu1 %4025, %v4507_v18   ;;  %3743 = vmatprep.subr.bf16.mxu0 %v4321_v23  ;;  %v4603_v16 = vsel %vm4595_vm11, 1, %v4320_v3 }
  0x13   :  { %3714 = vmatmul.mubr.msk.bf16.vlgmr.msra.gmra.mrb[0].mxu1 %vm164_vm0, %v159_v17 }
  0x14   :  { %3717 = vmatprep.mubr.msk.bf16.mxu1 %vm164_vm0, %v160_v19  ;;  %3744 = vmatpush3.bf16.msra.mxu0 %v4537_v29 }
  0x15   :  { %3749 = vmatprep.subr.bf16.mxu0 %v4321_v23 }
  0x17   :  { %3746 = vmatmul.mubr.bf16.vlgmr.msra.gmra.mrb[0].mxu0 %v4320_v3 }
  0x18   :  { %3750 = vmatpush3.bf16.msra.mxu0 %v4527_v26  ;;  %3753 = vmatprep.mubr.msk.bf16.mxu0 %vm4322_vm1, %v4321_v23 }
  0x19   :  { %3751 = vmatprep.subr.bf16.mxu0 %v4321_v23 }
  0x1b   :  { %3718 = vmatmul.mubr.msk.bf16.gmra.mrb[4].mxu1 %vm164_vm0, %v161_v22 }
  0x1c   :  { %3752 = vmatpush3.bf16.msra.mxu0 %v4537_v29 }
  0x1d   :  { %3757 = vmatprep.subr.bf16.mxu0 %v4321_v23 }
  0x8a   :  { %v88_v32 = vpop.permute.xlu0 %87 }
  0x8b   :  { %vm122_vm2 = vcmp.eq.s32.totalorder %v88_v32, %v4550_v31 }
  0x8c   :  { %v134_v33 = vsel %vm122_vm2, 1.0, %v4321_v23  ;;  %v94_v43 = vpop.permute.xlu1 %93  ;;  %vm600_vm2 = vmxor %vm361_vm15, %vm4324_vm8 }
  0x8d   :  { %vm124_vm5 = vcmp.eq.s32.totalorder %v94_v43, %v4550_v31 }
  0x8e   :  { %v91_v34 = vpop.permute.xlu0 %90  ;;  %v136_v51 = vsel %vm124_vm5, 1.0, %v4321_v23 }
  0x8f   :  { %vm123_vm3 = vcmp.eq.s32.totalorder %v91_v34, %v4550_v31 }
  0x90   :  { %v135_v35 = vsel %vm123_vm3, 1.0, %v4321_v23  ;;  %v97_v49 = vpop.permute.xlu1 %96 }
  0x91   :  { %v242_v36 = vpack.c.bf16 %v135_v35, %v134_v33  ;;  %vm125_vm6 = vcmp.eq.s32.totalorder %v97_v49, %v4550_v31 }
  0x92   :  { %v137_v52 = vsel %vm125_vm6, 1.0, %v4321_v23 }
  0x93   :  { %3729 = vmatprep.mubr.msk.bf16.mxu1 %vm259_vm4, %v242_v36  ;;  %v243_v53 = vpack.c.bf16 %v137_v52, %v136_v51 }
  0xe6   :  { %v3715_v37 = vpop.f32.mrb[0].mxu1 }
  0xe7   :  { %v211_v38 = vpop.f32.mrb[1].mxu1 }
  0xe8   :  { %v3716_v39 = vpop.f32.mrb[2].mxu1 }
  0xe9   :  { %v249_v40 = vpack.c.bf16 %v3716_v39, %v3715_v37  ;;  %v214_v41 = vpop.f32.mrb[3].mxu1 }
  0xea   :  { %v248_v42 = vpack.c.bf16 %v214_v41, %v211_v38  ;;  %v414_v54 = vpop.f32.mrb[0].mxu0 }
  0xeb   :  { %v3747_v55 = vpop.f32.mrb[1].mxu0 }
  0xec   :  { %3721 = vmatprep.subr.bf16.mxu1 %v248_v42  ;;  %v417_v56 = vpop.f32.mrb[2].mxu0 }
  0xed   :  { %3722 = vmatpush3.bf16.msra.mxu1 %v248_v42  ;;  %v3748_v57 = vpop.f32.mrb[3].mxu0 }
  0xee   :  { %v3719_v44 = vpop.f32.mrb[4].mxu1  ;;  %3723 = vmatprep.subr.bf16.mxu1 %v249_v40 }
  0xef   :  { %v227_v45 = vpop.f32.mrb[5].mxu1 }
  0xf0   :  { %v3720_v46 = vpop.f32.mrb[6].mxu1 }
  0xf1   :  { %v251_v47 = vpack.c.bf16 %v3720_v46, %v3719_v44  ;;  %v230_v48 = vpop.f32.mrb[7].mxu1  ;;  %3724 = vmatpush3.bf16.msra.mxu1 %v249_v40 }
  0xf2   :  { %v250_v50 = vpack.c.bf16 %v230_v48, %v227_v45 }
  0xf4   :  { %3725 = vmatprep.subr.bf16.mxu1 %v250_v50 }
  0xf5   :  { %3726 = vmatpush3.bf16.msra.mxu1 %v250_v50 }
  0xf6   :  { %3727 = vmatprep.subr.bf16.mxu1 %v251_v47 }
  0xf9   :  { %3728 = vmatpush3.bf16.msra.mxu1 %v251_v47 }
  0xfa   :  { %3781 = vmatprep.subr.bf16.mxu1 %v4321_v23 }
  0xfc   :  { %3730 = vmatmul.mubr.msk.bf16.vlgmr.msra.gmra.mrb[8].mxu1 %vm259_vm4, %v243_v53 }
  0xfd   :  { %3782 = vmatpush3.bf16.msra.mxu1 %v4527_v26 }
  0xfe   :  { %3783 = vmatprep.subr.bf16.mxu1 %v4321_v23 }
 0x101   :  { %3784 = vmatpush3.bf16.msra.mxu1 %v4537_v29 }
 0x102   :  { %3797 = vmatprep.subr.bf16.mxu1 %v4321_v23 }
 0x1cf   :  { %v4572_v59 = vpop.f32.mrb[8].mxu1 }
 0x1d0   :  { %v312_v60 = vpop.f32.mrb[9].mxu1 }
 0x1d1   :  { %v313_v61 = vadd.f32 %v4570_v58, %v312_v60  ;;  %v4575_v62 = vpop.f32.mrb[10].mxu1 }
 0x1d2   :  { %v315_v63 = vpop.f32.mrb[11].mxu1 }
 0x1d3   :  { %v421_v0 = vadd.f32 %v414_v54, %v313_v61  ;;  %v4578_v1 = vadd.f32 %v4570_v58, %v315_v63  ;;  %v321_v54 = vadd.f32 %v4572_v59, %v4570_v58 }
 0x1d5   :  { %4111 = vtanh.f32 %v421_v0  ;;  %v422_v2 = vadd.f32 %v417_v56, %v4578_v1  ;;  %v3501_v6 = vmul.f32 -1.442695, %v421_v0 }
 0x1d7   :  { %4113 = vtanh.f32 %v422_v2  ;;  %v3502_v7 = vmul.f32 -1.442695, %v422_v2 }
 0x1d8   :  { %4115 = vpow2.f32 %v3501_v6 }
 0x1d9   :  { %4117 = vpow2.f32 %v3502_v7 }
 0x1df   :  { %v4112_v4 = vpop.eup %4111 }
 0x1e0   :  { %441 = vrot.lane.b32.xlu0 %v4112_v4, %s4323_s8 }
 0x1e1   :  { %v4114_v5 = vpop.eup %4113 }
 0x1e2   :  { %443 = vrot.lane.b32.xlu1 %v4114_v5, %s4323_s8  ;;  %v4116_v8 = vpop.eup %4115 }
 0x1e3   :  { %v4118_v9 = vpop.eup %4117  ;;  %v429_v10 = vadd.f32 1.0, %v4116_v8 }
 0x1e4   :  { %v430_v11 = vadd.f32 1.0, %v4118_v9 }
 0x1e5   :  { %4119 = vrcp.f32 %v429_v10 }
 0x1e6   :  { %4121 = vrcp.f32 %v430_v11 }
 0x1ef   :  { %v4120_v14 = vpop.eup %4119 }
 0x1f0   :  { %v4122_v20 = vpop.eup %4121  ;;  %v437_v25 = vmul.f32 0.0, %v4120_v14 }
 0x1f1   :  { %v438_v30 = vmul.f32 0.0, %v4122_v20 }
 0x252   :  { %v442_v15 = vpop.permute.xlu0 %441 }
 0x253   :  { %v447_v19 = vmul.f32 %v4120_v14, %v442_v15 }
 0x254   :  { %v444_v21 = vpop.permute.xlu1 %443 }
 0x255   :  { %451 = vrot.lane.b32.xlu0 %v447_v19, %s4325_s23  ;;  %v448_v22 = vmul.f32 %v4122_v20, %v444_v21 }
 0x257   :  { %453 = vrot.lane.b32.xlu1 %v448_v22, %s4325_s23 }
 0x259   :  { %476 = vperm.xlu0 %4024, %v473_v12  }
 0x25b   :  { %479 = vperm.xlu1 %4025, %v4603_v16  }
 0x2c7   :  { %v452_v27 = vpop.permute.xlu0 %451 }
 0x2c8   :  { %v4606_v28 = vadd.f32 %v452_v27, %v437_v25 }
 0x2c9   :  { %v454_v32 = vpop.permute.xlu1 %453 }
 0x2ca   :  { %4123 = vtanh.f32 %v4606_v28  ;;  %v458_v33 = vadd.f32 %v454_v32, %v438_v30  ;;  %v601_v32 = vsel %vm600_vm2, 1, %v4320_v3 }
 0x2cc   :  { %4125 = vtanh.f32 %v458_v33 }
 0x2d4   :  { %v4124_v34 = vpop.eup %4123 }
 0x2d5   :  { %463 = vrot.lane.b32.xlu0 %v4124_v34, %s4323_s8  ;;  %v603_v34 = vrot.slane %v601_v32, 4 }
 0x2d6   :  { %v4126_v35 = vpop.eup %4125 }
 0x2d7   :  { %465 = vrot.lane.b32.xlu1 %v4126_v35, %s4323_s8  ;;  %v602_v35 = vrot.slane %v4603_v16, 4  ;;  %v4658_v16 = vld [vmem:[%s5741_s6 + $0x28] sm:$0xff]  ;;  %vm4671_vm6 = vcmp.ne.s32.totalorder %v603_v34, 0 }
 0x2d8   :  { %v477_v36 = vpop.permute.xlu0 %476  ;;  %vm608_vm7 = vmand %vm4595_vm11, %vm4671_vm6 }
 0x2d9   :  { %vm481_vm12 = vcmp.eq.s32.totalorder %v477_v36, 1  ;;  %v604_v36 = vsel %vm537_vm14, %v602_v35, %v603_v34 }
 0x2da   :  { %v480_v37 = vpop.permute.xlu1 %479  ;;  %v485_v10 = vsel %vm481_vm12, %v4606_v28, 0.0  ;;  %vm605_vm3 = vcmp.ne.s32.totalorder %v604_v36, 0 }
 0x2db   :  { %vm482_vm13 = vcmp.eq.s32.totalorder %v480_v37, 1  ;;  %v4651_v37 = vld [vmem:[%s5741_s6 + $0x20] sm:$0xff]  ;;  %vm4667_vm5 = vmand %vm4585_vm9, %vm605_vm3  ;;  %vm362_vm3 = vcmp.eq.s32.totalorder %v4507_v18, 0 }
 0x2dc   :  { %v486_v11 = vsel %vm482_vm13, %v458_v33, 0.0  ;;  %v609_v17 = vsel %vm4667_vm5, 1, %v4320_v3 }
 0x2dd   :  { %v562_v15 = vrot.slane %v486_v11, 4 }
 0x347   :  { %v464_v38 = vpop.permute.xlu0 %463 }
 0x348   :  { %v469_v39 = vmul.f32 %v4120_v14, %v464_v38  ;;  %v561_v14 = vrot.slane %v485_v10, 4 }
 0x349   :  { %v466_v40 = vpop.permute.xlu1 %465 }
 0x34a   :  { %v470_v41 = vmul.f32 %v4122_v20, %v466_v40  ;;  %v4612_v42 = vsel %vm481_vm12, %v469_v39, 0.0  ;;  %v563_v22 = vsel %vm537_vm14, %v561_v14, %v562_v15  ;;  %v4663_v39 = vld [vmem:[%s5741_s6 + $0x30] sm:$0xff] }
 0x34c   :  { %v4615_v43 = vsel %vm482_vm13, %v470_v41, 0.0 }
 0x34d   :  { %v487_v44 = vpack.c.bf16 %v4615_v43, %v4612_v42  ;;  %v4031_v45 = vpack.i.bf16 %v4615_v43, %v4612_v42 }
 0x34f   :  { %489 = vrot.lane.b32.xlu0 %v487_v44, %s4325_s23  ;;  %v4680_v44 = vld [vmem:[%s5741_s6 + $0x38] sm:$0xff] }
 0x3c1   :  { %v490_v46 = vpop.permute.xlu0 %489 }
 0x3c2   :  { %3754 = vmatmul.mubr.msk.bf16.vlgmr.msra.gmra.mrb[4].mxu0 %vm164_vm0, %v490_v46  ;;  %v610_v46 = vsel %vm608_vm7, 1, %v4320_v3 }
 0x3c3   :  { %3758 = vmatpush3.bf16.msra.mxu0 %v4527_v26  ;;  %3761 = vmatprep.mubr.msk.bf16.mxu0 %vm4322_vm1, %v4321_v23 }
 0x3c4   :  { %3759 = vmatprep.subr.bf16.mxu0 %v4321_v23 }
 0x3c7   :  { %3760 = vmatpush3.bf16.msra.mxu0 %v4537_v29 }
 0x3c8   :  { %3765 = vmatprep.subr.bf16.mxu0 %v4321_v23 }
 0x495   :  { %v528_v47 = vpop.f32.mrb[4].mxu0 }
 0x496   :  { %v538_v48 = vrot.slane %v528_v47, 4  ;;  %v3755_v49 = vpop.f32.mrb[5].mxu0 }
 0x497   :  { %v531_v50 = vpop.f32.mrb[6].mxu0 }
 0x498   :  { %v543_v51 = vadd.f32 %v538_v48, %v4578_v1  ;;  %v539_v52 = vrot.slane %v531_v50, 4  ;;  %v3756_v53 = vpop.f32.mrb[7].mxu0 }
 0x49a   :  { %4127 = vtanh.f32 %v543_v51  ;;  %v540_v55 = vsel %vm537_vm14, %v538_v48, %v539_v52  ;;  %v3504_v61 = vmul.f32 -1.442695, %v543_v51 }
 0x49b   :  { %v544_v56 = vadd.f32 %v540_v55, %v321_v54 }
 0x49d   :  { %4129 = vtanh.f32 %v544_v56  ;;  %v3505_v63 = vmul.f32 -1.442695, %v544_v56 }
 0x49e   :  { %4131 = vpow2.f32 %v3504_v61 }
 0x49f   :  { %4133 = vpow2.f32 %v3505_v63 }
 0x4a4   :  { %v4128_v57 = vpop.eup %4127 }
 0x4a5   :  { %570 = vrot.lane.b32.xlu1 %v4128_v57, %s4323_s8 }
 0x4a7   :  { %v4130_v60 = vpop.eup %4129 }
 0x4a8   :  { %572 = vrot.lane.b32.xlu0 %v4130_v60, %s4323_s8  ;;  %v4132_v0 = vpop.eup %4131 }
 0x4a9   :  { %v4134_v1 = vpop.eup %4133  ;;  %v551_v2 = vadd.f32 1.0, %v4132_v0 }
 0x4aa   :  { %v552_v59 = vadd.f32 1.0, %v4134_v1 }
 0x4ab   :  { %4135 = vrcp.f32 %v551_v2 }
 0x4ac   :  { %4137 = vrcp.f32 %v552_v59 }
 0x4b5   :  { %v4136_v4 = vpop.eup %4135 }
 0x4b6   :  { %v4138_v7 = vpop.eup %4137  ;;  %v566_v19 = vmul.f32 %v4136_v4, %v561_v14 }
 0x4b7   :  { %v567_v12 = vmul.f32 %v4138_v7, %v563_v22  ;;  %v324_v22 = vadd.f32 %v4575_v62, %v4570_v58 }
 0x517   :  { %v571_v5 = vpop.permute.xlu1 %570 }
 0x518   :  { %v576_v6 = vmul.f32 %v4136_v4, %v571_v5 }
 0x51a   :  { %580 = vrot.lane.b32.xlu1 %v576_v6, %s4325_s23  ;;  %v573_v8 = vpop.permute.xlu0 %572 }
 0x51b   :  { %v577_v9 = vmul.f32 %v4138_v7, %v573_v8 }
 0x51d   :  { %582 = vrot.lane.b32.xlu0 %v577_v9, %s4325_s23 }
 0x58c   :  { %v581_v20 = vpop.permute.xlu1 %580 }
 0x58d   :  { %v586_v21 = vadd.f32 %v581_v20, %v566_v19 }
 0x58f   :  { %4139 = vtanh.f32 %v586_v21  ;;  %v583_v25 = vpop.permute.xlu0 %582  ;;  %v642_v30 = vrot.slane %v586_v21, 4 }
 0x590   :  { %v587_v27 = vadd.f32 %v583_v25, %v567_v12 }
 0x592   :  { %4141 = vtanh.f32 %v587_v27  ;;  %v643_v28 = vrot.slane %v587_v27, 4 }
 0x594   :  { %v644_v33 = vsel %vm537_vm14, %v642_v30, %v643_v28 }
 0x599   :  { %v4140_v13 = vpop.eup %4139 }
 0x59a   :  { %592 = vrot.lane.b32.xlu1 %v4140_v13, %s4323_s8 }
 0x59c   :  { %v4142_v38 = vpop.eup %4141 }
 0x59d   :  { %594 = vrot.lane.b32.xlu0 %v4142_v38, %s4323_s8 }
 0x59e   :  { %99 = vperm.xlu1 %4025, %v4651_v37  }
 0x5a1   :  { %102 = vperm.xlu0 %4024, %v4658_v16  }
 0x5a2   :  { %105 = vperm.xlu1 %4025, %v4663_v39  }
 0x5a5   :  { %108 = vperm.xlu0 %4024, %v4680_v44  }
 0x5a6   :  { %612 = vperm.xlu1 %4025, %v609_v17  }
 0x5a9   :  { %615 = vperm.xlu0 %4024, %v610_v46  }
 0x5ad   :  { %4032 = vrot.lane.b32.xlu0 %v4031_v45, %s4325_s23 }
 0x5b1   :  { %647 = vrot.lane.b32.xlu0 %v643_v28, %s4326_s7 }
 0x5b5   :  { %653 = vrot.lane.b32.xlu0 %v486_v11, %s4326_s7 }
 0x60c   :  { %v593_v47 = vpop.permute.xlu1 %592 }
 0x60d   :  { %v598_v48 = vmul.f32 %v4136_v4, %v593_v47 }
 0x60f   :  { %v595_v49 = vpop.permute.xlu0 %594  ;;  %v621_v51 = vrot.slane %v598_v48, 4 }
 0x610   :  { %v599_v50 = vmul.f32 %v4138_v7, %v595_v49 }
 0x612   :  { %v622_v52 = vrot.slane %v599_v50, 4 }
 0x614   :  { %v623_v53 = vsel %vm537_vm14, %v621_v51, %v622_v52 }
 0x615   :  { %v4026_v54 = vpack.i.bf16 %v622_v52, %v623_v53 }
 0x617   :  { %4027 = vrot.lane.b32.xlu1 %v4026_v54, %s4325_s23 }
 0x61b   :  { %645 = vrot.lane.b32.xlu1 %v644_v33, %s4326_s7 }
 0x61d   :  { %v100_v42 = vpop.permute.xlu1 %99 }
 0x61e   :  { %vm126_vm9 = vcmp.eq.s32.totalorder %v100_v42, %v4550_v31 }
 0x61f   :  { %651 = vrot.lane.b32.xlu1 %v485_v10, %s4326_s7  ;;  %v138_v55 = vsel %vm126_vm9, 1.0, %v4321_v23  ;;  %vm4753_vm9 = vmxor %vm362_vm3, %vm4324_vm8 }
 0x620   :  { %v103_v43 = vpop.permute.xlu0 %102 }
 0x621   :  { %vm127_vm10 = vcmp.eq.s32.totalorder %v103_v43, %v4550_v31  ;;  %v106_v45 = vpop.permute.xlu1 %105 }
 0x622   :  { %v139_v56 = vsel %vm127_vm10, 1.0, %v4321_v23  ;;  %vm128_vm12 = vcmp.eq.s32.totalorder %v106_v45, %v4550_v31  ;;  %vm363_vm10 = vcmp.eq.s32.totalorder %v4651_v37, 0 }
 0x623   :  { %v244_v57 = vpack.c.bf16 %v139_v56, %v138_v55  ;;  %v140_v61 = vsel %vm128_vm12, 1.0, %v4321_v23  ;;  %vm764_vm12 = vmand %vm4667_vm5, %vm4753_vm9 }
 0x624   :  { %v109_v60 = vpop.permute.xlu0 %108  ;;  %v766_v37 = vsel %vm764_vm12, 1, %v4320_v3 }
 0x625   :  { %vm129_vm13 = vcmp.eq.s32.totalorder %v109_v60, %v4550_v31  ;;  %3733 = vmatprep.mubr.msk.bf16.mxu1 %vm259_vm4, %v244_v57  ;;  %v613_v2 = vpop.permute.xlu1 %612 }
 0x626   :  { %v141_v63 = vsel %vm129_vm13, 1.0, %v4321_v23  ;;  %vm617_vm15 = vcmp.eq.s32.totalorder %v613_v2, 1  ;;  %vm4763_vm13 = vmxor %vm363_vm10, %vm4324_vm8 }
 0x627   :  { %v245_v0 = vpack.c.bf16 %v141_v63, %v140_v61 }
 0x628   :  { %v616_v1 = vpop.permute.xlu0 %615 }
 0x629   :  { %3734 = vmatmul.mubr.msk.bf16.gmra.mrb[12].mxu1 %vm259_vm4, %v245_v0  ;;  %vm618_vm2 = vcmp.eq.s32.totalorder %v616_v1, 1 }
 0x62c   :  { %v4033_v59 = vpop.permute.xlu0 %4032 }
 0x62d   :  { %v4035_v5 = vunpack.i.h.bf16 %v4033_v59  ;;  %v4034_v6 = vunpack.i.l.bf16 %v4033_v59 }
 0x630   :  { %v648_v35 = vpop.permute.xlu0 %647 }
 0x634   :  { %v654_v62 = vpop.permute.xlu0 %653 }
 0x635   :  { %v658_v46 = vsel %vm618_vm2, %v648_v35, %v654_v62 }
 0x689   :  { %v4028_v4 = vpop.permute.xlu1 %4027 }
 0x68a   :  { %v4030_v7 = vunpack.i.h.bf16 %v4028_v4  ;;  %v4029_v8 = vunpack.i.l.bf16 %v4028_v4 }
 0x68c   :  { %v4717_v9 = vsel %vm617_vm15, %v4029_v8, %v4034_v6  ;;  %v4720_v10 = vsel %vm618_vm2, %v4030_v7, %v4035_v5 }
 0x68d   :  { %v659_v11 = vpack.c.bf16 %v4720_v10, %v4717_v9  ;;  %v4036_v14 = vpack.i.bf16 %v4720_v10, %v4717_v9  ;;  %v646_v34 = vpop.permute.xlu1 %645 }
 0x68f   :  { %3762 = vmatmul.mubr.msk.bf16.vlgmr.msra.gmra.mrb[8].mxu0 %vm164_vm0, %v659_v11 }
 0x690   :  { %3766 = vmatpush3.bf16.msra.mxu0 %v4527_v26  ;;  %3769 = vmatprep.mubr.msk.bf16.mxu0 %vm4322_vm1, %v4321_v23 }
 0x691   :  { %3767 = vmatprep.subr.bf16.mxu0 %v4321_v23  ;;  %v652_v36 = vpop.permute.xlu1 %651 }
 0x692   :  { %v657_v17 = vsel %vm617_vm15, %v646_v34, %v652_v36  ;;  %vm4781_vm15 = vmand %vm608_vm7, %vm4763_vm13  ;;  %vm364_vm7 = vcmp.eq.s32.totalorder %v4658_v16, 0 }
 0x693   :  { %v767_v60 = vsel %vm4781_vm15, 1, %v4320_v3  ;;  %vm900_vm2 = vmxor %vm364_vm7, %vm4324_vm8  ;;  %vm366_vm7 = vcmp.eq.s32.totalorder %v4680_v44, 0 }
 0x694   :  { %3768 = vmatpush3.bf16.msra.mxu0 %v4537_v29 }
 0x695   :  { %3773 = vmatprep.subr.bf16.mxu0 %v4321_v23 }
 0x6fc   :  { %v4733_v15 = vpop.f32.mrb[12].mxu1 }
 0x6fd   :  { %v328_v19 = vpop.f32.mrb[13].mxu1 }
 0x6fe   :  { %v4735_v20 = vpop.f32.mrb[14].mxu1  ;;  %v4742_v25 = vadd.f32 %v4570_v58, %v328_v19 }
 0x6ff   :  { %v4737_v21 = vpop.f32.mrb[15].mxu1 }
 0x762   :  { %v697_v12 = vpop.f32.mrb[8].mxu0 }
 0x763   :  { %v704_v27 = vadd.f32 %v697_v12, %v324_v22  ;;  %v3763_v30 = vpop.f32.mrb[9].mxu0 }
 0x764   :  { %v700_v28 = vpop.f32.mrb[10].mxu0 }
 0x765   :  { %4143 = vtanh.f32 %v704_v27  ;;  %v705_v32 = vadd.f32 %v700_v28, %v4742_v25  ;;  %v3764_v33 = vpop.f32.mrb[11].mxu0  ;;  %v3507_v47 = vmul.f32 -1.442695, %v704_v27 }
 0x767   :  { %4145 = vtanh.f32 %v705_v32  ;;  %v3508_v48 = vmul.f32 -1.442695, %v705_v32 }
 0x768   :  { %4147 = vpow2.f32 %v3507_v47 }
 0x769   :  { %4149 = vpow2.f32 %v3508_v48 }
 0x76f   :  { %v4144_v13 = vpop.eup %4143 }
 0x770   :  { %732 = vrot.lane.b32.xlu1 %v4144_v13, %s4323_s8 }
 0x771   :  { %v4146_v38 = vpop.eup %4145 }
 0x772   :  { %734 = vrot.lane.b32.xlu0 %v4146_v38, %s4323_s8  ;;  %v4148_v49 = vpop.eup %4147 }
 0x773   :  { %v4150_v50 = vpop.eup %4149  ;;  %v712_v51 = vadd.f32 1.0, %v4148_v49 }
 0x774   :  { %722 = vrot.lane.b32.xlu1 %v657_v17, %s4325_s23  ;;  %v713_v52 = vadd.f32 1.0, %v4150_v50  ;;  %v332_v17 = vadd.f32 %v4570_v58, %v4737_v21 }
 0x775   :  { %4151 = vrcp.f32 %v712_v51 }
 0x776   :  { %724 = vrot.lane.b32.xlu0 %v658_v46, %s4325_s23  ;;  %4153 = vrcp.f32 %v713_v52 }
 0x77f   :  { %v4152_v54 = vpop.eup %4151 }
 0x780   :  { %v4154_v18 = vpop.eup %4153 }
 0x7e2   :  { %v733_v42 = vpop.permute.xlu1 %732 }
 0x7e3   :  { %v738_v43 = vmul.f32 %v4152_v54, %v733_v42 }
 0x7e4   :  { %v735_v55 = vpop.permute.xlu0 %734 }
 0x7e5   :  { %742 = vrot.lane.b32.xlu1 %v738_v43, %s4325_s23  ;;  %v739_v56 = vmul.f32 %v4154_v18, %v735_v55 }
 0x7e6   :  { %v4789_v61 = vpop.permute.xlu1 %722 }
 0x7e7   :  { %744 = vrot.lane.b32.xlu0 %v739_v56, %s4325_s23  ;;  %v728_v63 = vmul.f32 %v4152_v54, %v4789_v61 }
 0x7e8   :  { %v4792_v24 = vpop.permute.xlu0 %724 }
 0x7e9   :  { %769 = vperm.xlu1 %4025, %v766_v37   ;;  %v729_v1 = vmul.f32 %v4154_v18, %v4792_v24 }
 0x7eb   :  { %772 = vperm.xlu0 %4024, %v767_v60  }
 0x857   :  { %v743_v41 = vpop.permute.xlu1 %742 }
 0x858   :  { %v4794_v0 = vadd.f32 %v743_v41, %v728_v63 }
 0x859   :  { %v745_v2 = vpop.permute.xlu0 %744 }
 0x85a   :  { %4155 = vtanh.f32 %v4794_v0  ;;  %v4798_v59 = vadd.f32 %v745_v2, %v729_v1  ;;  %v902_v2 = vsel %vm900_vm2, 1, %v4320_v3 }
 0x85c   :  { %4157 = vtanh.f32 %v4798_v59 }
 0x864   :  { %v4156_v4 = vpop.eup %4155 }
 0x865   :  { %754 = vrot.lane.b32.xlu1 %v4156_v4, %s4323_s8  ;;  %v901_v4 = vsel %vm4763_vm13, 1, %v4320_v3 }
 0x866   :  { %v4158_v5 = vpop.eup %4157 }
 0x867   :  { %756 = vrot.lane.b32.xlu0 %v4158_v5, %s4323_s8 }
 0x868   :  { %v770_v6 = vpop.permute.xlu1 %769 }
 0x869   :  { %4037 = vrot.lane.b32.xlu1 %v4036_v14, %s4326_s7  ;;  %vm774_vm11 = vcmp.eq.s32.totalorder %v770_v6, 1 }
 0x86a   :  { %v773_v7 = vpop.permute.xlu0 %772  ;;  %v786_v60 = vsel %vm774_vm11, %v4794_v0, %v4789_v61  ;;  %v904_v61 = vrot.slane %v902_v2, 4  ;;  %v903_v0 = vrot.slane %v901_v4, 4 }
 0x86b   :  { %vm775_vm6 = vcmp.eq.s32.totalorder %v773_v7, 1  ;;  %v861_v41 = vrot.slane %v786_v60, 4 }
 0x86c   :  { %v787_v63 = vsel %vm775_vm6, %v4798_v59, %v4792_v24  ;;  %vm4857_vm13 = vcmp.ne.s32.totalorder %v904_v61, 0 }
 0x86d   :  { %v862_v1 = vrot.slane %v787_v63, 4  ;;  %vm909_vm5 = vmand %vm4781_vm15, %vm4857_vm13 }
 0x86e   :  { %v911_v53 = vsel %vm909_vm5, 1, %v4320_v3 }
 0x86f   :  { %v863_v6 = vsel %vm537_vm14, %v861_v41, %v862_v1 }
 0x8d7   :  { %v755_v8 = vpop.permute.xlu1 %754 }
 0x8d8   :  { %v760_v22 = vmul.f32 %v4152_v54, %v755_v8 }
 0x8d9   :  { %v757_v11 = vpop.permute.xlu0 %756 }
 0x8da   :  { %v761_v12 = vmul.f32 %v4154_v18, %v757_v11 }
 0x8db   :  { %v4038_v19 = vpop.permute.xlu1 %4037 }
 0x8dc   :  { %v4040_v27 = vunpack.i.h.bf16 %v4038_v19  ;;  %v4039_v30 = vunpack.i.l.bf16 %v4038_v19 }
 0x8de   :  { %v4808_v28 = vsel %vm774_vm11, %v760_v22, %v4039_v30  ;;  %v4811_v32 = vsel %vm775_vm6, %v761_v12, %v4040_v27  ;;  %v905_v22 = vsel %vm537_vm14, %v903_v0, %v904_v61  ;;  %vm365_vm11 = vcmp.eq.s32.totalorder %v4663_v39, 0 }
 0x8df   :  { %v788_v9 = vpack.c.bf16 %v4811_v32, %v4808_v28  ;;  %v4046_v10 = vpack.i.bf16 %v4811_v32, %v4808_v28  ;;  %vm906_vm3 = vcmp.ne.s32.totalorder %v905_v22, 0  ;;  %vm4918_vm6 = vmxor %vm365_vm11, %vm4324_vm8 }
 0x8e0   :  { %vm4853_vm10 = vmand %vm764_vm12, %vm906_vm3 }
 0x8e1   :  { %790 = vrot.lane.b32.xlu0 %v788_v9, %s4325_s23  ;;  %v910_v9 = vsel %vm4853_vm10, 1, %v4320_v3  ;;  %vm1065_vm2 = vmand %vm4853_vm10, %vm4918_vm6 }
 0x8e2   :  { %vm4928_vm3 = vmxor %vm366_vm7, %vm4324_vm8  ;;  %v1067_v44 = vsel %vm1065_vm2, 1, %v4320_v3 }
 0x953   :  { %v791_v14 = vpop.permute.xlu0 %790 }
 0x954   :  { %3770 = vmatmul.mubr.msk.bf16.vlgmr.msra.gmra.mrb[12].mxu0 %vm164_vm0, %v791_v14 }
 0x955   :  { %3774 = vmatpush3.bf16.msra.mxu0 %v4527_v26  ;;  %3777 = vmatprep.mubr.msk.bf16.mxu0 %vm4322_vm1, %v4321_v23 }
 0x956   :  { %3775 = vmatprep.subr.bf16.mxu0 %v4321_v23 }
 0x959   :  { %3776 = vmatpush3.bf16.msra.mxu0 %v4537_v29 }
 0x95a   :  { %3789 = vmatprep.subr.bf16.mxu0 %v4321_v23 }
 0xa27   :  { %v829_v33 = vpop.f32.mrb[12].mxu0 }
 0xa28   :  { %v838_v34 = vrot.slane %v829_v33, 4  ;;  %v3771_v35 = vpop.f32.mrb[13].mxu0 }
 0xa29   :  { %v832_v13 = vpop.f32.mrb[14].mxu0 }
 0xa2a   :  { %v843_v36 = vadd.f32 %v838_v34, %v4742_v25  ;;  %v839_v38 = vrot.slane %v832_v13, 4  ;;  %v3772_v62 = vpop.f32.mrb[15].mxu0 }
 0xa2c   :  { %4159 = vtanh.f32 %v843_v36  ;;  %v840_v46 = vsel %vm537_vm14, %v838_v34, %v839_v38  ;;  %v3510_v50 = vmul.f32 -1.442695, %v843_v36 }
 0xa2d   :  { %v844_v47 = vadd.f32 %v840_v46, %v332_v17 }
 0xa2f   :  { %4161 = vtanh.f32 %v844_v47  ;;  %v3511_v51 = vmul.f32 -1.442695, %v844_v47 }
 0xa30   :  { %4163 = vpow2.f32 %v3510_v50 }
 0xa31   :  { %4165 = vpow2.f32 %v3511_v51 }
 0xa36   :  { %v4160_v48 = vpop.eup %4159 }
 0xa37   :  { %870 = vrot.lane.b32.xlu1 %v4160_v48, %s4323_s8 }
 0xa39   :  { %v4162_v49 = vpop.eup %4161 }
 0xa3a   :  { %872 = vrot.lane.b32.xlu0 %v4162_v49, %s4323_s8  ;;  %v4164_v25 = vpop.eup %4163 }
 0xa3b   :  { %v4166_v52 = vpop.eup %4165  ;;  %v851_v54 = vadd.f32 1.0, %v4164_v25 }
 0xa3c   :  { %v852_v42 = vadd.f32 1.0, %v4166_v52 }
 0xa3d   :  { %4167 = vrcp.f32 %v851_v54  ;;  %v337_v54 = vadd.f32 %v4733_v15, %v4570_v58 }
 0xa3e   :  { %4169 = vrcp.f32 %v852_v42 }
 0xa47   :  { %v4168_v21 = vpop.eup %4167 }
 0xa48   :  { %v4170_v55 = vpop.eup %4169  ;;  %v866_v5 = vmul.f32 %v4168_v21, %v861_v41 }
 0xa49   :  { %v867_v11 = vmul.f32 %v4170_v55, %v863_v6 }
 0xaa9   :  { %v871_v43 = vpop.permute.xlu1 %870 }
 0xaaa   :  { %v876_v18 = vmul.f32 %v4168_v21, %v871_v43 }
 0xaac   :  { %880 = vrot.lane.b32.xlu1 %v876_v18, %s4325_s23  ;;  %v873_v56 = vpop.permute.xlu0 %872 }
 0xaad   :  { %v877_v37 = vmul.f32 %v4170_v55, %v873_v56 }
 0xaaf   :  { %882 = vrot.lane.b32.xlu0 %v877_v37, %s4325_s23 }
 0xb1e   :  { %v881_v16 = vpop.permute.xlu1 %880 }
 0xb1f   :  { %v886_v8 = vadd.f32 %v881_v16, %v866_v5 }
 0xb21   :  { %4171 = vtanh.f32 %v886_v8  ;;  %v883_v24 = vpop.permute.xlu0 %882  ;;  %v943_v7 = vrot.slane %v886_v8, 4 }
 0xb22   :  { %v887_v59 = vadd.f32 %v883_v24, %v867_v11 }
 0xb24   :  { %4173 = vtanh.f32 %v887_v59  ;;  %v944_v19 = vrot.slane %v887_v59, 4 }
 0xb26   :  { %v945_v12 = vsel %vm537_vm14, %v943_v7, %v944_v19 }
 0xb2b   :  { %v4172_v30 = vpop.eup %4171 }
 0xb2c   :  { %892 = vrot.lane.b32.xlu1 %v4172_v30, %s4323_s8 }
 0xb2e   :  { %v4174_v40 = vpop.eup %4173 }
 0xb2f   :  { %894 = vrot.lane.b32.xlu0 %v4174_v40, %s4323_s8 }
 0xb30   :  { %913 = vperm.xlu1 %4025, %v910_v9  }
 0xb33   :  { %916 = vperm.xlu0 %4024, %v911_v53  }
 0xb37   :  { %4047 = vrot.lane.b32.xlu0 %v4046_v10, %s4325_s23 }
 0xb3b   :  { %948 = vrot.lane.b32.xlu0 %v944_v19, %s4326_s7 }
 0xb3f   :  { %954 = vrot.lane.b32.xlu0 %v787_v63, %s4326_s7 }
 0xb9e   :  { %v893_v14 = vpop.permute.xlu1 %892 }
 0xb9f   :  { %v898_v33 = vmul.f32 %v4168_v21, %v893_v14  ;;  %v4907_v21 = vadd.f32 %v4735_v20, %v4570_v58 }
 0xba1   :  { %v895_v34 = vpop.permute.xlu0 %894  ;;  %v922_v13 = vrot.slane %v898_v33, 4 }
 0xba2   :  { %v899_v35 = vmul.f32 %v4170_v55, %v895_v34 }
 0xba4   :  { %v923_v36 = vrot.slane %v899_v35, 4 }
 0xba6   :  { %v924_v38 = vsel %vm537_vm14, %v922_v13, %v923_v36 }
 0xba7   :  { %v4041_v62 = vpack.i.bf16 %v923_v36, %v924_v38  ;;  %v4975_v36 = vld [vmem:[%s5741_s6 + $0x40] sm:$0xff]  ;;  %v4980_v38 = vld [vmem:[%s5741_s6 + $0x48] sm:$0xff] }
 0xba9   :  { %4042 = vrot.lane.b32.xlu1 %v4041_v62, %s4325_s23  ;;  %v4987_v62 = vld [vmem:[%s5741_s6 + $0x50] sm:$0xff] }
 0xbad   :  { %946 = vrot.lane.b32.xlu1 %v945_v12, %s4326_s7 }
 0xbaf   :  { %v914_v32 = vpop.permute.xlu1 %913 }
 0xbb0   :  { %vm918_vm9 = vcmp.eq.s32.totalorder %v914_v32, 1 }
 0xbb1   :  { %952 = vrot.lane.b32.xlu1 %v786_v60, %s4326_s7 }
 0xbb2   :  { %v917_v28 = vpop.permute.xlu0 %916 }
 0xbb3   :  { %vm919_vm12 = vcmp.eq.s32.totalorder %v917_v28, 1  ;;  %v4992_v28 = vld [vmem:[%s5741_s6 + $0x58] sm:$0xff]  ;;  %s5779_s6 = sld [smem:[#allocation8_spill]] }
 0xbb6   :  { %v4048_v10 = vpop.permute.xlu0 %4047 }
 0xbb7   :  { %v4050_v46 = vunpack.i.h.bf16 %v4048_v10  ;;  %v4049_v47 = vunpack.i.l.bf16 %v4048_v10 }
 0xbba   :  { %v949_v63 = vpop.permute.xlu0 %948 }
 0xbbe   :  { %v955_v2 = vpop.permute.xlu0 %954 }
 0xbbf   :  { %v959_v20 = vsel %vm919_vm12, %v949_v63, %v955_v2 }
 0xc1b   :  { %v4043_v17 = vpop.permute.xlu1 %4042 }
 0xc1c   :  { %v4045_v48 = vunpack.i.h.bf16 %v4043_v17  ;;  %v4044_v49 = vunpack.i.l.bf16 %v4043_v17 }
 0xc1e   :  { %v4887_v50 = vsel %vm918_vm9, %v4044_v49, %v4049_v47  ;;  %v4890_v51 = vsel %vm919_vm12, %v4045_v48, %v4050_v46 }
 0xc1f   :  { %v960_v25 = vpack.c.bf16 %v4890_v51, %v4887_v50  ;;  %v4051_v52 = vpack.i.bf16 %v4890_v51, %v4887_v50  ;;  %v947_v60 = vpop.permute.xlu1 %946 }
 0xc21   :  { %3778 = vmatmul.mubr.msk.bf16.vlgmr.msra.gmra.mrb[16].mxu0 %vm164_vm0, %v960_v25 }
 0xc22   :  { %3790 = vmatpush3.bf16.msra.mxu0 %v4527_v26  ;;  %3793 = vmatprep.mubr.msk.bf16.mxu0 %vm4322_vm1, %v4321_v23 }
 0xc23   :  { %3791 = vmatprep.subr.bf16.mxu0 %v4321_v23  ;;  %v953_v1 = vpop.permute.xlu1 %952 }
 0xc24   :  { %v958_v58 = vsel %vm918_vm9, %v947_v60, %v953_v1  ;;  %vm4946_vm9 = vmand %vm909_vm5, %vm4928_vm3 }
 0xc25   :  { %v1068_v30 = vsel %vm4946_vm9, 1, %v4320_v3 }
 0xc26   :  { %3792 = vmatpush3.bf16.msra.mxu0 %v4537_v29 }
 0xc27   :  { %3805 = vmatprep.subr.bf16.mxu0 %v4321_v23 }
 0xcf4   :  { %v998_v42 = vpop.f32.mrb[16].mxu0 }
 0xcf5   :  { %v1005_v43 = vadd.f32 %v998_v42, %v337_v54  ;;  %v3779_v18 = vpop.f32.mrb[17].mxu0 }
 0xcf6   :  { %v1001_v55 = vpop.f32.mrb[18].mxu0 }
 0xcf7   :  { %4175 = vtanh.f32 %v1005_v43  ;;  %v1006_v56 = vadd.f32 %v1001_v55, %v4907_v21  ;;  %v3780_v37 = vpop.f32.mrb[19].mxu0  ;;  %v3513_v4 = vmul.f32 -1.442695, %v1005_v43 }
 0xcf9   :  { %4177 = vtanh.f32 %v1006_v56  ;;  %v3514_v5 = vmul.f32 -1.442695, %v1006_v56 }
 0xcfa   :  { %4179 = vpow2.f32 %v3513_v4 }
 0xcfb   :  { %4181 = vpow2.f32 %v3514_v5 }
 0xd01   :  { %v4176_v41 = vpop.eup %4175 }
 0xd02   :  { %1033 = vrot.lane.b32.xlu1 %v4176_v41, %s4323_s8 }
 0xd03   :  { %v4178_v15 = vpop.eup %4177 }
 0xd04   :  { %1035 = vrot.lane.b32.xlu0 %v4178_v15, %s4323_s8  ;;  %v4180_v16 = vpop.eup %4179 }
 0xd05   :  { %v4182_v8 = vpop.eup %4181  ;;  %v1013_v6 = vadd.f32 1.0, %v4180_v16 }
 0xd06   :  { %1023 = vrot.lane.b32.xlu1 %v958_v58, %s4325_s23  ;;  %v1014_v61 = vadd.f32 1.0, %v4182_v8 }
 0xd07   :  { %4183 = vrcp.f32 %v1013_v6 }
 0xd08   :  { %1025 = vrot.lane.b32.xlu0 %v959_v20, %s4325_s23  ;;  %4185 = vrcp.f32 %v1014_v61 }
 0xd11   :  { %v4184_v11 = vpop.eup %4183 }
 0xd12   :  { %v4186_v39 = vpop.eup %4185 }
 0xd74   :  { %v1034_v24 = vpop.permute.xlu1 %1033 }
 0xd75   :  { %v1039_v59 = vmul.f32 %v4184_v11, %v1034_v24  ;;  %v5043_v24 = vld [vmem:[%s5743_s30] ss:$0 sm:$0xff]  ;;  %s4328_s30 = smov 80  }
 0xd76   :  { %v1036_v19 = vpop.permute.xlu0 %1035 }
 0xd77   :  { %1043 = vrot.lane.b32.xlu1 %v1039_v59, %s4325_s23  ;;  %v1040_v22 = vmul.f32 %v4186_v39, %v1036_v19 }
 0xd78   :  { %v4954_v9 = vpop.permute.xlu1 %1023 }
 0xd79   :  { %1045 = vrot.lane.b32.xlu0 %v1040_v22, %s4325_s23  ;;  %v1029_v40 = vmul.f32 %v4184_v11, %v4954_v9 }
 0xd7a   :  { %v4957_v57 = vpop.permute.xlu0 %1025 }
 0xd7b   :  { %1070 = vperm.xlu1 %4025, %v1067_v44   ;;  %v1030_v14 = vmul.f32 %v4186_v39, %v4957_v57 }
 0xd7d   :  { %1073 = vperm.xlu0 %4024, %v1068_v30  }
 0xde9   :  { %v1044_v27 = vpop.permute.xlu1 %1043 }
 0xdea   :  { %v4959_v53 = vadd.f32 %v1044_v27, %v1029_v40 }
 0xdeb   :  { %v1046_v33 = vpop.permute.xlu0 %1045 }
 0xdec   :  { %4187 = vtanh.f32 %v4959_v53  ;;  %v4963_v34 = vadd.f32 %v1046_v33, %v1030_v14 }
 0xdee   :  { %4189 = vtanh.f32 %v4963_v34 }
 0xdf6   :  { %v4188_v35 = vpop.eup %4187 }
 0xdf7   :  { %1055 = vrot.lane.b32.xlu1 %v4188_v35, %s4323_s8 }
 0xdf8   :  { %v4190_v13 = vpop.eup %4189 }
 0xdf9   :  { %1057 = vrot.lane.b32.xlu0 %v4190_v13, %s4323_s8 }
 0xdfa   :  { %v4996_v32 = vpop.permute.xlu1 %1070 }
 0xdfb   :  { %4052 = vrot.lane.b32.xlu1 %v4051_v52, %s4326_s7  ;;  %vm1075_vm15 = vcmp.eq.s32.totalorder %v4996_v32, 1 }
 0xdfc   :  { %v4998_v10 = vpop.permute.xlu0 %1073 }
 0xdfd   :  { %111 = vperm.xlu0 %4024, %v4975_v36   ;;  %vm1076_vm13 = vcmp.eq.s32.totalorder %v4998_v10, 1 }
 0xdff   :  { %114 = vperm.xlu1 %4025, %v4980_v38  }
 0xe01   :  { %117 = vperm.xlu0 %4024, %v4987_v62  }
 0xe03   :  { %120 = vperm.xlu1 %4025, %v4992_v28  }
 0xe69   :  { %v1056_v17 = vpop.permute.xlu1 %1055 }
 0xe6a   :  { %v1061_v48 = vmul.f32 %v4184_v11, %v1056_v17 }
 0xe6b   :  { %v1058_v46 = vpop.permute.xlu0 %1057 }
 0xe6c   :  { %v1062_v49 = vmul.f32 %v4186_v39, %v1058_v46 }
 0xe6d   :  { %v4053_v47 = vpop.permute.xlu1 %4052 }
 0xe6e   :  { %v4055_v50 = vunpack.i.h.bf16 %v4053_v47  ;;  %v4054_v51 = vunpack.i.l.bf16 %v4053_v47 }
 0xe70   :  { %v5004_v25 = vsel %vm1075_vm15, %v1061_v48, %v4054_v51  ;;  %v5008_v52 = vsel %vm1076_vm13, %v1062_v49, %v4055_v50  ;;  %v1087_v48 = vsel %vm1075_vm15, %v4959_v53, %v4954_v9  ;;  %v1088_v49 = vsel %vm1076_vm13, %v4963_v34, %v4957_v57 }
 0xe71   :  { %v1089_v54 = vpack.c.bf16 %v5008_v52, %v5004_v25  ;;  %v4061_v42 = vpack.i.bf16 %v5008_v52, %v5004_v25  ;;  %v1162_v50 = vrot.slane %v1087_v48, 4  ;;  %v1163_v51 = vrot.slane %v1088_v49, 4 }
 0xe73   :  { %1091 = vrot.lane.b32.xlu0 %v1089_v54, %s4325_s23  ;;  %v1202_v54 = vsel %vm4928_vm3, 1, %v4320_v3  ;;  %v1164_v9 = vsel %vm537_vm14, %v1162_v50, %v1163_v51 }
 0xe74   :  { %v1204_v53 = vrot.slane %v1202_v54, 4 }
 0xe7c   :  { %v112_v43 = vpop.permute.xlu0 %111 }
 0xe7d   :  { %vm130_vm5 = vcmp.eq.s32.totalorder %v112_v43, %v4550_v31 }
 0xe7e   :  { %v115_v18 = vpop.permute.xlu1 %114  ;;  %v142_v55 = vsel %vm130_vm5, 1.0, %v4321_v23  ;;  %vm367_vm5 = vcmp.eq.s32.totalorder %v4975_v36, 0 }
 0xe7f   :  { %vm131_vm12 = vcmp.eq.s32.totalorder %v115_v18, %v4550_v31 }
 0xe80   :  { %v143_v56 = vsel %vm131_vm12, 1.0, %v4321_v23  ;;  %v118_v60 = vpop.permute.xlu0 %117  ;;  %vm1201_vm12 = vmxor %vm367_vm5, %vm4324_vm8 }
 0xe81   :  { %v246_v37 = vpack.c.bf16 %v143_v56, %v142_v55  ;;  %vm132_vm11 = vcmp.eq.s32.totalorder %v118_v60, %v4550_v31  ;;  %v1203_v36 = vsel %vm1201_vm12, 1, %v4320_v3 }
 0xe82   :  { %v121_v63 = vpop.permute.xlu1 %120  ;;  %v144_v41 = vsel %vm132_vm11, 1.0, %v4321_v23  ;;  %v1205_v32 = vrot.slane %v1203_v36, 4  ;;  %vm368_vm11 = vcmp.eq.s32.totalorder %v4980_v38, 0 }
 0xe83   :  { %vm133_vm7 = vcmp.eq.s32.totalorder %v121_v63, %v4550_v31  ;;  %3737 = vmatprep.mubr.msk.bf16.mxu1 %vm259_vm4, %v246_v37  ;;  %vm5135_vm5 = vmxor %vm368_vm11, %vm4324_vm8  ;;  %v1543_v63 = vld [vmem:[%s5778_s28] sm:$0xff] }
 0xe84   :  { %v145_v1 = vsel %vm133_vm7, 1.0, %v4321_v23  ;;  %v1206_v60 = vsel %vm537_vm14, %v1204_v53, %v1205_v32  ;;  %vm5077_vm13 = vcmp.ne.s32.totalorder %v1205_v32, 0  ;;  %vm369_vm7 = vcmp.eq.s32.totalorder %v4987_v62, 0  ;;  %v1544_v32 = vld [vmem:[%s5778_s28 + $0x8] sm:$0xff] }
 0xe85   :  { %v247_v15 = vpack.c.bf16 %v145_v1, %v144_v41  ;;  %vm1207_vm3 = vcmp.ne.s32.totalorder %v1206_v60, 0  ;;  %vm1210_vm10 = vmand %vm4946_vm9, %vm5077_vm13 }
 0xe86   :  { %vm5073_vm15 = vmand %vm1065_vm2, %vm1207_vm3  ;;  %v1212_v0 = vsel %vm1210_vm10, 1, %v4320_v3 }
 0xe87   :  { %3738 = vmatmul.mubr.msk.bf16.gmra.mrb[16].mxu1 %vm259_vm4, %v247_v15  ;;  %v1211_v15 = vsel %vm5073_vm15, 1, %v4320_v3  ;;  %vm5140_vm12 = vmxor %vm369_vm7, %vm4324_vm8 }
 0xe88   :  { %3785 = vmatprep.mubr.msk.bf16.mxu1 %vm4322_vm1, %v4321_v23  ;;  %vm1366_vm3 = vmand %vm5073_vm15, %vm5135_vm5 }
 0xe89   :  { %v1368_v60 = vsel %vm1366_vm3, 1, %v4320_v3 }
 0xee5   :  { %v1092_v2 = vpop.permute.xlu0 %1091 }
 0xee6   :  { %3786 = vmatmul.mubr.msk.bf16.vlgmr.msra.gmra.mrb[20].mxu1 %vm164_vm0, %v1092_v2 }
 0xee7   :  { %3798 = vmatpush3.bf16.msra.mxu1 %v4527_v26  ;;  %3801 = vmatprep.mubr.msk.bf16.mxu1 %vm4322_vm1, %v4321_v23 }
 0xee8   :  { %3799 = vmatprep.subr.bf16.mxu1 %v4321_v23 }
 0xeeb   :  { %3800 = vmatpush3.bf16.msra.mxu1 %v4537_v29 }
 0xf5a   :  { %v5033_v31 = vpop.f32.mrb[16].mxu1 }
 0xf5b   :  { %v344_v58 = vpop.f32.mrb[17].mxu1 }
 0xf5c   :  { %v5035_v20 = vpop.f32.mrb[18].mxu1  ;;  %v345_v29 = vadd.f32 %v5043_v24, %v344_v58 }
 0xf5d   :  { %v5037_v4 = vpop.f32.mrb[19].mxu1 }
 0xfb9   :  { %v1130_v5 = vpop.f32.mrb[20].mxu1 }
 0xfba   :  { %v1139_v16 = vrot.slane %v1130_v5, 4  ;;  %v3787_v8 = vpop.f32.mrb[21].mxu1 }
 0xfbb   :  { %v1133_v6 = vpop.f32.mrb[22].mxu1 }
 0xfbc   :  { %v1144_v26 = vadd.f32 %v1139_v16, %v4907_v21  ;;  %v1140_v61 = vrot.slane %v1133_v6, 4  ;;  %v3788_v11 = vpop.f32.mrb[23].mxu1 }
 0xfbe   :  { %4191 = vtanh.f32 %v1144_v26  ;;  %v1141_v59 = vsel %vm537_vm14, %v1139_v16, %v1140_v61  ;;  %v3516_v21 = vmul.f32 -1.442695, %v1144_v26 }
 0xfbf   :  { %v1145_v39 = vadd.f32 %v1141_v59, %v345_v29 }
 0xfc1   :  { %4193 = vtanh.f32 %v1145_v39  ;;  %v3517_v44 = vmul.f32 -1.442695, %v1145_v39 }
 0xfc2   :  { %4195 = vpow2.f32 %v3516_v21 }
 0xfc3   :  { %4197 = vpow2.f32 %v3517_v44 }
 0xfc8   :  { %v4192_v19 = vpop.eup %4191 }
 0xfc9   :  { %1171 = vrot.lane.b32.xlu1 %v4192_v19, %s4323_s8 }
 0xfcb   :  { %v4194_v22 = vpop.eup %4193 }
 0xfcc   :  { %1173 = vrot.lane.b32.xlu0 %v4194_v22, %s4323_s8  ;;  %v4196_v30 = vpop.eup %4195 }
 0xfcd   :  { %v4198_v40 = vpop.eup %4197  ;;  %v1152_v27 = vadd.f32 1.0, %v4196_v30 }
 0xfce   :  { %v1153_v14 = vadd.f32 1.0, %v4198_v40  ;;  %v348_v40 = vadd.f32 %v5043_v24, %v5037_v4 }
 0xfcf   :  { %4199 = vrcp.f32 %v1152_v27 }
 0xfd0   :  { %4201 = vrcp.f32 %v1153_v14  ;;  %v5123_v14 = vadd.f32 %v5043_v24, %v5033_v31 }
 0xfd9   :  { %v4200_v33 = vpop.eup %4199 }
 0xfda   :  { %v4202_v17 = vpop.eup %4201  ;;  %v1167_v43 = vmul.f32 %v4200_v33, %v1162_v50 }
 0xfdb   :  { %v1168_v56 = vmul.f32 %v4202_v17, %v1164_v9 }
0x103b   :  { %v1172_v35 = vpop.permute.xlu1 %1171 }
0x103c   :  { %v1177_v13 = vmul.f32 %v4200_v33, %v1172_v35 }
0x103e   :  { %1181 = vrot.lane.b32.xlu1 %v1177_v13, %s4325_s23  ;;  %v1174_v46 = vpop.permute.xlu0 %1173 }
0x103f   :  { %v1178_v47 = vmul.f32 %v4202_v17, %v1174_v46 }
0x1041   :  { %1183 = vrot.lane.b32.xlu0 %v1178_v47, %s4325_s23 }
0x10b0   :  { %v1182_v18 = vpop.permute.xlu1 %1181 }
0x10b1   :  { %v1187_v55 = vadd.f32 %v1182_v18, %v1167_v43 }
0x10b3   :  { %4203 = vtanh.f32 %v1187_v55  ;;  %v1184_v57 = vpop.permute.xlu0 %1183  ;;  %v1244_v10 = vrot.slane %v1187_v55, 4 }
0x10b4   :  { %v1188_v34 = vadd.f32 %v1184_v57, %v1168_v56 }
0x10b6   :  { %4205 = vtanh.f32 %v1188_v34  ;;  %v1245_v37 = vrot.slane %v1188_v34, 4 }
0x10b8   :  { %v1246_v7 = vsel %vm537_vm14, %v1244_v10, %v1245_v37 }
0x10bd   :  { %v4204_v1 = vpop.eup %4203 }
0x10be   :  { %1193 = vrot.lane.b32.xlu1 %v4204_v1, %s4323_s8 }
0x10c0   :  { %v4206_v45 = vpop.eup %4205 }
0x10c1   :  { %1195 = vrot.lane.b32.xlu0 %v4206_v45, %s4323_s8 }
0x10c2   :  { %1214 = vperm.xlu1 %4025, %v1211_v15  }
0x10c5   :  { %1217 = vperm.xlu0 %4024, %v1212_v0  }
0x10c9   :  { %4062 = vrot.lane.b32.xlu0 %v4061_v42, %s4325_s23 }
0x10cd   :  { %1249 = vrot.lane.b32.xlu0 %v1245_v37, %s4326_s7 }
0x10d1   :  { %1255 = vrot.lane.b32.xlu0 %v1088_v49, %s4326_s7 }
0x1130   :  { %v1194_v2 = vpop.permute.xlu1 %1193 }
0x1131   :  { %v1199_v58 = vmul.f32 %v4200_v33, %v1194_v2 }
0x1133   :  { %v1196_v5 = vpop.permute.xlu0 %1195  ;;  %v1223_v8 = vrot.slane %v1199_v58, 4 }
0x1134   :  { %v1200_v16 = vmul.f32 %v4202_v17, %v1196_v5 }
0x1136   :  { %v1224_v6 = vrot.slane %v1200_v16, 4 }
0x1138   :  { %v1225_v26 = vsel %vm537_vm14, %v1223_v8, %v1224_v6 }
0x1139   :  { %v4056_v61 = vpack.i.bf16 %v1224_v6, %v1225_v26 }
0x113b   :  { %4057 = vrot.lane.b32.xlu1 %v4056_v61, %s4325_s23 }
0x113f   :  { %1247 = vrot.lane.b32.xlu1 %v1246_v7, %s4326_s7  ;;  %v1548_v7 = vpack.c.bf16 %v1544_v32, %v1543_v63 }
0x1141   :  { %v1215_v52 = vpop.permute.xlu1 %1214 }
0x1142   :  { %vm1219_vm6 = vcmp.eq.s32.totalorder %v1215_v52, 1 }
0x1143   :  { %1253 = vrot.lane.b32.xlu1 %v1087_v48, %s4326_s7 }
0x1144   :  { %v1218_v25 = vpop.permute.xlu0 %1217 }
0x1145   :  { %vm1220_vm2 = vcmp.eq.s32.totalorder %v1218_v25, 1 }
0x1148   :  { %v4063_v42 = vpop.permute.xlu0 %4062 }
0x1149   :  { %v4065_v29 = vunpack.i.h.bf16 %v4063_v42  ;;  %v4064_v59 = vunpack.i.l.bf16 %v4063_v42 }
0x114c   :  { %v1250_v48 = vpop.permute.xlu0 %1249 }
0x1150   :  { %v1256_v51 = vpop.permute.xlu0 %1255 }
0x1151   :  { %v1260_v54 = vsel %vm1220_vm2, %v1250_v48, %v1256_v51 }
0x11ad   :  { %v4058_v11 = vpop.permute.xlu1 %4057 }
0x11ae   :  { %v4060_v39 = vunpack.i.h.bf16 %v4058_v11  ;;  %v4059_v19 = vunpack.i.l.bf16 %v4058_v11 }
0x11b0   :  { %v5107_v22 = vsel %vm1219_vm6, %v4059_v19, %v4064_v59  ;;  %v5110_v21 = vsel %vm1220_vm2, %v4060_v39, %v4065_v29 }
0x11b1   :  { %v1261_v44 = vpack.c.bf16 %v5110_v21, %v5107_v22  ;;  %v4066_v30 = vpack.i.bf16 %v5110_v21, %v5107_v22  ;;  %v1248_v47 = vpop.permute.xlu1 %1247 }
0x11b3   :  { %3794 = vmatmul.mubr.msk.bf16.vlgmr.msra.gmra.mrb[20].mxu0 %vm164_vm0, %v1261_v44 }
0x11b4   :  { %3809 = vmatprep.mubr.msk.bf16.mxu0 %vm4322_vm1, %v4321_v23  ;;  %3806 = vmatpush3.bf16.msra.mxu0 %v1548_v7 }
0x11b5   :  { %v1254_v50 = vpop.permute.xlu1 %1253  ;;  %3807 = vmatprep.subr.bf16.mxu0 %v4321_v23 }
0x11b6   :  { %v1259_v31 = vsel %vm1219_vm6, %v1248_v47, %v1254_v50  ;;  %vm5162_vm6 = vmand %vm1210_vm10, %vm5140_vm12  ;;  %vm370_vm10 = vcmp.eq.s32.totalorder %v4992_v28, 0 }
0x11b7   :  { %v1369_v1 = vsel %vm5162_vm6, 1, %v4320_v3  ;;  %vm1502_vm2 = vmxor %vm370_vm10, %vm4324_vm8 }
0x1286   :  { %v1299_v27 = vpop.f32.mrb[20].mxu0 }
0x1287   :  { %v1306_v33 = vadd.f32 %v1299_v27, %v348_v40  ;;  %v3795_v35 = vpop.f32.mrb[21].mxu0 }
0x1288   :  { %v1302_v13 = vpop.f32.mrb[22].mxu0 }
0x1289   :  { %4207 = vtanh.f32 %v1306_v33  ;;  %v1307_v17 = vadd.f32 %v1302_v13, %v5123_v14  ;;  %v3796_v46 = vpop.f32.mrb[23].mxu0  ;;  %v3519_v36 = vmul.f32 -1.442695, %v1306_v33 }
0x128b   :  { %4209 = vtanh.f32 %v1307_v17  ;;  %v3520_v43 = vmul.f32 -1.442695, %v1307_v17 }
0x128c   :  { %4211 = vpow2.f32 %v3519_v36 }
0x128d   :  { %4213 = vpow2.f32 %v3520_v43 }
0x1293   :  { %v4208_v49 = vpop.eup %4207 }
0x1294   :  { %1334 = vrot.lane.b32.xlu1 %v4208_v49, %s4323_s8 }
0x1295   :  { %v4210_v4 = vpop.eup %4209 }
0x1296   :  { %1336 = vrot.lane.b32.xlu0 %v4210_v4, %s4323_s8  ;;  %v4212_v18 = vpop.eup %4211  ;;  %v356_v4 = vadd.f32 %v5043_v24, %v5035_v20 }
0x1297   :  { %v4214_v55 = vpop.eup %4213  ;;  %v1314_v9 = vadd.f32 1.0, %v4212_v18 }
0x1298   :  { %1324 = vrot.lane.b32.xlu1 %v1259_v31, %s4325_s23  ;;  %v1315_v53 = vadd.f32 1.0, %v4214_v55 }
0x1299   :  { %4215 = vrcp.f32 %v1314_v9 }
0x129a   :  { %1326 = vrot.lane.b32.xlu0 %v1260_v54, %s4325_s23  ;;  %4217 = vrcp.f32 %v1315_v53 }
0x12a3   :  { %v4216_v56 = vpop.eup %4215 }
0x12a4   :  { %v4218_v38 = vpop.eup %4217 }
0x1306   :  { %v1335_v34 = vpop.permute.xlu1 %1334 }
0x1307   :  { %v1340_v10 = vmul.f32 %v4216_v56, %v1335_v34 }
0x1308   :  { %v1337_v62 = vpop.permute.xlu0 %1336 }
0x1309   :  { %1344 = vrot.lane.b32.xlu1 %v1340_v10, %s4325_s23  ;;  %v1341_v37 = vmul.f32 %v4218_v38, %v1337_v62  ;;  %v1503_v62 = vsel %vm5140_vm12, 1, %v4320_v3 }
0x130a   :  { %v1325_v15 = vpop.permute.xlu1 %1324 }
0x130b   :  { %1346 = vrot.lane.b32.xlu0 %v1341_v37, %s4325_s23  ;;  %v1330_v45 = vmul.f32 %v4216_v56, %v1325_v15  ;;  %v1504_v37 = vsel %vm1502_vm2, 1, %v4320_v3 }
0x130c   :  { %v1327_v0 = vpop.permute.xlu0 %1326 }
0x130d   :  { %1371 = vperm.xlu1 %4025, %v1368_v60   ;;  %v1331_v58 = vmul.f32 %v4218_v38, %v1327_v0 }
0x130f   :  { %1374 = vperm.xlu0 %4024, %v1369_v1  }
0x137b   :  { %v1345_v2 = vpop.permute.xlu1 %1344 }
0x137c   :  { %v1350_v12 = vadd.f32 %v1345_v2, %v1330_v45  ;;  %v1505_v45 = vrot.slane %v1503_v62, 4 }
0x137d   :  { %v1347_v41 = vpop.permute.xlu0 %1346 }
0x137e   :  { %4219 = vtanh.f32 %v1350_v12  ;;  %v1351_v5 = vadd.f32 %v1347_v41, %v1331_v58 }
0x1380   :  { %4221 = vtanh.f32 %v1351_v5 }
0x1388   :  { %v4220_v16 = vpop.eup %4219 }
0x1389   :  { %1356 = vrot.lane.b32.xlu1 %v4220_v16, %s4323_s8 }
0x138a   :  { %v4222_v8 = vpop.eup %4221 }
0x138b   :  { %1358 = vrot.lane.b32.xlu0 %v4222_v8, %s4323_s8  ;;  %v1546_v8 = vld [vmem:[%s5778_s28 + $0x18] sm:$0xff] }
0x138c   :  { %v1372_v6 = vpop.permute.xlu1 %1371 }
0x138d   :  { %vm1376_vm9 = vcmp.eq.s32.totalorder %v1372_v6, 1  ;;  %4067 = vrot.lane.b32.xlu1 %v4066_v30, %s4326_s7 }
0x138e   :  { %v1388_v26 = vsel %vm1376_vm9, %v1350_v12, %v1325_v15  ;;  %v1375_v61 = vpop.permute.xlu0 %1374 }
0x138f   :  { %vm1377_vm13 = vcmp.eq.s32.totalorder %v1375_v61, 1  ;;  %v1463_v52 = vrot.slane %v1388_v26, 4 }
0x1390   :  { %v1389_v25 = vsel %vm1377_vm13, %v1351_v5, %v1327_v0  ;;  %v1506_v0 = vrot.slane %v1504_v37, 4 }
0x1391   :  { %v1464_v42 = vrot.slane %v1389_v25, 4 }
0x1392   :  { %v1507_v41 = vsel %vm537_vm14, %v1505_v45, %v1506_v0  ;;  %vm1509_vm12 = vcmp.ne.s32.totalorder %v1506_v0, 0 }
0x1393   :  { %v1465_v11 = vsel %vm537_vm14, %v1463_v52, %v1464_v42  ;;  %vm1508_vm11 = vcmp.ne.s32.totalorder %v1507_v41, 0 }
0x1394   :  { %vm1510_vm7 = vmand %vm1366_vm3, %vm1508_vm11  ;;  %vm1597_vm3 = vcmask 97280  }
0x1395   :  { %v1512_v57 = vsel %vm1510_vm7, 1, %v4320_v3 }
0x13fb   :  { %v1357_v29 = vpop.permute.xlu1 %1356 }
0x13fc   :  { %v1362_v19 = vmul.f32 %v4216_v56, %v1357_v29 }
0x13fd   :  { %v1359_v59 = vpop.permute.xlu0 %1358 }
0x13fe   :  { %v1363_v44 = vmul.f32 %v4218_v38, %v1359_v59 }
0x13ff   :  { %v4068_v39 = vpop.permute.xlu1 %4067 }
0x1400   :  { %v4070_v40 = vunpack.i.h.bf16 %v4068_v39  ;;  %v4069_v27 = vunpack.i.l.bf16 %v4068_v39 }
0x1402   :  { %v5179_v33 = vsel %vm1376_vm9, %v1362_v19, %v4069_v27  ;;  %v5181_v22 = vsel %vm1377_vm13, %v1363_v44, %v4070_v40  ;;  %vm1511_vm9 = vmand %vm5162_vm6, %vm1509_vm12  ;;  %vm2260_vm13 = vcmask 195584  }
0x1403   :  { %v4076_v21 = vpack.i.bf16 %v5181_v22, %v5179_v33  ;;  %v1390_v30 = vpack.c.bf16 %v5181_v22, %v5179_v33  ;;  %v1513_v16 = vsel %vm1511_vm9, 1, %v4320_v3  ;;  %v1545_v3 = vld [vmem:[%s5778_s28 + $0x10] sm:$0xff]  ;;  %vm3996_vm6 = vmpackc.low %vm537_vm14, %vm4324_vm8  ;;  %s4330_s28 = smov 72   ;;  %vm1749_vm8 = vcmask 64512  }
0x1404   :  { %v1549_v6 = vpack.c.bf16 %v1546_v8, %v1545_v3  ;;  %v5316_v3 = vld [vmem:[%s5707_s2] sm:$0xff] }
0x1405   :  { %1392 = vrot.lane.b32.xlu0 %v1390_v30, %s4325_s23 }
0x1406   :  { %3808 = vmatpush3.bf16.msra.mxu0 %v1549_v6  ;;  %v5321_v6 = vld [vmem:[%s5707_s2 + $0x8] sm:$0xff]  ;;  %s5729_s2 = smov 48  }
0x1407   :  { %3820 = vmatprep.subr.bf16.mxu0 %v4321_v23 }
0x1477   :  { %v1393_v35 = vpop.permute.xlu0 %1392 }
0x1478   :  { %3802 = vmatmul.mubr.msk.bf16.vlgmr.msra.gmra.mrb[24].mxu1 %vm164_vm0, %v1393_v35 }
0x154b   :  { %v1431_v13 = vpop.f32.mrb[24].mxu1 }
0x154c   :  { %v1440_v17 = vrot.slane %v1431_v13, 4  ;;  %v3803_v46 = vpop.f32.mrb[25].mxu1 }
0x154d   :  { %v1434_v47 = vpop.f32.mrb[26].mxu1  ;;  %v1684_v46 = vld [vmem:[%s5704_s10] sm:$0xff] }
0x154e   :  { %v1445_v48 = vadd.f32 %v1440_v17, %v5123_v14  ;;  %v1441_v49 = vrot.slane %v1434_v47, 4  ;;  %v3804_v50 = vpop.f32.mrb[27].mxu1  ;;  %v1685_v47 = vld [vmem:[%s5704_s10 + $0x8] sm:$0xff] }
0x1550   :  { %4223 = vtanh.f32 %v1445_v48  ;;  %v1442_v51 = vsel %vm537_vm14, %v1440_v17, %v1441_v49  ;;  %v3522_v43 = vmul.f32 -1.442695, %v1445_v48  ;;  %v1595_v17 = vld [vmem:[%s5779_s6] sm:$0xff]  ;;  %v1689_v48 = vpack.c.bf16 %v1685_v47, %v1684_v46 }
0x1551   :  { %v1446_v31 = vadd.f32 %v1442_v51, %v356_v4  ;;  %3817 = vmatprep.mubr.msk.f32.mxu1 %vm1597_vm3, %v1595_v17 }
0x1553   :  { %4225 = vtanh.f32 %v1446_v31  ;;  %v3523_v18 = vmul.f32 -1.442695, %v1446_v31 }
0x1554   :  { %4227 = vpow2.f32 %v3522_v43  ;;  %v1687_v43 = vld [vmem:[%s5704_s10 + $0x18] sm:$0xff] }
0x1555   :  { %4229 = vpow2.f32 %v3523_v18 }
0x155a   :  { %v4224_v54 = vpop.eup %4223 }
0x155b   :  { %1472 = vrot.lane.b32.xlu1 %v4224_v54, %s4323_s8  ;;  %v1596_v54 = vld [vmem:[%s5779_s6 + $0x8] sm:$0xff]  ;;  %s5731_s6 = smov 16  }
0x155d   :  { %v4226_v36 = vpop.eup %4225 }
0x155e   :  { %1474 = vrot.lane.b32.xlu0 %v4226_v36, %s4323_s8  ;;  %v4228_v14 = vpop.eup %4227  ;;  %v1686_v36 = vld [vmem:[%s5704_s10 + $0x10] sm:$0xff] }
0x155f   :  { %v4230_v55 = vpop.eup %4229  ;;  %v1453_v9 = vadd.f32 1.0, %v4228_v14  ;;  %v1690_v18 = vpack.c.bf16 %v1687_v43, %v1686_v36  ;;  %v1594_v14 = vld [vmem:[%s5705_s4] sm:$0xff]  ;;  %s4327_s4 = smov 88  }
0x1560   :  { %v1454_v53 = vadd.f32 1.0, %v4230_v55 }
0x1561   :  { %4231 = vrcp.f32 %v1453_v9 }
0x1562   :  { %4233 = vrcp.f32 %v1454_v53 }
0x156b   :  { %v4232_v20 = vpop.eup %4231 }
0x156c   :  { %v4234_v34 = vpop.eup %4233  ;;  %v1468_v60 = vmul.f32 %v4232_v20, %v1463_v52 }
0x156d   :  { %v1469_v2 = vmul.f32 %v4234_v34, %v1465_v11 }
0x15cd   :  { %v1473_v24 = vpop.permute.xlu1 %1472 }
0x15ce   :  { %v1478_v56 = vmul.f32 %v4232_v20, %v1473_v24 }
0x15d0   :  { %1482 = vrot.lane.b32.xlu1 %v1478_v56, %s4325_s23  ;;  %v1475_v10 = vpop.permute.xlu0 %1474  ;;  %v3528_v56 = vld [vmem:[%s5706_s11] ss:$0 sm:$0xff] }
0x15d1   :  { %v1479_v38 = vmul.f32 %v4234_v34, %v1475_v10 }
0x15d3   :  { %1484 = vrot.lane.b32.xlu0 %v1479_v38, %s4325_s23 }
0x1642   :  { %v1483_v1 = vpop.permute.xlu1 %1482 }
0x1643   :  { %v1488_v15 = vadd.f32 %v1483_v1, %v1468_v60 }
0x1645   :  { %4235 = vtanh.f32 %v1488_v15  ;;  %v1485_v12 = vpop.permute.xlu0 %1484 }
0x1646   :  { %v1489_v58 = vadd.f32 %v1485_v12, %v1469_v2 }
0x1648   :  { %4237 = vtanh.f32 %v1489_v58 }
0x164f   :  { %v4236_v28 = vpop.eup %4235 }
0x1650   :  { %1494 = vrot.lane.b32.xlu1 %v4236_v28, %s4323_s8 }
0x1652   :  { %v4238_v5 = vpop.eup %4237 }
0x1653   :  { %1496 = vrot.lane.b32.xlu0 %v4238_v5, %s4323_s8 }
0x1654   :  { %1515 = vperm.xlu1 %4025, %v1512_v57  }
0x1657   :  { %1518 = vperm.xlu0 %4024, %v1513_v16  }
0x165b   :  { %4077 = vrot.lane.b32.xlu0 %v4076_v21, %s4325_s23 }
0x16c2   :  { %v1495_v26 = vpop.permute.xlu1 %1494 }
0x16c3   :  { %v1500_v61 = vmul.f32 %v4232_v20, %v1495_v26 }
0x16c5   :  { %v1497_v25 = vpop.permute.xlu0 %1496  ;;  %v1524_v42 = vrot.slane %v1500_v61, 4 }
0x16c6   :  { %v1501_v52 = vmul.f32 %v4234_v34, %v1497_v25 }
0x16c8   :  { %v1525_v11 = vrot.slane %v1501_v52, 4 }
0x16ca   :  { %v1526_v29 = vsel %vm537_vm14, %v1524_v42, %v1525_v11  ;;  %vm1797_vm14 = vcmask 130048  }
0x16cb   :  { %v4071_v59 = vpack.i.bf16 %v1525_v11, %v1526_v29 }
0x16cd   :  { %4072 = vrot.lane.b32.xlu1 %v4071_v59, %s4325_s23  ;;  %s5728_s23 = smov 40  }
0x16d3   :  { %v1516_v19 = vpop.permute.xlu1 %1515 }
0x16d4   :  { %vm1520_vm15 = vcmp.eq.s32.totalorder %v1516_v19, 1 }
0x16d6   :  { %v1519_v39 = vpop.permute.xlu0 %1518 }
0x16d7   :  { %vm1521_vm5 = vcmp.eq.s32.totalorder %v1519_v39, 1 }
0x16da   :  { %v4078_v44 = vpop.permute.xlu0 %4077 }
0x16db   :  { %v4080_v27 = vunpack.i.h.bf16 %v4078_v44  ;;  %v4079_v33 = vunpack.i.l.bf16 %v4078_v44 }
0x173f   :  { %v4073_v40 = vpop.permute.xlu1 %4072 }
0x1740   :  { %v4075_v22 = vunpack.i.h.bf16 %v4073_v40  ;;  %v4074_v21 = vunpack.i.l.bf16 %v4073_v40 }
0x1742   :  { %v1541_v30 = vsel %vm1520_vm15, %v4074_v21, %v4079_v33  ;;  %v1542_v35 = vsel %vm1521_vm5, %v4075_v22, %v4080_v27 }
0x1743   :  { %v1547_v13 = vpack.c.bf16 %v1542_v35, %v1541_v30 }
0x1745   :  { %3810 = vmatmul.mubr.msk.bf16.vlgmr.msra.gmra.mrb[24].mxu0 %vm164_vm0, %v1547_v13 }
0x1746   :  { %3824 = vmatprep.mubr.msk.bf16.mxu0 %vm4322_vm1, %v4321_v23  ;;  %3821 = vmatpush3.bf16.msra.mxu0 %v1689_v48 }
0x1747   :  { %3822 = vmatprep.subr.bf16.mxu0 %v4321_v23 }
0x174a   :  { %3823 = vmatpush3.bf16.msra.mxu0 %v1690_v18 }
0x174b   :  { %3834 = vmatprep.subr.bf16.mxu0 %v4321_v23 }
0x1818   :  { %v1587_v49 = vpop.f32.mrb[24].mxu0 }
0x1819   :  { %v3811_v50 = vpop.f32.mrb[25].mxu0 }
0x181a   :  { %v1590_v4 = vpop.f32.mrb[26].mxu0 }
0x181b   :  { %v3995_v51 = vpack.c.bf16 %v1590_v4, %v1587_v49  ;;  %v3812_v31 = vpop.f32.mrb[27].mxu0 }
0x181d   :  { %3997 = vmatprep.subr.msk.bf16.mxu1 %vm3996_vm6, %v3995_v51 }
0x181e   :  { %4000 = vmatpush3.bf16.msk.msra.mxu1 %vm3996_vm6, %v3995_v51 }
0x181f   :  { %3828 = vmatprep.subr.bf16.mxu1 %v4321_v23 }
0x1821   :  { %3818 = vmatmul.mubr.msk.f32.vlgmr.msra.gmra.mrb[28].mxu1 %vm1597_vm3, %v1596_v54 }
0x1822   :  { %3830 = vmatprep.mubr.msk.bf16.mxu1 %vm4322_vm1, %v4321_v23 }
0x18f4   :  { %v3819_v55 = vpop.f32.mrb[28].mxu1 }
0x18f5   :  { %v5268_v9 = vadd.f32 %v3819_v55, %v1594_v14  ;;  %v1673_v53 = vpop.f32.mrb[29].mxu1 }
0x18f6   :  { %v5270_v20 = vadd.f32 %v1673_v53, %v1594_v14 }
0x18f8   :  { %v1688_v24 = vpack.c.bf16 %v5268_v9, %v5270_v20 }
0x18fa   :  { %3825 = vmatmul.mubr.msk.bf16.vlgmr.msra.gmra.mrb[28].mxu0 %vm164_vm0, %v1688_v24 }
0x18fb   :  { %3836 = vmatprep.mubr.msk.bf16.mxu0 %vm4322_vm1, %v4321_v23 }
0x19cd   :  { %v1735_v34 = vpop.f32.mrb[28].mxu0 }
0x19ce   :  { %v1736_v10 = vadd.f32 %v3528_v56, %v1735_v34  ;;  %v3826_v38 = vpop.f32.mrb[29].mxu0 }
0x19cf   :  { %v1738_v62 = vpop.f32.mrb[30].mxu0 }
0x19d0   :  { %v1739_v37 = vadd.f32 %v3528_v56, %v1738_v62  ;;  %v3827_v60 = vpop.f32.mrb[31].mxu0  ;;  %v1742_v1 = vmul.f32 0.35355338, %v1736_v10 }
0x19d2   :  { %v1743_v15 = vmul.f32 0.35355338, %v1739_v37  ;;  %v5280_v45 = vpack.c.bf16 %v1739_v37, %v1736_v10 }
0x19d4   :  { %v1744_v0 = vpack.c.bf16 %v1743_v15, %v1742_v1  ;;  %1871 = vrot.lane.b32.xlu0 %v5280_v45, %s4327_s4  ;;  %1747 = vrot.lane.b32.xlu1 %v5280_v45, %s4326_s7 }
0x19d8   :  { %1992 = vrot.lane.b32.xlu0 %v5280_v45, %s4328_s30  ;;  %1869 = vrot.lane.b32.xlu1 %v1744_v0, %s4329_s27 }
0x19dc   :  { %2113 = vrot.lane.b32.xlu0 %v5280_v45, %s4330_s28  ;;  %1990 = vrot.lane.b32.xlu1 %v1744_v0, %s4331_s29 }
0x19e0   :  { %2111 = vrot.lane.b32.xlu1 %v1744_v0, %s4332_s5 }
0x1a46   :  { %v1748_v2 = vpop.permute.xlu1 %1747  ;;  %v1872_v58 = vpop.permute.xlu0 %1871 }
0x1a47   :  { %v1754_v12 = vsel %vm1749_vm8, %v1748_v2, 0  ;;  %v1877_v41 = vsel %vm1749_vm8, %v1872_v58, 0 }
0x1a48   :  { %3829 = vmatpush3.bf16.xpose.msra.mxu1 %v1754_v12 }
0x1a49   :  { %3840 = vmatprep.subr.bf16.mxu1 %v4321_v23 }
0x1a4a   :  { %v1993_v28 = vpop.permute.xlu0 %1992  ;;  %v1870_v57 = vpop.permute.xlu1 %1869 }
0x1a4b   :  { %v1998_v5 = vsel %vm1749_vm8, %v1993_v28, 0 }
0x1a4e   :  { %v2114_v16 = vpop.permute.xlu0 %2113  ;;  %v1991_v63 = vpop.permute.xlu1 %1990 }
0x1a4f   :  { %3831 = vmatmul.mubr.msk.bf16.vlgmr.msra.gmra.mrb[32].mxu1 %vm1749_vm8, %v1744_v0  ;;  %v2119_v32 = vsel %vm1749_vm8, %v2114_v16, 0 }
0x1a50   :  { %3841 = vmatpush3.bf16.xpose.msra.mxu1 %v1877_v41  ;;  %3842 = vmatprep.mubr.msk.bf16.mxu1 %vm4322_vm1, %v4321_v23 }
0x1a51   :  { %3852 = vmatprep.subr.bf16.mxu1 %v4321_v23 }
0x1a52   :  { %v2112_v7 = vpop.permute.xlu1 %2111 }
0x1a57   :  { %3843 = vmatmul.mubr.msk.bf16.vlgmr.msra.gmra.mrb[36].mxu1 %vm1749_vm8, %v1870_v57 }
0x1a58   :  { %3853 = vmatpush3.bf16.xpose.msra.mxu1 %v1998_v5  ;;  %3854 = vmatprep.mubr.msk.bf16.mxu1 %vm4322_vm1, %v4321_v23 }
0x1a59   :  { %3864 = vmatprep.subr.bf16.mxu1 %v4321_v23 }
0x1a5f   :  { %3855 = vmatmul.mubr.msk.bf16.vlgmr.msra.gmra.mrb[40].mxu1 %vm1749_vm8, %v1991_v63 }
0x1a60   :  { %3865 = vmatpush3.bf16.xpose.msra.mxu1 %v2119_v32  ;;  %3866 = vmatprep.mubr.msk.bf16.mxu1 %vm4322_vm1, %v4321_v23 }
0x1a61   :  { %3876 = vmatprep.subr.bf16.mxu1 %v4321_v23 }
0x1a67   :  { %3867 = vmatmul.mubr.msk.bf16.vlgmr.msra.gmra.mrb[44].mxu1 %vm1749_vm8, %v2112_v7 }
0x1a68   :  { %3880 = vmatprep.mubr.msk.bf16.mxu1 %vm4322_vm1, %v4321_v23 }
0x1b22   :  { %v1790_v8 = vpop.f32.mrb[32].mxu1 }
0x1b23   :  { %v1791_v26 = vadd.f32 %v1790_v8, %v5316_v3  ;;  %v3832_v61 = vpop.f32.mrb[33].mxu1 }
0x1b24   :  { %v1793_v25 = vpop.f32.mrb[34].mxu1 }
0x1b25   :  { %v1794_v52 = vadd.f32 %v1793_v25, %v5321_v6  ;;  %v3833_v42 = vpop.f32.mrb[35].mxu1  ;;  %v1798_v11 = vsel %vm1797_vm14, %v1791_v26, -inf }
0x1b26   :  { %1799 = vmax.xlane.f32.xlu0 %v1798_v11 }
0x1b27   :  { %v1801_v29 = vsel %vm1797_vm14, %v1794_v52, -inf }
0x1b28   :  { %1802 = vmax.xlane.f32.xlu1 %v1801_v29 }
0x1b2a   :  { %v1913_v59 = vpop.f32.mrb[36].mxu1 }
0x1b2b   :  { %v1914_v39 = vadd.f32 %v1913_v59, %v5316_v3  ;;  %v3844_v19 = vpop.f32.mrb[37].mxu1 }
0x1b2c   :  { %v1916_v44 = vpop.f32.mrb[38].mxu1 }
0x1b2d   :  { %v1917_v40 = vadd.f32 %v1916_v44, %v5321_v6  ;;  %v3845_v27 = vpop.f32.mrb[39].mxu1  ;;  %v1920_v33 = vsel %vm1797_vm14, %v1914_v39, -inf }
0x1b2e   :  { %1921 = vmax.xlane.f32.xlu0 %v1920_v33 }
0x1b2f   :  { %v1923_v22 = vsel %vm1797_vm14, %v1917_v40, -inf }
0x1b32   :  { %1924 = vmax.xlane.f32.xlu0 %v1923_v22  ;;  %v2034_v21 = vpop.f32.mrb[40].mxu1 }
0x1b33   :  { %v2035_v30 = vadd.f32 %v2034_v21, %v5316_v3  ;;  %v3856_v35 = vpop.f32.mrb[41].mxu1 }
0x1b34   :  { %v2037_v13 = vpop.f32.mrb[42].mxu1 }
0x1b35   :  { %v2038_v17 = vadd.f32 %v2037_v13, %v5321_v6  ;;  %v3857_v46 = vpop.f32.mrb[43].mxu1  ;;  %v2041_v47 = vsel %vm1797_vm14, %v2035_v30, -inf }
0x1b36   :  { %2042 = vmax.xlane.f32.xlu1 %v2041_v47 }
0x1b37   :  { %v2044_v48 = vsel %vm1797_vm14, %v2038_v17, -inf }
0x1b38   :  { %2045 = vmax.xlane.f32.xlu0 %v2044_v48 }
0x1b3a   :  { %v2155_v49 = vpop.f32.mrb[44].mxu1 }
0x1b3b   :  { %v2156_v50 = vadd.f32 %v2155_v49, %v5316_v3  ;;  %v3868_v4 = vpop.f32.mrb[45].mxu1 }
0x1b3c   :  { %v2158_v51 = vpop.f32.mrb[46].mxu1 }
0x1b3d   :  { %v2159_v31 = vadd.f32 %v2158_v51, %v5321_v6  ;;  %v3869_v54 = vpop.f32.mrb[47].mxu1  ;;  %v2162_v36 = vsel %vm1797_vm14, %v2156_v50, -inf }
0x1b3e   :  { %2163 = vmax.xlane.f32.xlu1 %v2162_v36 }
0x1b3f   :  { %v2165_v43 = vsel %vm1797_vm14, %v2159_v31, -inf }
0x1b40   :  { %2166 = vmax.xlane.f32.xlu0 %v2165_v43 }
0x1b4f   :  { %1821 = vrot.lane.b32.xlu1 %v5280_v45, %s4323_s8 }
0x1bb3   :  { %v1800_v18 = vpop.xlane.xlu0 %1799 }
0x1bb4   :  { %v1804_v14 = vsub.f32 %v1791_v26, %v1800_v18 }
0x1bb5   :  { %v1803_v55 = vpop.xlane.xlu1 %1802 }
0x1bb6   :  { %v1806_v53 = vmul.f32 1.442695, %v1804_v14  ;;  %v1805_v24 = vsub.f32 %v1794_v52, %v1803_v55 }
0x1bb8   :  { %4239 = vpow2.f32 %v1806_v53  ;;  %v1808_v56 = vmul.f32 1.442695, %v1805_v24 }
0x1bba   :  { %4241 = vpow2.f32 %v1808_v56 }
0x1bbb   :  { %v1922_v34 = vpop.xlane.xlu0 %1921 }
0x1bbc   :  { %v1926_v10 = vsub.f32 %v1914_v39, %v1922_v34 }
0x1bbe   :  { %v1928_v38 = vmul.f32 1.442695, %v1926_v10 }
0x1bbf   :  { %v1925_v62 = vpop.xlane.xlu0 %1924 }
0x1bc0   :  { %4243 = vpow2.f32 %v1928_v38  ;;  %v1927_v37 = vsub.f32 %v1917_v40, %v1925_v62 }
0x1bc2   :  { %v4240_v60 = vpop.eup %4239  ;;  %v1930_v1 = vmul.f32 1.442695, %v1927_v37 }
0x1bc3   :  { %v2043_v15 = vpop.xlane.xlu1 %2042  ;;  %v1810_v0 = vsel %vm1797_vm14, %v4240_v60, 0.0 }
0x1bc4   :  { %v4242_v2 = vpop.eup %4241  ;;  %4245 = vpow2.f32 %v1930_v1  ;;  %v2047_v12 = vsub.f32 %v2035_v30, %v2043_v15  ;;  %1811 = vadd.xlane.f32.xlu1 %v1810_v0 }
0x1bc5   :  { %v2046_v58 = vpop.xlane.xlu0 %2045  ;;  %v1813_v41 = vsel %vm1797_vm14, %v4242_v2, 0.0 }
0x1bc6   :  { %v2049_v28 = vmul.f32 1.442695, %v2047_v12  ;;  %v2048_v57 = vsub.f32 %v2038_v17, %v2046_v58  ;;  %1814 = vadd.xlane.f32.xlu0 %v1813_v41 }
0x1bc8   :  { %4247 = vpow2.f32 %v2049_v28  ;;  %v2051_v5 = vmul.f32 1.442695, %v2048_v57 }
0x1bca   :  { %v4244_v16 = vpop.eup %4243  ;;  %4249 = vpow2.f32 %v2051_v5 }
0x1bcb   :  { %v2164_v63 = vpop.xlane.xlu1 %2163  ;;  %v1932_v32 = vsel %vm1797_vm14, %v4244_v16, 0.0 }
0x1bcc   :  { %v2168_v7 = vsub.f32 %v2156_v50, %v2164_v63  ;;  %1933 = vadd.xlane.f32.xlu1 %v1932_v32  ;;  %v2264_v63 = vld [vmem:[%s5708_s12 + $0x8] sm:$0xff] }
0x1bcd   :  { %v2167_v8 = vpop.xlane.xlu0 %2166 }
0x1bce   :  { %v4246_v26 = vpop.eup %4245  ;;  %v2170_v61 = vmul.f32 1.442695, %v2168_v7  ;;  %v2169_v25 = vsub.f32 %v2159_v31, %v2167_v8  ;;  %v2265_v8 = vld [vmem:[%s5708_s12 + $0x10] sm:$0xff] }
0x1bcf   :  { %v1822_v52 = vpop.permute.xlu1 %1821  ;;  %v1935_v42 = vsel %vm1797_vm14, %v4246_v26, 0.0 }
0x1bd0   :  { %4251 = vpow2.f32 %v2170_v61  ;;  %v2172_v11 = vmul.f32 1.442695, %v2169_v25  ;;  %3835 = vmatpush3.bf16.msra.mxu0 %v1822_v52  ;;  %1936 = vadd.xlane.f32.xlu0 %v1935_v42 }
0x1bd1   :  { %3846 = vmatprep.subr.bf16.mxu0 %v4321_v23 }
0x1bd2   :  { %v4248_v29 = vpop.eup %4247  ;;  %4253 = vpow2.f32 %v2172_v11 }
0x1bd3   :  { %v2053_v59 = vsel %vm1797_vm14, %v4248_v29, 0.0 }
0x1bd4   :  { %v4250_v39 = vpop.eup %4249  ;;  %2054 = vadd.xlane.f32.xlu1 %v2053_v59 }
0x1bd5   :  { %v2056_v19 = vsel %vm1797_vm14, %v4250_v39, 0.0 }
0x1bd6   :  { %2057 = vadd.xlane.f32.xlu0 %v2056_v19 }
0x1bda   :  { %v4252_v44 = vpop.eup %4251 }
0x1bdb   :  { %v2174_v40 = vsel %vm1797_vm14, %v4252_v44, 0.0 }
0x1bdc   :  { %v4254_v27 = vpop.eup %4253  ;;  %2175 = vadd.xlane.f32.xlu1 %v2174_v40 }
0x1bdd   :  { %v2177_v33 = vsel %vm1797_vm14, %v4254_v27, 0.0 }
0x1bde   :  { %2178 = vadd.xlane.f32.xlu0 %v2177_v33 }
0x1bed   :  { %2064 = vrot.lane.b32.xlu1 %v5280_v45, %s5729_s2 }
0x1bf1   :  { %2185 = vrot.lane.b32.xlu1 %v5280_v45, %s5728_s23 }
0x1bf4   :  { %1943 = vrot.lane.b32.xlu0 %v5280_v45, %s5727_s25  ;;  %s5730_s25 = smov 24  }
0x1c51   :  { %v1812_v22 = vpop.xlane.xlu1 %1811 }
0x1c52   :  { %4255 = vrcp.f32 %v1812_v22 }
0x1c53   :  { %v1815_v21 = vpop.xlane.xlu0 %1814 }
0x1c54   :  { %4257 = vrcp.f32 %v1815_v21 }
0x1c59   :  { %v1934_v47 = vpop.xlane.xlu1 %1933 }
0x1c5c   :  { %v4256_v30 = vpop.eup %4255 }
0x1c5d   :  { %v1937_v35 = vpop.xlane.xlu0 %1936  ;;  %v1818_v17 = vmul.f32 %v4256_v30, %v4240_v60 }
0x1c5e   :  { %v4258_v13 = vpop.eup %4257  ;;  %4259 = vrcp.f32 %v1937_v35 }
0x1c5f   :  { %v1819_v46 = vmul.f32 %v4258_v13, %v4242_v2  ;;  %4261 = vrcp.f32 %v1934_v47 }
0x1c61   :  { %v1820_v48 = vpack.c.bf16 %v1819_v46, %v1818_v17  ;;  %v2055_v45 = vpop.xlane.xlu1 %2054 }
0x1c63   :  { %3837 = vmatmul.mubr.msk.bf16.vlgmr.msra.gmra.mrb[32].mxu0 %vm1797_vm14, %v1820_v48  ;;  %v2058_v49 = vpop.xlane.xlu0 %2057 }
0x1c64   :  { %3848 = vmatprep.mubr.msk.bf16.mxu0 %vm4322_vm1, %v4321_v23  ;;  %4263 = vrcp.f32 %v2058_v49 }
0x1c65   :  { %4265 = vrcp.f32 %v2055_v45 }
0x1c68   :  { %v4260_v50 = vpop.eup %4259 }
0x1c69   :  { %v4262_v51 = vpop.eup %4261  ;;  %v1941_v31 = vmul.f32 %v4260_v50, %v4246_v26  ;;  %v2176_v54 = vpop.xlane.xlu1 %2175  ;;  %v2266_v26 = vld [vmem:[%s5708_s12 + $0x18] sm:$0xff] }
0x1c6a   :  { %v1940_v36 = vmul.f32 %v4262_v51, %v4244_v16  ;;  %v2263_v16 = vld [vmem:[%s5708_s12] sm:$0xff]  ;;  %v2269_v25 = vpack.c.bf16 %v2266_v26, %v2265_v8 }
0x1c6b   :  { %v2179_v4 = vpop.xlane.xlu0 %2178  ;;  %v2268_v32 = vpack.c.bf16 %v2264_v63, %v2263_v16  ;;  %v3538_v51 = vld [vmem:[%s5709_s13] ss:$0 sm:$0xff]  ;;  %v2430_v16 = vld [vmem:[%s5711_s18 + $0x10] sm:$0xff] }
0x1c6c   :  { %4267 = vrcp.f32 %v2179_v4  ;;  %v1942_v18 = vpack.c.bf16 %v1941_v31, %v1940_v36 }
0x1c6d   :  { %4269 = vrcp.f32 %v2176_v54  ;;  %v2065_v55 = vpop.permute.xlu1 %2064  ;;  %3877 = vmatpush3.bf16.msra.mxu1 %v2268_v32  ;;  %v2431_v32 = vld [vmem:[%s5711_s18 + $0x18] sm:$0xff] }
0x1c6e   :  { %v4264_v14 = vpop.eup %4263  ;;  %3878 = vmatprep.subr.bf16.mxu1 %v4321_v23 }
0x1c6f   :  { %v1944_v43 = vpop.permute.xlu0 %1943  ;;  %v4266_v53 = vpop.eup %4265  ;;  %v2062_v24 = vmul.f32 %v4264_v14, %v4250_v39 }
0x1c70   :  { %3847 = vmatpush3.bf16.msra.mxu0 %v1944_v43  ;;  %v2061_v56 = vmul.f32 %v4266_v53, %v4248_v29 }
0x1c71   :  { %3858 = vmatprep.subr.bf16.mxu0 %v4321_v23  ;;  %v2186_v38 = vpop.permute.xlu1 %2185  ;;  %3879 = vmatpush3.bf16.msra.mxu1 %v2269_v25 }
0x1c72   :  { %v2063_v34 = vpack.c.bf16 %v2062_v24, %v2061_v56  ;;  %3892 = vmatprep.subr.bf16.mxu1 %v4321_v23 }
0x1c73   :  { %3849 = vmatmul.mubr.msk.bf16.vlgmr.msra.gmra.mrb[36].mxu0 %vm1797_vm14, %v1942_v18 }
0x1c74   :  { %3859 = vmatpush3.bf16.msra.mxu0 %v2065_v55  ;;  %3860 = vmatprep.mubr.msk.bf16.mxu0 %vm4322_vm1, %v4321_v23 }
0x1c75   :  { %3870 = vmatprep.subr.bf16.mxu0 %v4321_v23 }
0x1c76   :  { %v4268_v10 = vpop.eup %4267 }
0x1c77   :  { %v4270_v62 = vpop.eup %4269  ;;  %v2183_v37 = vmul.f32 %v4268_v10, %v4254_v27 }
0x1c78   :  { %v2182_v60 = vmul.f32 %v4270_v62, %v4252_v44 }
0x1c7a   :  { %v2184_v1 = vpack.c.bf16 %v2183_v37, %v2182_v60 }
0x1c7b   :  { %3861 = vmatmul.mubr.msk.bf16.vlgmr.msra.gmra.mrb[40].mxu0 %vm1797_vm14, %v2063_v34 }
0x1c7c   :  { %3871 = vmatpush3.bf16.msra.mxu0 %v2186_v38  ;;  %3872 = vmatprep.mubr.msk.bf16.mxu0 %vm4322_vm1, %v4321_v23 }
0x1c7d   :  { %3884 = vmatprep.subr.bf16.mxu0 %v4321_v23 }
0x1c83   :  { %3873 = vmatmul.mubr.msk.bf16.vlgmr.msra.gmra.mrb[44].mxu0 %vm1797_vm14, %v2184_v1 }
0x1c84   :  { %3888 = vmatprep.mubr.msk.bf16.mxu0 %vm4322_vm1, %v4321_v23 }
0x1d36   :  { %v1861_v15 = vpop.f32.mrb[32].mxu0 }
0x1d37   :  { %v3838_v0 = vpop.f32.mrb[33].mxu0 }
0x1d38   :  { %v1864_v2 = vpop.f32.mrb[34].mxu0 }
0x1d39   :  { %v3839_v12 = vpop.f32.mrb[35].mxu0 }
0x1d46   :  { %v1983_v58 = vpop.f32.mrb[36].mxu0 }
0x1d47   :  { %v3850_v41 = vpop.f32.mrb[37].mxu0 }
0x1d48   :  { %v1986_v28 = vpop.f32.mrb[38].mxu0  ;;  %v2371_v41 = vld [vmem:[%s5710_s16 + $0x18] sm:$0xff] }
0x1d49   :  { %v4081_v57 = vpack.i.bf16 %v1986_v28, %v1983_v58  ;;  %v3851_v5 = vpop.f32.mrb[39].mxu0  ;;  %v2370_v58 = vld [vmem:[%s5710_s16 + $0x10] sm:$0xff] }
0x1d4a   :  { %v2374_v28 = vpack.c.bf16 %v2371_v41, %v2370_v58  ;;  %v2429_v5 = vld [vmem:[%s5711_s18 + $0x8] sm:$0xff] }
0x1d4b   :  { %4082 = vrot.lane.b32.xlu0 %v4081_v57, %s4336_s1  ;;  %v2428_v57 = vld [vmem:[%s5711_s18] sm:$0xff] }
0x1d4c   :  { %v2437_v63 = vpack.c.bf16 %v2429_v5, %v2428_v57  ;;  %v3549_v57 = vld [vmem:[%s5704_s10 + $0x28] sm:$0xff] }
0x1d4e   :  { %v2104_v7 = vpop.f32.mrb[40].mxu0 }
0x1d4f   :  { %v3862_v61 = vpop.f32.mrb[41].mxu0 }
0x1d50   :  { %v2107_v52 = vpop.f32.mrb[42].mxu0 }
0x1d51   :  { %v4086_v42 = vpack.i.bf16 %v2107_v52, %v2104_v7  ;;  %v3863_v11 = vpop.f32.mrb[43].mxu0  ;;  %v2438_v7 = vpack.c.bf16 %v2431_v32, %v2430_v16  ;;  %v3550_v16 = vld [vmem:[%s5704_s10 + $0x30] sm:$0xff] }
0x1d53   :  { %4087 = vrot.lane.b32.xlu1 %v4086_v42, %s5731_s6 }
0x1d56   :  { %v2225_v29 = vpop.f32.mrb[44].mxu0 }
0x1d57   :  { %v3874_v59 = vpop.f32.mrb[45].mxu0 }
0x1d58   :  { %v2228_v39 = vpop.f32.mrb[46].mxu0 }
0x1d59   :  { %v4091_v19 = vpack.i.bf16 %v2228_v39, %v2225_v29  ;;  %v3875_v44 = vpop.f32.mrb[47].mxu0  ;;  %v3540_v29 = vld [vmem:[%s5712_s14] ss:$0 sm:$0xff] }
0x1d5b   :  { %4092 = vrot.lane.b32.xlu0 %v4091_v19, %s5730_s25  ;;  %s5784_s25 = smov 24  }
0x1dbd   :  { %v4083_v40 = vpop.permute.xlu0 %4082 }
0x1dbe   :  { %v4085_v33 = vunpack.i.h.bf16 %v4083_v40  ;;  %v4084_v22 = vunpack.i.l.bf16 %v4083_v40  ;;  %v3541_v40 = vld [vmem:[%s5713_s15] ss:$0 sm:$0xff] }
0x1dc0   :  { %v2257_v13 = vsel %vm1749_vm8, %v1864_v2, %v4085_v33  ;;  %v2256_v17 = vsel %vm1749_vm8, %v1861_v15, %v4084_v22  ;;  %v2369_v2 = vld [vmem:[%s5710_s16 + $0x8] sm:$0xff] }
0x1dc5   :  { %v4088_v27 = vpop.permute.xlu1 %4087 }
0x1dc6   :  { %v4090_v21 = vunpack.i.h.bf16 %v4088_v27  ;;  %v4089_v30 = vunpack.i.l.bf16 %v4088_v27 }
0x1dc8   :  { %v2259_v48 = vsel %vm1797_vm14, %v2257_v13, %v4090_v21  ;;  %v2258_v49 = vsel %vm1797_vm14, %v2256_v17, %v4089_v30  ;;  %v2432_v30 = vld [vmem:[%s5711_s18 + $0x20] sm:$0xff]  ;;  %v2434_v17 = vld [vmem:[%s5711_s18 + $0x30] sm:$0xff] }
0x1dcd   :  { %v4093_v35 = vpop.permute.xlu0 %4092 }
0x1dce   :  { %v4095_v46 = vunpack.i.h.bf16 %v4093_v35  ;;  %v4094_v47 = vunpack.i.l.bf16 %v4093_v35  ;;  %v2433_v35 = vld [vmem:[%s5711_s18 + $0x28] sm:$0xff] }
0x1dcf   :  { %v2439_v13 = vpack.c.bf16 %v2433_v35, %v2432_v30 }
0x1dd0   :  { %v2262_v45 = vsel %vm2260_vm13, %v2259_v48, %v4095_v46  ;;  %v2261_v50 = vsel %vm2260_vm13, %v2258_v49, %v4094_v47  ;;  %v2435_v46 = vld [vmem:[%s5711_s18 + $0x38] sm:$0xff]  ;;  %v3542_v48 = vld [vmem:[%s5714_s17] ss:$0 sm:$0xff] }
0x1dd1   :  { %v2267_v4 = vpack.c.bf16 %v2262_v45, %v2261_v50  ;;  %v2440_v47 = vpack.c.bf16 %v2435_v46, %v2434_v17 }
0x1dd3   :  { %3881 = vmatmul.mubr.msk.bf16.vlgmr.msra.gmra.mrb[48].mxu1 %vm164_vm0, %v2267_v4 }
0x1dd4   :  { %3900 = vmatprep.mubr.msk.bf16.mxu1 %vm4322_vm1, %v4321_v23  ;;  %3893 = vmatpush3.bf16.msra.mxu1 %v2437_v63  ;;  %v3551_v63 = vld [vmem:[%s5704_s10 + $0x38] sm:$0xff] }
0x1dd5   :  { %3894 = vmatprep.subr.bf16.mxu1 %v4321_v23  ;;  %v2545_v32 = vpack.c.bf16 %v3551_v63, %v3550_v16 }
0x1dd8   :  { %3895 = vmatpush3.bf16.msra.mxu1 %v2438_v7 }
0x1dd9   :  { %3896 = vmatprep.subr.bf16.mxu1 %v4321_v23 }
0x1ddc   :  { %3897 = vmatpush3.bf16.msra.mxu1 %v2439_v13 }
0x1ddd   :  { %3898 = vmatprep.subr.bf16.mxu1 %v4321_v23 }
0x1de0   :  { %3899 = vmatpush3.bf16.msra.mxu1 %v2440_v47 }
0x1de1   :  { %3918 = vmatprep.subr.bf16.mxu1 %v4321_v23 }
0x1ea6   :  { %v2314_v31 = vpop.f32.mrb[48].mxu1 }
0x1ea7   :  { %v2315_v54 = vadd.f32 %v3538_v51, %v2314_v31  ;;  %v3882_v36 = vpop.f32.mrb[49].mxu1 }
0x1ea8   :  { %v2317_v43 = vpop.f32.mrb[50].mxu1 }
0x1ea9   :  { %v2321_v18 = vadd.f32 %v2315_v54, %v5270_v20  ;;  %v2318_v14 = vadd.f32 %v3538_v51, %v2317_v43  ;;  %v3883_v55 = vpop.f32.mrb[51].mxu1 }
0x1eab   :  { %v2322_v53 = vadd.f32 %v2318_v14, %v5268_v9  ;;  %v2325_v24 = vsel %vm164_vm0, %v2321_v18, 0.0  ;;  %v2368_v9 = vld [vmem:[%s5710_s16] sm:$0xff] }
0x1eac   :  { %2326 = vadd.xlane.f32.xlu1 %v2325_v24  ;;  %v2373_v12 = vpack.c.bf16 %v2369_v2, %v2368_v9 }
0x1ead   :  { %v2328_v56 = vsel %vm164_vm0, %v2322_v53, 0.0 }
0x1eae   :  { %2329 = vadd.xlane.f32.xlu0 %v2328_v56  ;;  %3885 = vmatpush3.bf16.msra.mxu0 %v2373_v12 }
0x1eaf   :  { %3886 = vmatprep.subr.bf16.mxu0 %v4321_v23 }
0x1eb2   :  { %3887 = vmatpush3.bf16.msra.mxu0 %v2374_v28  ;;  %v3548_v28 = vld [vmem:[%s5704_s10 + $0x20] sm:$0xff] }
0x1eb3   :  { %3904 = vmatprep.subr.bf16.mxu0 %v4321_v23  ;;  %v2544_v5 = vpack.c.bf16 %v3549_v57, %v3548_v28 }
0x1f39   :  { %v2327_v34 = vpop.xlane.xlu1 %2326 }
0x1f3a   :  { %v2332_v10 = vmul.f32 0.03125, %v2327_v34 }
0x1f3b   :  { %v2330_v38 = vpop.xlane.xlu0 %2329 }
0x1f3c   :  { %v2334_v62 = vsub.f32 %v2321_v18, %v2332_v10  ;;  %v2333_v37 = vmul.f32 0.03125, %v2330_v38  ;;  %v3544_v18 = vld [vmem:[%s5715_s19] ss:$0 sm:$0xff] }
0x1f3e   :  { %v2335_v60 = vsub.f32 %v2322_v53, %v2333_v37  ;;  %v2336_v1 = vmul.f32 %v2334_v62, %v2334_v62 }
0x1f40   :  { %v2338_v15 = vsel %vm164_vm0, %v2336_v1, 0.0  ;;  %v2337_v20 = vmul.f32 %v2335_v60, %v2335_v60 }
0x1f41   :  { %2339 = vadd.xlane.f32.xlu0 %v2338_v15 }
0x1f42   :  { %v2341_v0 = vsel %vm164_vm0, %v2337_v20, 0.0 }
0x1f43   :  { %2342 = vadd.xlane.f32.xlu1 %v2341_v0 }
0x1fce   :  { %v2340_v8 = vpop.xlane.xlu0 %2339 }
0x1fcf   :  { %v2344_v26 = vmul.f32 0.03125, %v2340_v8 }
0x1fd0   :  { %v2343_v61 = vpop.xlane.xlu1 %2342 }
0x1fd1   :  { %v2346_v25 = vadd.f32 1e-05, %v2344_v26  ;;  %v2345_v52 = vmul.f32 0.03125, %v2343_v61 }
0x1fd3   :  { %4271 = vrsqrt.f32 %v2346_v25  ;;  %v2347_v42 = vadd.f32 1e-05, %v2345_v52 }
0x1fd5   :  { %4273 = vrsqrt.f32 %v2347_v42 }
0x1fdd   :  { %v4272_v11 = vpop.eup %4271 }
0x1fde   :  { %v2350_v59 = vmul.f32 %v4272_v11, %v2334_v62  ;;  %v3546_v11 = vld [vmem:[%s5716_s20] ss:$0 sm:$0xff] }
0x1fdf   :  { %v4274_v39 = vpop.eup %4273 }
0x1fe0   :  { %v2358_v19 = vmul.f32 %v3540_v29, %v2350_v59  ;;  %v2351_v44 = vmul.f32 %v4274_v39, %v2335_v60 }
0x1fe2   :  { %v2359_v27 = vmul.f32 %v3540_v29, %v2351_v44  ;;  %v2366_v33 = vadd.f32 %v3541_v40, %v2358_v19  ;;  %v3547_v44 = vld [vmem:[%s5717_s21] ss:$0 sm:$0xff] }
0x1fe4   :  { %v2367_v22 = vadd.f32 %v3541_v40, %v2359_v27 }
0x1fe6   :  { %v2372_v21 = vpack.c.bf16 %v2367_v22, %v2366_v33 }
0x1fe8   :  { %3889 = vmatmul.mubr.msk.bf16.vlgmr.msra.gmra.mrb[48].mxu0 %vm164_vm0, %v2372_v21  ;;  %v3553_v21 = vld [vmem:[%s5706_s11 + $0x1] ss:$0 sm:$0xff]  ;;  %s5780_s11 = smov 48  }
0x1fe9   :  { %3908 = vmatprep.mubr.msk.bf16.mxu0 %vm4322_vm1, %v4321_v23  ;;  %3905 = vmatpush3.bf16.msra.mxu0 %v2544_v5 }
0x1fea   :  { %3906 = vmatprep.subr.bf16.mxu0 %v4321_v23 }
0x1fed   :  { %3907 = vmatpush3.bf16.msra.mxu0 %v2545_v32 }
0x1fee   :  { %3912 = vmatprep.subr.bf16.mxu0 %v4321_v23 }
0x20bb   :  { %v2419_v49 = vpop.f32.mrb[48].mxu0 }
0x20bc   :  { %v2420_v45 = vadd.f32 %v3542_v48, %v2419_v49  ;;  %v3890_v50 = vpop.f32.mrb[49].mxu0 }
0x20bd   :  { %v2422_v4 = vpop.f32.mrb[50].mxu0 }
0x20be   :  { %v2423_v51 = vadd.f32 %v3542_v48, %v2422_v4  ;;  %v3891_v31 = vpop.f32.mrb[51].mxu0  ;;  %v2426_v54 = vmax.f32 %v2420_v45, 0.0 }
0x20c0   :  { %v2427_v36 = vmax.f32 %v2423_v51, 0.0 }
0x20c2   :  { %v2436_v43 = vpack.c.bf16 %v2427_v36, %v2426_v54 }
0x20c4   :  { %3901 = vmatmul.mubr.msk.bf16.vlgmr.msra.gmra.mrb[52].mxu1 %vm259_vm4, %v2436_v43 }
0x20c5   :  { %3920 = vmatprep.mubr.msk.bf16.mxu1 %vm4322_vm1, %v4321_v23 }
0x2197   :  { %v2485_v14 = vpop.f32.mrb[52].mxu1 }
0x2198   :  { %v2486_v55 = vadd.f32 %v3544_v18, %v2485_v14  ;;  %v3902_v53 = vpop.f32.mrb[53].mxu1 }
0x2199   :  { %v2488_v24 = vpop.f32.mrb[54].mxu1 }
0x219a   :  { %v2492_v56 = vadd.f32 %v2486_v55, %v2366_v33  ;;  %v2489_v34 = vadd.f32 %v3544_v18, %v2488_v24  ;;  %v3903_v10 = vpop.f32.mrb[55].mxu1 }
0x219c   :  { %v2493_v38 = vadd.f32 %v2489_v34, %v2367_v22  ;;  %v2496_v62 = vsel %vm164_vm0, %v2492_v56, 0.0 }
0x219d   :  { %2497 = vadd.xlane.f32.xlu0 %v2496_v62 }
0x219e   :  { %v2499_v37 = vsel %vm164_vm0, %v2493_v38, 0.0 }
0x219f   :  { %2500 = vadd.xlane.f32.xlu1 %v2499_v37 }
0x222a   :  { %v2498_v60 = vpop.xlane.xlu0 %2497 }
0x222b   :  { %v2502_v1 = vmul.f32 0.03125, %v2498_v60 }
0x222c   :  { %v2501_v15 = vpop.xlane.xlu1 %2500 }
0x222d   :  { %v2504_v20 = vsub.f32 %v2492_v56, %v2502_v1  ;;  %v2503_v0 = vmul.f32 0.03125, %v2501_v15 }
0x222f   :  { %v2505_v9 = vsub.f32 %v2493_v38, %v2503_v0  ;;  %v2506_v2 = vmul.f32 %v2504_v20, %v2504_v20 }
0x2231   :  { %v2508_v12 = vsel %vm164_vm0, %v2506_v2, 0.0  ;;  %v2507_v58 = vmul.f32 %v2505_v9, %v2505_v9 }
0x2232   :  { %2509 = vadd.xlane.f32.xlu0 %v2508_v12 }
0x2233   :  { %v2511_v41 = vsel %vm164_vm0, %v2507_v58, 0.0 }
0x2234   :  { %2512 = vadd.xlane.f32.xlu1 %v2511_v41 }
0x22bf   :  { %v2510_v7 = vpop.xlane.xlu0 %2509 }
0x22c0   :  { %v2514_v8 = vmul.f32 0.03125, %v2510_v7 }
0x22c1   :  { %v2513_v26 = vpop.xlane.xlu1 %2512 }
0x22c2   :  { %v2516_v61 = vadd.f32 1e-05, %v2514_v8  ;;  %v2515_v25 = vmul.f32 0.03125, %v2513_v26 }
0x22c4   :  { %4275 = vrsqrt.f32 %v2516_v61  ;;  %v2517_v52 = vadd.f32 1e-05, %v2515_v25 }
0x22c6   :  { %4277 = vrsqrt.f32 %v2517_v52 }
0x22ce   :  { %v4276_v42 = vpop.eup %4275 }
0x22cf   :  { %v2520_v29 = vmul.f32 %v4276_v42, %v2504_v20 }
0x22d0   :  { %v4278_v59 = vpop.eup %4277 }
0x22d1   :  { %v2528_v39 = vmul.f32 %v3546_v11, %v2520_v29  ;;  %v2521_v19 = vmul.f32 %v4278_v59, %v2505_v9 }
0x22d3   :  { %v2529_v40 = vmul.f32 %v3546_v11, %v2521_v19  ;;  %v5490_v27 = vadd.f32 %v3547_v44, %v2528_v39 }
0x22d5   :  { %v5492_v33 = vadd.f32 %v3547_v44, %v2529_v40 }
0x22d7   :  { %v2543_v22 = vpack.c.bf16 %v5492_v33, %v5490_v27 }
0x22d9   :  { %3909 = vmatmul.mubr.msk.bf16.vlgmr.msra.gmra.mrb[52].mxu0 %vm164_vm0, %v2543_v22 }
0x22da   :  { %3914 = vmatprep.mubr.msk.bf16.mxu0 %vm4322_vm1, %v4321_v23 }
0x23ac   :  { %v2591_v30 = vpop.f32.mrb[52].mxu0 }
0x23ad   :  { %v2592_v35 = vadd.f32 %v3553_v21, %v2591_v30  ;;  %v3910_v13 = vpop.f32.mrb[53].mxu0 }
0x23ae   :  { %v2594_v17 = vpop.f32.mrb[54].mxu0 }
0x23af   :  { %v2595_v46 = vadd.f32 %v3553_v21, %v2594_v17  ;;  %v3911_v47 = vpop.f32.mrb[55].mxu0  ;;  %v2598_v48 = vmul.f32 0.35355338, %v2592_v35 }
0x23b1   :  { %v2599_v49 = vmul.f32 0.35355338, %v2595_v46  ;;  %v5502_v45 = vpack.c.bf16 %v2595_v46, %v2592_v35 }
0x23b3   :  { %v2600_v50 = vpack.c.bf16 %v2599_v49, %v2598_v48  ;;  %2725 = vrot.lane.b32.xlu1 %v5502_v45, %s4327_s4  ;;  %2603 = vrot.lane.b32.xlu0 %v5502_v45, %s4326_s7  ;;  %s5782_s7 = smov 56  }
0x23b7   :  { %2846 = vrot.lane.b32.xlu0 %v5502_v45, %s4328_s30  ;;  %2723 = vrot.lane.b32.xlu1 %v2600_v50, %s4329_s27 }
0x23bb   :  { %2967 = vrot.lane.b32.xlu0 %v5502_v45, %s4330_s28  ;;  %2844 = vrot.lane.b32.xlu1 %v2600_v50, %s4331_s29 }
0x23bf   :  { %2965 = vrot.lane.b32.xlu1 %v2600_v50, %s4332_s5 }
0x2425   :  { %v2604_v4 = vpop.permute.xlu0 %2603  ;;  %v2726_v31 = vpop.permute.xlu1 %2725 }
0x2426   :  { %v2609_v51 = vsel %vm1749_vm8, %v2604_v4, 0  ;;  %v2731_v54 = vsel %vm1749_vm8, %v2726_v31, 0 }
0x2427   :  { %3913 = vmatpush3.bf16.xpose.msra.mxu0 %v2609_v51 }
0x2428   :  { %3924 = vmatprep.subr.bf16.mxu0 %v4321_v23 }
0x2429   :  { %v2847_v36 = vpop.permute.xlu0 %2846  ;;  %v2724_v43 = vpop.permute.xlu1 %2723 }
0x242a   :  { %v2852_v18 = vsel %vm1749_vm8, %v2847_v36, 0 }
0x242d   :  { %v2968_v14 = vpop.permute.xlu0 %2967  ;;  %v2845_v55 = vpop.permute.xlu1 %2844 }
0x242e   :  { %3915 = vmatmul.mubr.msk.bf16.vlgmr.msra.gmra.mrb[56].mxu0 %vm1749_vm8, %v2600_v50  ;;  %v2973_v53 = vsel %vm1749_vm8, %v2968_v14, 0 }
0x242f   :  { %3925 = vmatpush3.bf16.xpose.msra.mxu0 %v2731_v54  ;;  %3926 = vmatprep.mubr.msk.bf16.mxu0 %vm4322_vm1, %v4321_v23 }
0x2430   :  { %3936 = vmatprep.subr.bf16.mxu0 %v4321_v23 }
0x2431   :  { %v2966_v24 = vpop.permute.xlu1 %2965 }
0x2436   :  { %3927 = vmatmul.mubr.msk.bf16.vlgmr.msra.gmra.mrb[60].mxu0 %vm1749_vm8, %v2724_v43 }
0x2437   :  { %3937 = vmatpush3.bf16.xpose.msra.mxu0 %v2852_v18  ;;  %3938 = vmatprep.mubr.msk.bf16.mxu0 %vm4322_vm1, %v4321_v23 }
0x2438   :  { %3948 = vmatprep.subr.bf16.mxu0 %v4321_v23 }
0x243e   :  { %3939 = vmatmul.mubr.msk.bf16.vlgmr.msra.gmra.mrb[64].mxu0 %vm1749_vm8, %v2845_v55 }
0x243f   :  { %3949 = vmatpush3.bf16.xpose.msra.mxu0 %v2973_v53  ;;  %3950 = vmatprep.mubr.msk.bf16.mxu0 %vm4322_vm1, %v4321_v23 }
0x2440   :  { %3960 = vmatprep.subr.bf16.mxu0 %v4321_v23 }
0x2446   :  { %3951 = vmatmul.mubr.msk.bf16.vlgmr.msra.gmra.mrb[68].mxu0 %vm1749_vm8, %v2966_v24 }
0x2447   :  { %3964 = vmatprep.mubr.msk.bf16.mxu0 %vm4322_vm1, %v4321_v23 }
0x2501   :  { %v2645_v56 = vpop.f32.mrb[56].mxu0 }
0x2502   :  { %v2646_v34 = vadd.f32 %v2645_v56, %v5316_v3  ;;  %v3916_v10 = vpop.f32.mrb[57].mxu0 }
0x2503   :  { %v2648_v38 = vpop.f32.mrb[58].mxu0 }
0x2504   :  { %v2649_v62 = vadd.f32 %v2648_v38, %v5321_v6  ;;  %v3917_v37 = vpop.f32.mrb[59].mxu0  ;;  %v2652_v60 = vsel %vm1797_vm14, %v2646_v34, -inf }
0x2505   :  { %2653 = vmax.xlane.f32.xlu0 %v2652_v60 }
0x2506   :  { %v2655_v1 = vsel %vm1797_vm14, %v2649_v62, -inf }
0x2507   :  { %2656 = vmax.xlane.f32.xlu1 %v2655_v1 }
0x2509   :  { %v2767_v15 = vpop.f32.mrb[60].mxu0 }
0x250a   :  { %v2768_v20 = vadd.f32 %v2767_v15, %v5316_v3  ;;  %v3928_v0 = vpop.f32.mrb[61].mxu0 }
0x250b   :  { %v2770_v9 = vpop.f32.mrb[62].mxu0 }
0x250c   :  { %v2771_v2 = vadd.f32 %v2770_v9, %v5321_v6  ;;  %v3929_v12 = vpop.f32.mrb[63].mxu0  ;;  %v2774_v58 = vsel %vm1797_vm14, %v2768_v20, -inf }
0x250d   :  { %2775 = vmax.xlane.f32.xlu0 %v2774_v58 }
0x250e   :  { %v2777_v41 = vsel %vm1797_vm14, %v2771_v2, -inf }
0x2511   :  { %2778 = vmax.xlane.f32.xlu0 %v2777_v41  ;;  %v2888_v28 = vpop.f32.mrb[64].mxu0 }
0x2512   :  { %v2889_v57 = vadd.f32 %v2888_v28, %v5316_v3  ;;  %v3940_v5 = vpop.f32.mrb[65].mxu0 }
0x2513   :  { %v2891_v16 = vpop.f32.mrb[66].mxu0 }
0x2514   :  { %v2892_v63 = vadd.f32 %v2891_v16, %v5321_v6  ;;  %v3941_v32 = vpop.f32.mrb[67].mxu0  ;;  %v2895_v7 = vsel %vm1797_vm14, %v2889_v57, -inf }
0x2515   :  { %2896 = vmax.xlane.f32.xlu1 %v2895_v7 }
0x2516   :  { %v2898_v8 = vsel %vm1797_vm14, %v2892_v63, -inf }
0x2517   :  { %2899 = vmax.xlane.f32.xlu0 %v2898_v8 }
0x2519   :  { %v3009_v26 = vpop.f32.mrb[68].mxu0 }
0x251a   :  { %v3010_v61 = vadd.f32 %v3009_v26, %v5316_v3  ;;  %v3952_v25 = vpop.f32.mrb[69].mxu0 }
0x251b   :  { %v3012_v52 = vpop.f32.mrb[70].mxu0 }
0x251c   :  { %v3013_v42 = vadd.f32 %v3012_v52, %v5321_v6  ;;  %v3953_v11 = vpop.f32.mrb[71].mxu0  ;;  %v3016_v29 = vsel %vm1797_vm14, %v3010_v61, -inf }
0x251d   :  { %3017 = vmax.xlane.f32.xlu1 %v3016_v29 }
0x251e   :  { %v3019_v59 = vsel %vm1797_vm14, %v3013_v42, -inf }
0x251f   :  { %3020 = vmax.xlane.f32.xlu0 %v3019_v59 }
0x252e   :  { %2675 = vrot.lane.b32.xlu1 %v5502_v45, %s4323_s8  ;;  %s5781_s8 = smov 40  }
0x2592   :  { %v2654_v39 = vpop.xlane.xlu0 %2653 }
0x2593   :  { %v2658_v19 = vsub.f32 %v2646_v34, %v2654_v39 }
0x2594   :  { %v2657_v44 = vpop.xlane.xlu1 %2656 }
0x2595   :  { %v2660_v40 = vmul.f32 1.442695, %v2658_v19  ;;  %v2659_v22 = vsub.f32 %v2649_v62, %v2657_v44 }
0x2597   :  { %4279 = vpow2.f32 %v2660_v40  ;;  %v2662_v3 = vmul.f32 1.442695, %v2659_v22 }
0x2599   :  { %4281 = vpow2.f32 %v2662_v3 }
0x259a   :  { %v2776_v21 = vpop.xlane.xlu0 %2775 }
0x259b   :  { %v2780_v6 = vsub.f32 %v2768_v20, %v2776_v21 }
0x259d   :  { %v2782_v30 = vmul.f32 1.442695, %v2780_v6 }
0x259e   :  { %v2779_v35 = vpop.xlane.xlu0 %2778 }
0x259f   :  { %4283 = vpow2.f32 %v2782_v30  ;;  %v2781_v13 = vsub.f32 %v2771_v2, %v2779_v35 }
0x25a1   :  { %v4280_v17 = vpop.eup %4279  ;;  %v2784_v46 = vmul.f32 1.442695, %v2781_v13 }
0x25a2   :  { %v2897_v47 = vpop.xlane.xlu1 %2896  ;;  %v2664_v48 = vsel %vm1797_vm14, %v4280_v17, 0.0 }
0x25a3   :  { %v4282_v49 = vpop.eup %4281  ;;  %4285 = vpow2.f32 %v2784_v46  ;;  %v2901_v50 = vsub.f32 %v2889_v57, %v2897_v47  ;;  %2665 = vadd.xlane.f32.xlu1 %v2664_v48 }
0x25a4   :  { %v2900_v4 = vpop.xlane.xlu0 %2899  ;;  %v2667_v51 = vsel %vm1797_vm14, %v4282_v49, 0.0 }
0x25a5   :  { %v2903_v31 = vmul.f32 1.442695, %v2901_v50  ;;  %v2902_v54 = vsub.f32 %v2892_v63, %v2900_v4  ;;  %2668 = vadd.xlane.f32.xlu0 %v2667_v51  ;;  %v3563_v51 = vld [vmem:[%s5708_s12 + $0x20] sm:$0xff] }
0x25a7   :  { %4287 = vpow2.f32 %v2903_v31  ;;  %v2905_v36 = vmul.f32 1.442695, %v2902_v54  ;;  %v3564_v31 = vld [vmem:[%s5708_s12 + $0x28] sm:$0xff] }
0x25a9   :  { %v4284_v43 = vpop.eup %4283  ;;  %4289 = vpow2.f32 %v2905_v36 }
0x25aa   :  { %v3018_v18 = vpop.xlane.xlu1 %3017  ;;  %v2786_v14 = vsel %vm1797_vm14, %v4284_v43, 0.0 }
0x25ab   :  { %v3022_v55 = vsub.f32 %v3010_v61, %v3018_v18  ;;  %2787 = vadd.xlane.f32.xlu1 %v2786_v14  ;;  %v3565_v14 = vld [vmem:[%s5708_s12 + $0x30] sm:$0xff] }
0x25ac   :  { %v3021_v53 = vpop.xlane.xlu0 %3020 }
0x25ad   :  { %v4286_v24 = vpop.eup %4285  ;;  %v3024_v56 = vmul.f32 1.442695, %v3022_v55  ;;  %v3023_v34 = vsub.f32 %v3013_v42, %v3021_v53  ;;  %v3566_v55 = vld [vmem:[%s5708_s12 + $0x38] sm:$0xff] }
0x25ae   :  { %v2676_v10 = vpop.permute.xlu1 %2675  ;;  %v2789_v38 = vsel %vm1797_vm14, %v4286_v24, 0.0 }
0x25af   :  { %4291 = vpow2.f32 %v3024_v56  ;;  %v3026_v62 = vmul.f32 1.442695, %v3023_v34  ;;  %3919 = vmatpush3.bf16.msra.mxu1 %v2676_v10  ;;  %2790 = vadd.xlane.f32.xlu0 %v2789_v38 }
0x25b0   :  { %3930 = vmatprep.subr.bf16.mxu1 %v4321_v23 }
0x25b1   :  { %v4288_v37 = vpop.eup %4287  ;;  %4293 = vpow2.f32 %v3026_v62 }
0x25b2   :  { %v2907_v60 = vsel %vm1797_vm14, %v4288_v37, 0.0 }
0x25b3   :  { %v4290_v1 = vpop.eup %4289  ;;  %2908 = vadd.xlane.f32.xlu1 %v2907_v60 }
0x25b4   :  { %v2910_v15 = vsel %vm1797_vm14, %v4290_v1, 0.0 }
0x25b5   :  { %2911 = vadd.xlane.f32.xlu0 %v2910_v15 }
0x25b9   :  { %v4292_v20 = vpop.eup %4291 }
0x25ba   :  { %v3028_v0 = vsel %vm1797_vm14, %v4292_v20, 0.0 }
0x25bb   :  { %v4294_v9 = vpop.eup %4293  ;;  %3029 = vadd.xlane.f32.xlu1 %v3028_v0 }
0x25bc   :  { %v3031_v2 = vsel %vm1797_vm14, %v4294_v9, 0.0 }
0x25bd   :  { %3032 = vadd.xlane.f32.xlu0 %v3031_v2 }
0x25cc   :  { %2918 = vrot.lane.b32.xlu1 %v5502_v45, %s5780_s11 }
0x25d0   :  { %3039 = vrot.lane.b32.xlu1 %v5502_v45, %s5781_s8 }
0x25d3   :  { %2797 = vrot.lane.b32.xlu0 %v5502_v45, %s5782_s7 }
0x2630   :  { %v2666_v12 = vpop.xlane.xlu1 %2665 }
0x2631   :  { %4295 = vrcp.f32 %v2666_v12 }
0x2632   :  { %v2669_v58 = vpop.xlane.xlu0 %2668 }
0x2633   :  { %4297 = vrcp.f32 %v2669_v58 }
0x2638   :  { %v2788_v63 = vpop.xlane.xlu1 %2787 }
0x263b   :  { %v4296_v41 = vpop.eup %4295 }
0x263c   :  { %v2791_v28 = vpop.xlane.xlu0 %2790  ;;  %v2672_v5 = vmul.f32 %v4296_v41, %v4280_v17 }
0x263d   :  { %v4298_v57 = vpop.eup %4297  ;;  %4299 = vrcp.f32 %v2791_v28 }
0x263e   :  { %v2673_v16 = vmul.f32 %v4298_v57, %v4282_v49  ;;  %4301 = vrcp.f32 %v2788_v63 }
0x2640   :  { %v2674_v32 = vpack.c.bf16 %v2673_v16, %v2672_v5  ;;  %v2909_v45 = vpop.xlane.xlu1 %2908 }
0x2642   :  { %3921 = vmatmul.mubr.msk.bf16.vlgmr.msra.gmra.mrb[56].mxu1 %vm1797_vm14, %v2674_v32  ;;  %v2912_v7 = vpop.xlane.xlu0 %2911 }
0x2643   :  { %3932 = vmatprep.mubr.msk.bf16.mxu1 %vm4322_vm1, %v4321_v23  ;;  %4303 = vrcp.f32 %v2912_v7 }
0x2644   :  { %4305 = vrcp.f32 %v2909_v45 }
0x2647   :  { %v4300_v8 = vpop.eup %4299 }
0x2648   :  { %v4302_v61 = vpop.eup %4301  ;;  %v2795_v25 = vmul.f32 %v4300_v8, %v4286_v24  ;;  %v3030_v52 = vpop.xlane.xlu1 %3029  ;;  %v3123_v24 = vpack.c.bf16 %v3566_v55, %v3565_v14  ;;  %v3568_v8 = vld [vmem:[%s5709_s13 + $0x1] ss:$0 sm:$0xff] }
0x2649   :  { %v2794_v42 = vmul.f32 %v4302_v61, %v4284_v43  ;;  %v3122_v43 = vpack.c.bf16 %v3564_v31, %v3563_v51  ;;  %v3583_v51 = vld [vmem:[%s5711_s18 + $0x50] sm:$0xff] }
0x264a   :  { %v3033_v26 = vpop.xlane.xlu0 %3032 }
0x264b   :  { %4307 = vrcp.f32 %v3033_v26  ;;  %v2796_v29 = vpack.c.bf16 %v2795_v25, %v2794_v42  ;;  %3961 = vmatpush3.bf16.msra.mxu0 %v3122_v43 }
0x264c   :  { %4309 = vrcp.f32 %v3030_v52  ;;  %v2919_v39 = vpop.permute.xlu1 %2918  ;;  %3962 = vmatprep.subr.bf16.mxu0 %v4321_v23 }
0x264d   :  { %v4304_v59 = vpop.eup %4303 }
0x264e   :  { %v2798_v11 = vpop.permute.xlu0 %2797  ;;  %v4306_v19 = vpop.eup %4305  ;;  %v2916_v44 = vmul.f32 %v4304_v59, %v4290_v1 }
0x264f   :  { %3931 = vmatpush3.bf16.msra.mxu1 %v2798_v11  ;;  %v2915_v40 = vmul.f32 %v4306_v19, %v4288_v37  ;;  %3963 = vmatpush3.bf16.msra.mxu0 %v3123_v24 }
0x2650   :  { %3942 = vmatprep.subr.bf16.mxu1 %v4321_v23  ;;  %v3040_v21 = vpop.permute.xlu1 %3039  ;;  %3976 = vmatprep.subr.bf16.mxu0 %v4321_v23 }
0x2651   :  { %v2917_v22 = vpack.c.bf16 %v2916_v44, %v2915_v40 }
0x2652   :  { %3933 = vmatmul.mubr.msk.bf16.vlgmr.msra.gmra.mrb[60].mxu1 %vm1797_vm14, %v2796_v29 }
0x2653   :  { %3943 = vmatpush3.bf16.msra.mxu1 %v2919_v39  ;;  %3944 = vmatprep.mubr.msk.bf16.mxu1 %vm4322_vm1, %v4321_v23 }
0x2654   :  { %3954 = vmatprep.subr.bf16.mxu1 %v4321_v23 }
0x2655   :  { %v4308_v3 = vpop.eup %4307 }
0x2656   :  { %v4310_v6 = vpop.eup %4309  ;;  %v3037_v30 = vmul.f32 %v4308_v3, %v4294_v9 }
0x2657   :  { %v3036_v35 = vmul.f32 %v4310_v6, %v4292_v20 }
0x2659   :  { %v3038_v13 = vpack.c.bf16 %v3037_v30, %v3036_v35 }
0x265a   :  { %3945 = vmatmul.mubr.msk.bf16.vlgmr.msra.gmra.mrb[64].mxu1 %vm1797_vm14, %v2917_v22 }
0x265b   :  { %3955 = vmatpush3.bf16.msra.mxu1 %v3040_v21  ;;  %3956 = vmatprep.mubr.msk.bf16.mxu1 %vm4322_vm1, %v4321_v23 }
0x265c   :  { %3968 = vmatprep.subr.bf16.mxu1 %v4321_v23 }
0x2662   :  { %3957 = vmatmul.mubr.msk.bf16.vlgmr.msra.gmra.mrb[68].mxu1 %vm1797_vm14, %v3038_v13 }
0x2663   :  { %3972 = vmatprep.mubr.msk.bf16.mxu1 %vm4322_vm1, %v4321_v23 }
0x2715   :  { %v2715_v17 = vpop.f32.mrb[56].mxu1 }
0x2716   :  { %v3922_v46 = vpop.f32.mrb[57].mxu1 }
0x2717   :  { %v2718_v47 = vpop.f32.mrb[58].mxu1 }
0x2718   :  { %v3923_v48 = vpop.f32.mrb[59].mxu1 }
0x2719   :  { %v3577_v48 = vld [vmem:[%s5710_s16 + $0x38] sm:$0xff] }
0x2725   :  { %v2837_v49 = vpop.f32.mrb[60].mxu1 }
0x2726   :  { %v3934_v50 = vpop.f32.mrb[61].mxu1 }
0x2727   :  { %v2840_v4 = vpop.f32.mrb[62].mxu1  ;;  %v3581_v50 = vld [vmem:[%s5711_s18 + $0x40] sm:$0xff] }
0x2728   :  { %v4096_v54 = vpack.i.bf16 %v2840_v4, %v2837_v49  ;;  %v3935_v36 = vpop.f32.mrb[63].mxu1  ;;  %v3582_v4 = vld [vmem:[%s5711_s18 + $0x48] sm:$0xff] }
0x2729   :  { %v3296_v31 = vpack.c.bf16 %v3582_v4, %v3581_v50 }
0x272a   :  { %4097 = vrot.lane.b32.xlu0 %v4096_v54, %s4336_s1  ;;  %s5783_s1 = smov 16   ;;  %v3584_v54 = vld [vmem:[%s5711_s18 + $0x58] sm:$0xff] }
0x272b   :  { %v3297_v36 = vpack.c.bf16 %v3584_v54, %v3583_v51  ;;  %v3594_v54 = vld [vmem:[%s5716_s20 + $0x1] ss:$0 sm:$0xff] }
0x272d   :  { %v2958_v18 = vpop.f32.mrb[64].mxu1 }
0x272e   :  { %v3946_v53 = vpop.f32.mrb[65].mxu1 }
0x272f   :  { %v2961_v56 = vpop.f32.mrb[66].mxu1 }
0x2730   :  { %v4101_v34 = vpack.i.bf16 %v2961_v56, %v2958_v18  ;;  %v3947_v10 = vpop.f32.mrb[67].mxu1 }
0x2732   :  { %4102 = vrot.lane.b32.xlu1 %v4101_v34, %s5783_s1  ;;  %v3572_v34 = vld [vmem:[%s5712_s14 + $0x1] ss:$0 sm:$0xff] }
0x2735   :  { %v3079_v38 = vpop.f32.mrb[68].mxu1 }
0x2736   :  { %v3958_v62 = vpop.f32.mrb[69].mxu1 }
0x2737   :  { %v3082_v37 = vpop.f32.mrb[70].mxu1 }
0x2738   :  { %v4106_v60 = vpack.i.bf16 %v3082_v37, %v3079_v38  ;;  %v3959_v1 = vpop.f32.mrb[71].mxu1 }
0x273a   :  { %4107 = vrot.lane.b32.xlu0 %v4106_v60, %s5784_s25  ;;  %v3573_v60 = vld [vmem:[%s5713_s15 + $0x1] ss:$0 sm:$0xff] }
0x279c   :  { %v4098_v15 = vpop.permute.xlu0 %4097 }
0x279d   :  { %v4100_v0 = vunpack.i.h.bf16 %v4098_v15  ;;  %v4099_v9 = vunpack.i.l.bf16 %v4098_v15 }
0x279f   :  { %v3111_v41 = vsel %vm1749_vm8, %v2718_v47, %v4100_v0  ;;  %v3110_v28 = vsel %vm1749_vm8, %v2715_v17, %v4099_v9  ;;  %v3575_v17 = vld [vmem:[%s5710_s16 + $0x28] sm:$0xff]  ;;  %v3576_v47 = vld [vmem:[%s5710_s16 + $0x30] sm:$0xff]  ;;  %v3585_v9 = vld [vmem:[%s5711_s18 + $0x60] sm:$0xff] }
0x27a0   :  { %v3231_v49 = vpack.c.bf16 %v3577_v48, %v3576_v47 }
0x27a4   :  { %v4103_v20 = vpop.permute.xlu1 %4102 }
0x27a5   :  { %v4105_v2 = vunpack.i.h.bf16 %v4103_v20  ;;  %v4104_v12 = vunpack.i.l.bf16 %v4103_v20 }
0x27a7   :  { %v3113_v16 = vsel %vm1797_vm14, %v3111_v41, %v4105_v2  ;;  %v3112_v63 = vsel %vm1797_vm14, %v3110_v28, %v4104_v12  ;;  %v3586_v2 = vld [vmem:[%s5711_s18 + $0x68] sm:$0xff]  ;;  %v3588_v41 = vld [vmem:[%s5711_s18 + $0x78] sm:$0xff] }
0x27a8   :  { %v3298_v12 = vpack.c.bf16 %v3586_v2, %v3585_v9 }
0x27ac   :  { %v4108_v58 = vpop.permute.xlu0 %4107 }
0x27ad   :  { %v4110_v57 = vunpack.i.h.bf16 %v4108_v58  ;;  %v4109_v5 = vunpack.i.l.bf16 %v4108_v58  ;;  %v3587_v58 = vld [vmem:[%s5711_s18 + $0x70] sm:$0xff] }
0x27ae   :  { %v3299_v28 = vpack.c.bf16 %v3588_v41, %v3587_v58 }
0x27af   :  { %v3115_v32 = vsel %vm2260_vm13, %v3113_v16, %v4110_v57  ;;  %v3114_v7 = vsel %vm2260_vm13, %v3112_v63, %v4109_v5  ;;  %v3579_v57 = vld [vmem:[%s5714_s17 + $0x1] ss:$0 sm:$0xff] }
0x27b0   :  { %v3121_v45 = vpack.c.bf16 %v3115_v32, %v3114_v7 }
0x27b2   :  { %3965 = vmatmul.mubr.msk.bf16.vlgmr.msra.gmra.mrb[72].mxu0 %vm164_vm0, %v3121_v45 }
0x27b3   :  { %3984 = vmatprep.mubr.msk.bf16.mxu0 %vm4322_vm1, %v4321_v23  ;;  %3977 = vmatpush3.bf16.msra.mxu0 %v3296_v31  ;;  %vm3484_vm1 = vcmask 259072  }
0x27b4   :  { %3978 = vmatprep.subr.bf16.mxu0 %v4321_v23 }
0x27b7   :  { %3979 = vmatpush3.bf16.msra.mxu0 %v3297_v36 }
0x27b8   :  { %3980 = vmatprep.subr.bf16.mxu0 %v4321_v23 }
0x27bb   :  { %3981 = vmatpush3.bf16.msra.mxu0 %v3298_v12 }
0x27bc   :  { %3982 = vmatprep.subr.bf16.mxu0 %v4321_v23 }
0x27bf   :  { %3983 = vmatpush3.bf16.msra.mxu0 %v3299_v28 }
0x2885   :  { %v3169_v26 = vpop.f32.mrb[72].mxu0 }
0x2886   :  { %v3170_v61 = vadd.f32 %v3568_v8, %v3169_v26  ;;  %v3966_v25 = vpop.f32.mrb[73].mxu0 }
0x2887   :  { %v3172_v52 = vpop.f32.mrb[74].mxu0 }
0x2888   :  { %v3176_v42 = vadd.f32 %v3170_v61, %v5490_v27  ;;  %v3173_v11 = vadd.f32 %v3568_v8, %v3172_v52  ;;  %v3967_v29 = vpop.f32.mrb[75].mxu0  ;;  %v3590_v61 = vld [vmem:[%s5715_s19 + $0x1] ss:$0 sm:$0xff] }
0x288a   :  { %v3177_v59 = vadd.f32 %v3173_v11, %v5492_v33  ;;  %v3182_v39 = vsel %vm164_vm0, %v3176_v42, 0.0  ;;  %v3574_v33 = vld [vmem:[%s5710_s16 + $0x20] sm:$0xff] }
0x288b   :  { %3183 = vadd.xlane.f32.xlu1 %v3182_v39  ;;  %v3230_v46 = vpack.c.bf16 %v3575_v17, %v3574_v33 }
0x288c   :  { %v3185_v19 = vsel %vm164_vm0, %v3177_v59, 0.0 }
0x288d   :  { %3186 = vadd.xlane.f32.xlu0 %v3185_v19  ;;  %3969 = vmatpush3.bf16.msra.mxu1 %v3230_v46  ;;  %v3400_v46 = vld [vmem:[%s5718_s3] sm:$0xff] }
0x288e   :  { %3970 = vmatprep.subr.bf16.mxu1 %v4321_v23 }
0x2891   :  { %3971 = vmatpush3.bf16.msra.mxu1 %v3231_v49 }
0x2918   :  { %v3184_v44 = vpop.xlane.xlu1 %3183 }
0x2919   :  { %v3188_v40 = vmul.f32 0.03125, %v3184_v44 }
0x291a   :  { %v3187_v22 = vpop.xlane.xlu0 %3186 }
0x291b   :  { %v3190_v3 = vsub.f32 %v3176_v42, %v3188_v40  ;;  %v3189_v21 = vmul.f32 0.03125, %v3187_v22 }
0x291d   :  { %v3191_v6 = vsub.f32 %v3177_v59, %v3189_v21  ;;  %v3192_v30 = vmul.f32 %v3190_v3, %v3190_v3 }
0x291f   :  { %v3194_v35 = vsel %vm164_vm0, %v3192_v30, 0.0  ;;  %v3193_v27 = vmul.f32 %v3191_v6, %v3191_v6 }
0x2920   :  { %3195 = vadd.xlane.f32.xlu0 %v3194_v35 }
0x2921   :  { %v3197_v13 = vsel %vm164_vm0, %v3193_v27, 0.0 }
0x2922   :  { %3198 = vadd.xlane.f32.xlu1 %v3197_v13 }
0x29ad   :  { %v3196_v43 = vpop.xlane.xlu0 %3195 }
0x29ae   :  { %v3200_v18 = vmul.f32 0.03125, %v3196_v43 }
0x29af   :  { %v3199_v14 = vpop.xlane.xlu1 %3198 }
0x29b0   :  { %v3202_v55 = vadd.f32 1e-05, %v3200_v18  ;;  %v3201_v53 = vmul.f32 0.03125, %v3199_v14 }
0x29b2   :  { %4311 = vrsqrt.f32 %v3202_v55  ;;  %v3203_v24 = vadd.f32 1e-05, %v3201_v53  ;;  %v3595_v55 = vld [vmem:[%s5717_s21 + $0x1] ss:$0 sm:$0xff] }
0x29b4   :  { %4313 = vrsqrt.f32 %v3203_v24 }
0x29bc   :  { %v4312_v56 = vpop.eup %4311 }
0x29bd   :  { %v3206_v10 = vmul.f32 %v4312_v56, %v3190_v3 }
0x29be   :  { %v4314_v38 = vpop.eup %4313 }
0x29bf   :  { %v3214_v62 = vmul.f32 %v3572_v34, %v3206_v10  ;;  %v3207_v37 = vmul.f32 %v4314_v38, %v3191_v6  ;;  %v3401_v10 = vld [vmem:[%s5718_s3 + $0x8] sm:$0x3f] }
0x29c1   :  { %v3215_v1 = vmul.f32 %v3572_v34, %v3207_v37  ;;  %v3222_v15 = vadd.f32 %v3573_v60, %v3214_v62 }
0x29c3   :  { %v3223_v20 = vadd.f32 %v3573_v60, %v3215_v1 }
0x29c5   :  { %v3229_v0 = vpack.c.bf16 %v3223_v20, %v3222_v15 }
0x29c7   :  { %3973 = vmatmul.mubr.msk.bf16.vlgmr.msra.gmra.mrb[72].mxu1 %vm164_vm0, %v3229_v0 }
0x29c8   :  { %3992 = vmatprep.mubr.msk.f32.mxu1 %vm1797_vm14, %v3400_v46 }
0x2a9a   :  { %v3277_v5 = vpop.f32.mrb[72].mxu1 }
0x2a9b   :  { %v3278_v16 = vadd.f32 %v3579_v57, %v3277_v5  ;;  %v3974_v63 = vpop.f32.mrb[73].mxu1 }
0x2a9c   :  { %v3280_v32 = vpop.f32.mrb[74].mxu1 }
0x2a9d   :  { %v3281_v7 = vadd.f32 %v3579_v57, %v3280_v32  ;;  %v3975_v23 = vpop.f32.mrb[75].mxu1  ;;  %v3284_v45 = vmax.f32 %v3278_v16, 0.0 }
0x2a9f   :  { %v3285_v8 = vmax.f32 %v3281_v7, 0.0 }
0x2aa1   :  { %v3295_v26 = vpack.c.bf16 %v3285_v8, %v3284_v45 }
0x2aa3   :  { %3985 = vmatmul.mubr.msk.bf16.vlgmr.msra.gmra.mrb[76].mxu0 %vm259_vm4, %v3295_v26 }
0x2b76   :  { %v3345_v25 = vpop.f32.mrb[76].mxu0 }
0x2b77   :  { %v3346_v52 = vadd.f32 %v3590_v61, %v3345_v25  ;;  %v3986_v42 = vpop.f32.mrb[77].mxu0 }
0x2b78   :  { %v3348_v11 = vpop.f32.mrb[78].mxu0 }
0x2b79   :  { %v3352_v29 = vadd.f32 %v3346_v52, %v3222_v15  ;;  %v3349_v59 = vadd.f32 %v3590_v61, %v3348_v11  ;;  %v3987_v39 = vpop.f32.mrb[79].mxu0 }
0x2b7b   :  { %v3353_v19 = vadd.f32 %v3349_v59, %v3223_v20  ;;  %v3358_v44 = vsel %vm164_vm0, %v3352_v29, 0.0 }
0x2b7c   :  { %3359 = vadd.xlane.f32.xlu0 %v3358_v44 }
0x2b7d   :  { %v3361_v40 = vsel %vm164_vm0, %v3353_v19, 0.0 }
0x2b7e   :  { %3362 = vadd.xlane.f32.xlu1 %v3361_v40 }
0x2c09   :  { %v3360_v22 = vpop.xlane.xlu0 %3359 }
0x2c0a   :  { %v3364_v3 = vmul.f32 0.03125, %v3360_v22 }
0x2c0b   :  { %v3363_v21 = vpop.xlane.xlu1 %3362 }
0x2c0c   :  { %v3366_v6 = vsub.f32 %v3352_v29, %v3364_v3  ;;  %v3365_v30 = vmul.f32 0.03125, %v3363_v21 }
0x2c0e   :  { %v3367_v35 = vsub.f32 %v3353_v19, %v3365_v30  ;;  %v3368_v27 = vmul.f32 %v3366_v6, %v3366_v6 }
0x2c10   :  { %v3370_v13 = vsel %vm164_vm0, %v3368_v27, 0.0  ;;  %v3369_v33 = vmul.f32 %v3367_v35, %v3367_v35 }
0x2c11   :  { %3371 = vadd.xlane.f32.xlu0 %v3370_v13 }
0x2c12   :  { %v3373_v17 = vsel %vm164_vm0, %v3369_v33, 0.0 }
0x2c13   :  { %3374 = vadd.xlane.f32.xlu1 %v3373_v17 }
0x2c9e   :  { %v3372_v47 = vpop.xlane.xlu0 %3371 }
0x2c9f   :  { %v3376_v48 = vmul.f32 0.03125, %v3372_v47 }
0x2ca0   :  { %v3375_v49 = vpop.xlane.xlu1 %3374 }
0x2ca1   :  { %v3378_v50 = vadd.f32 1e-05, %v3376_v48  ;;  %v3377_v4 = vmul.f32 0.03125, %v3375_v49 }
0x2ca3   :  { %4315 = vrsqrt.f32 %v3378_v50  ;;  %v3379_v51 = vadd.f32 1e-05, %v3377_v4 }
0x2ca5   :  { %4317 = vrsqrt.f32 %v3379_v51 }
0x2cad   :  { %v4316_v31 = vpop.eup %4315 }
0x2cae   :  { %v3382_v36 = vmul.f32 %v4316_v31, %v3366_v6 }
0x2caf   :  { %v4318_v43 = vpop.eup %4317 }
0x2cb0   :  { %v3383_v18 = vmul.f32 %v4318_v43, %v3367_v35  ;;  %v3390_v14 = vmul.f32 %v3594_v54, %v3382_v36 }
0x2cb2   :  { %v3391_v53 = vmul.f32 %v3594_v54, %v3383_v18  ;;  %v3398_v24 = vadd.f32 %v3595_v55, %v3390_v14 }
0x2cb4   :  { %v3399_v56 = vadd.f32 %v3595_v55, %v3391_v53 }
0x2cb6   :  { %v4001_v34 = vpack.c.bf16 %v3399_v56, %v3398_v24 }
0x2cb8   :  { %4002 = vmatprep.subr.bf16.mxu1 %v4001_v34 }
0x2cb9   :  { %4004 = vmatpush3.bf16.msra.mxu1 %v4001_v34 }
0x2cbc   :  { %3993 = vmatmul.mubr.msk.f32.vlgmr.msra.gmra.mrb[30].mxu1 %vm1797_vm14, %v3401_v10 }
0x2d8f   :  { %v3994_v38 = vpop.f32.mrb[30].mxu1 }
0x2d90   :  { %3485 = vst.msk [vmem:[%s5719_s22 + $0x8] sm:$0x3f] %vm3484_vm1, %v3994_v38  ;;  %v3474_v62 = vpop.f32.mrb[31].mxu1 }
0x2d91   :  { %3483 = vst.msk [vmem:[%s5719_s22] sm:$0xff] %vm164_vm0, %v3474_v62 }

</bundles_post_ra>
